<compile_context>
chip_gen: v6e
topology: v6e:2x2x1
jax: 0.10.0
libtpu: 0.0.40
codegen_flags: <defaults>
</compile_context>

<pallas_src>
import jax
import jax.numpy as jnp
from jax import lax
from jax.experimental import pallas as pl
from jax.experimental.pallas import tpu as pltpu


# ----------------------------- Pallas kernel ------------------------------- #

def _make_bilstm_kernel(T, B, D, H):
    """Fused bidirectional LSTM layer kernel.

    Kernel refs (one grid step = one LSTM / weight set):
      x_ref:    (T, B, D)    f32   time-major input (shared across grid)
      mask_ref: (T, B, 1)    f32   1.0 inside sequence, 0.0 at (trailing) padding
      wih_ref:  (D, 8H)      bf16  columns = [i_f i_b | f_f f_b | g_f g_b | o_f o_b]
      whh_ref:  (2H, 8H)     bf16  rows 0:H -> fwd gate cols, H:2H -> bwd gate cols
      b_ref:    (1, 8H)      f32   b_ih + b_hh, both directions (same column layout)
      out_ref:  (T, B, 2H)   f32   [:, :, :H]=fwd, [:, :, H:]=bwd; zeros at padding
    """
    G2 = 8 * H   # fused gate width (both directions, gate-interleaved)
    HH = 2 * H   # state width [fwd | bwd]

    def kernel(x_ref, mask_ref, wih_ref, whh_ref, b_ref, out_ref):
        # ---- hoisted lane maps / constants (no per-iteration broadcast_in_dim) ----
        lane_g = lax.broadcasted_iota(jnp.int32, (1, G2), 1)
        is_fwd_g = jnp.broadcast_to((lane_g % HH) < H, (B, G2))         # fwd lanes per gate
        is_g_gate = (lane_g >= 4 * H) & (lane_g < 6 * H)                # the "g" (cell) gate
        # sigmoid(x) = 0.5*tanh(0.5*x) + 0.5 ; tanh lanes keep scale=1, shift=0
        a_scale = jnp.broadcast_to(
            jnp.where(is_g_gate, 1.0, 0.5).astype(jnp.float32), (B, G2))
        a_shift = jnp.broadcast_to(
            jnp.where(is_g_gate, 0.0, 0.5).astype(jnp.float32), (B, G2))
        lane_h = lax.broadcasted_iota(jnp.int32, (1, HH), 1)
        is_fwd_h = jnp.broadcast_to(lane_h < H, (B, HH))

        # ---- prologue: input projection, all timesteps, both directions (1 MXU matmul)
        x2d = x_ref[...].reshape(T * B, D).astype(jnp.bfloat16)
        xp = jnp.dot(x2d, wih_ref[...],
                     preferred_element_type=jnp.float32) + b_ref[...]   # (T*B, 8H) f32
        whh = whh_ref[...]                                              # (2H, 8H) bf16
        m_all = mask_ref[...]                                           # (T, B, 1)  f32

        h = jnp.zeros((B, HH), jnp.float32)                             # [h_fwd | h_bwd]
        c = jnp.zeros((B, HH), jnp.float32)

        # ---- recurrence: statically unrolled; fwd walks t=0..T-1, bwd walks T-1..0 ----
        for s in range(T):
            r = T - 1 - s
            hh = jnp.dot(h.astype(jnp.bfloat16), whh,
                         preferred_element_type=jnp.float32)            # (B, 8H)
            x_t = jnp.where(is_fwd_g,
                            xp[s * B:(s + 1) * B],
                            xp[r * B:(r + 1) * B])                      # (B, 8H)
            gates = hh + x_t
            act = a_scale * jnp.tanh(gates * a_scale) + a_shift         # fused sigmoid/tanh

            i_g = act[:, 0:HH]
            f_g = act[:, HH:2 * HH]
            g_g = act[:, 2 * HH:3 * HH]
            o_g = act[:, 3 * HH:4 * HH]

            c_new = f_g * c + i_g * g_g                                 # (B, 2H)
            h_new = o_g * jnp.tanh(c_new)                               # (B, 2H)

            m_f = m_all[s]                                              # (B, 1)
            m_b = m_all[r]                                              # (B, 1)
            keep = jnp.where(is_fwd_h, m_f, m_b) > 0.5                  # (B, 2H)
            # packed-sequence semantics: padded steps freeze state and emit zeros
            h = jnp.where(keep, h_new, h)
            c = jnp.where(keep, c_new, c)

            out_ref[s, :, 0:H] = m_f * h_new[:, 0:H]
            out_ref[r, :, H:2 * H] = m_b * h_new[:, H:2 * H]

    return kernel


def _bilstm_layer(x_tm, mask_tm, wih, whh, bias, H):
    """Run NL independent bidirectional LSTMs over the same time-major input.

    x_tm: (T, B, D) f32; wih: (NL, D, 8H) bf16; whh: (NL, 2H, 8H) bf16; bias: (NL, 1, 8H) f32
    Returns (NL, T, B, 2H) f32.
    """
    NL, D, G2 = wih.shape
    T, B, _ = x_tm.shape
    kernel = _make_bilstm_kernel(T, B, D, H)
    return pl.pallas_call(
        kernel,
        out_shape=jax.ShapeDtypeStruct((NL, T, B, 2 * H), jnp.float32),
        grid=(NL,),
        in_specs=[
            pl.BlockSpec((T, B, D), lambda g: (0, 0, 0)),          # shared input
            pl.BlockSpec((T, B, 1), lambda g: (0, 0, 0)),          # shared mask
            pl.BlockSpec((None, D, G2), lambda g: (g, 0, 0)),
            pl.BlockSpec((None, 2 * H, G2), lambda g: (g, 0, 0)),
            pl.BlockSpec((None, 1, G2), lambda g: (g, 0, 0)),
        ],
        out_specs=pl.BlockSpec((None, T, B, 2 * H), lambda g: (g, 0, 0, 0)),
        compiler_params=pltpu.CompilerParams(
            dimension_semantics=("parallel",),          # independent LSTMs -> 2nd TC on v7x
            vmem_limit_bytes=32 * 1024 * 1024),
    )(x_tm, mask_tm, wih, whh, bias)


# ------------------------------- model glue -------------------------------- #

def _forward_impl(input_ids, attention_mask, params, H):
    """input_ids: (B, T, 300) float embeddings; attention_mask: (B, T) {0,1}."""
    B, T, _ = input_ids.shape
    mask_bt = attention_mask.astype(jnp.float32)
    lengths = jnp.sum(attention_mask, axis=1).astype(jnp.int32)
    last = jnp.maximum(lengths - 1, 0)                  # guard length-0 sequences

    x_tm = jnp.transpose(input_ids, (1, 0, 2)).astype(jnp.float32)   # (T, B, D)
    mask_tm = jnp.transpose(mask_bt, (1, 0))[:, :, None]             # (T, B, 1)

    # Level 1: t_lstm and s_lstm fused into one pallas_call (grid-parallel over the 2 LSTMs).
    out1 = _bilstm_layer(x_tm, mask_tm,
                         params['l1_wih'], params['l1_whh'], params['l1_b'], H)
    t_out, s_out = out1[0], out1[1]                                   # (T, B, 2H) each

    # Level 2 (meta) LSTM over concat(t_out, s_out).
    meta = jnp.concatenate([t_out, s_out], axis=-1)                   # (T, B, 4H)
    out2 = _bilstm_layer(meta, mask_tm,
                         params['l2_wih'], params['l2_whh'], params['l2_b'], H)[0]

    b_idx = jnp.arange(B)
    s_red = jnp.concatenate([s_out[last, b_idx, :H], s_out[0, :, H:]], axis=1)   # (B, 2H)
    o_red = jnp.concatenate([out2[last, b_idx, :H], out2[0, :, H:]], axis=1)     # (B, 2H)

    # Token head (plain jnp — tiny matmul, XLA fuses it; dropout = identity in eval).
    token_in = jnp.concatenate([t_out, out2], axis=-1)                # (T, B, 4H)
    tok = jnp.dot(token_in.reshape(T * B, 4 * H), params['token_w']) + params['token_b']
    token_logits = tok.reshape(T, B, -1).transpose(1, 0, 2)           # (B, T, n_token_labels)

    # Sequence head: dense -> tanh -> out_proj (dropouts = identity in eval).
    seq_in = jnp.concatenate([s_red, o_red], axis=1)                  # (B, 4H)
    hid = jnp.tanh(jnp.dot(seq_in, params['seq_dense_w']) + params['seq_dense_b'])
    seq_logits = jnp.dot(hid, params['seq_out_w']) + params['seq_out_b']
    return token_logits, seq_logits


forward = jax.jit(_forward_impl, static_argnums=(3,))


# ------------------------------ parameter init ------------------------------ #

def _uniform(key, shape, scale):
    return jax.random.uniform(key, shape, jnp.float32, -scale, scale)


def _interleave_gates(a_f, a_b, H):
    """(..., 4H) fwd + (..., 4H) bwd -> (..., 8H) [i_f i_b | f_f f_b | g_f g_b | o_f o_b]."""
    lead = a_f.shape[:-1]
    a_f = a_f.reshape(lead + (4, 1, H))
    a_b = a_b.reshape(lead + (4, 1, H))
    return jnp.concatenate([a_f, a_b], axis=-2).reshape(lead + (8 * H,))


def _init_bilstm(key, D, H):
    """PyTorch-style init for one bidirectional LSTM layer, packed for the fused kernel."""
    s = 1.0 / float(H) ** 0.5
    ks = jax.random.split(key, 8)
    wih_f = _uniform(ks[0], (D, 4 * H), s)
    whh_f = _uniform(ks[1], (H, 4 * H), s)
    b_f = _uniform(ks[2], (1, 4 * H), s) + _uniform(ks[3], (1, 4 * H), s)   # b_ih + b_hh
    wih_b = _uniform(ks[4], (D, 4 * H), s)
    whh_b = _uniform(ks[5], (H, 4 * H), s)
    b_b = _uniform(ks[6], (1, 4 * H), s) + _uniform(ks[7], (1, 4 * H), s)

    wih = _interleave_gates(wih_f, wih_b, H)                          # (D, 8H)
    zero = jnp.zeros_like(whh_f)
    whh = jnp.concatenate(
        [_interleave_gates(whh_f, zero, H),                           # rows 0:H  -> fwd cols
         _interleave_gates(zero, whh_b, H)], axis=0)                  # rows H:2H -> bwd cols
    bias = _interleave_gates(b_f, b_b, H)                             # (1, 8H)
    return wih, whh, bias


def init_params(key, H, emb, num_labels, num_token_labels):
    ks = jax.random.split(key, 8)
    wih_t, whh_t, b_t = _init_bilstm(ks[0], emb, H)
    wih_s, whh_s, b_s = _init_bilstm(ks[1], emb, H)
    wih_m, whh_m, b_m = _init_bilstm(ks[2], 4 * H, H)
    return {
        # level-1 stack: index 0 = t_lstm, 1 = s_lstm
        'l1_wih': jnp.stack([wih_t, wih_s]).astype(jnp.bfloat16),     # (2, emb, 8H)
        'l1_whh': jnp.stack([whh_t, whh_s]).astype(jnp.bfloat16),     # (2, 2H, 8H)
        'l1_b': jnp.stack([b_t, b_s]),                                # (2, 1, 8H) f32
        # level-2 (meta) LSTM
        'l2_wih': wih_m[None].astype(jnp.bfloat16),                   # (1, 4H, 8H)
        'l2_whh': whh_m[None].astype(jnp.bfloat16),                   # (1, 2H, 8H)
        'l2_b': b_m[None],                                            # (1, 1, 8H) f32
        # heads
        'token_w': _uniform(ks[3], (4 * H, num_token_labels), 0.1),
        'token_b': _uniform(ks[4], (1, num_token_labels), 0.1),
        'seq_dense_w': _uniform(ks[5], (4 * H, 4 * H), 0.1),
        'seq_dense_b': jnp.zeros((1, 4 * H), jnp.float32),
        'seq_out_w': _uniform(ks[6], (4 * H, num_labels), 0.1),
        'seq_out_b': _uniform(ks[7], (1, num_labels), 0.1),
    }


# ----------------------------------- main ----------------------------------- #

if __name__ == "__main__":
    B, T, EMB = 2, 8, 300            # input_ids are 300-d embeddings (s/t LSTM input_size=300)
    H = 32                           # rnn_hidden_dimension
    NUM_LABELS, NUM_TOKEN_LABELS = 3, 5

    key = jax.random.PRNGKey(0)
    k_in, k_p = jax.random.split(key)

    input_ids = jax.random.normal(k_in, (B, T, EMB), jnp.float32)
    lengths = jnp.array([T, 5], dtype=jnp.int32)
    attention_mask = (jnp.arange(T)[None, :] < lengths[:, None]).astype(jnp.int32)

    params = init_params(k_p, H, EMB, NUM_LABELS, NUM_TOKEN_LABELS)

    token_logits, seq_logits = forward(input_ids, attention_mask, params, H)
    jax.block_until_ready((token_logits, seq_logits))

    assert token_logits.shape == (B, T, NUM_TOKEN_LABELS)
    assert seq_logits.shape == (B, NUM_LABELS)
    assert bool(jnp.all(jnp.isfinite(token_logits))) and bool(jnp.all(jnp.isfinite(seq_logits)))
    print("KERNEL_OK")
</pallas_src>

<mosaic_0001>
module attributes {stable_mosaic.version = 11 : i64} {
  func.func @kernel(%arg0: i32, %arg1: memref<8x2x300xf32, #tpu.memory_space<vmem>>, %arg2: memref<8x2x1xf32, #tpu.memory_space<vmem>>, %arg3: memref<1x300x256xbf16, #tpu.memory_space<vmem>>, %arg4: memref<1x64x256xbf16, #tpu.memory_space<vmem>>, %arg5: memref<1x1x256xf32, #tpu.memory_space<vmem>>, %arg6: memref<1x8x2x64xf32, #tpu.memory_space<vmem>>) attributes {dimension_semantics = [#tpu.dimension_semantics<parallel>], iteration_bounds = array<i64: 2>, scalar_prefetch = 0 : i64, scratch_operands = 0 : i64, tpu.core_type = #tpu.core_type<tc>, window_params = [{pipeline_mode = #tpu.pipeline_mode<synchronous>, transform_indices = @transform_0, window_bounds = array<i64: 8, 2, 300>}, {pipeline_mode = #tpu.pipeline_mode<synchronous>, transform_indices = @transform_1, window_bounds = array<i64: 8, 2, 1>}, {transform_indices = @transform_2, window_bounds = array<i64: 1, 300, 256>}, {transform_indices = @transform_3, window_bounds = array<i64: 1, 64, 256>}, {transform_indices = @transform_4, window_bounds = array<i64: 1, 1, 256>}, {transform_indices = @transform_5, window_bounds = array<i64: 1, 8, 2, 64>}]} {
    %0 = tpu.iota {dimensions = array<i32: 1>} : vector<1x256xi32>
    %c64_i32 = arith.constant 64 : i32
    %c0_i32 = arith.constant 0 : i32
    %1 = arith.cmpi eq, %c64_i32, %c0_i32 : i32
    %c1_i32 = arith.constant 1 : i32
    %2 = arith.select %1, %c1_i32, %c64_i32 : i32
    %3 = vector.broadcast %2 : i32 to vector<1x256xi32>
    %4 = arith.remsi %0, %3 : vector<1x256xi32>
    %c0_i32_0 = arith.constant 0 : i32
    %5 = vector.broadcast %c0_i32_0 : i32 to vector<1x256xi32>
    %6 = arith.cmpi ne, %4, %5 : vector<1x256xi32>
    %c0_i32_1 = arith.constant 0 : i32
    %7 = vector.broadcast %c0_i32_1 : i32 to vector<1x256xi32>
    %8 = arith.cmpi slt, %4, %7 : vector<1x256xi32>
    %c0_i32_2 = arith.constant 0 : i32
    %9 = arith.cmpi slt, %2, %c0_i32_2 : i32
    %10 = vector.broadcast %9 : i1 to vector<1x256xi1>
    %11 = vector.broadcast %10 : vector<1x256xi1> to vector<1x256xi1>
    %12 = arith.xori %8, %11 : vector<1x256xi1>
    %13 = arith.andi %12, %6 : vector<1x256xi1>
    %14 = vector.broadcast %2 : i32 to vector<1x256xi32>
    %15 = arith.addi %4, %14 : vector<1x256xi32>
    %16 = arith.select %13, %15, %4 : vector<1x256xi1>, vector<1x256xi32>
    %c32_i32 = arith.constant 32 : i32
    %17 = vector.broadcast %c32_i32 : i32 to vector<1x256xi32>
    %18 = arith.cmpi slt, %16, %17 : vector<1x256xi32>
    %19 = vector.shape_cast %18 : vector<1x256xi1> to vector<1x256xi1>
    %20 = vector.broadcast %19 : vector<1x256xi1> to vector<2x256xi1>
    %c128_i32 = arith.constant 128 : i32
    %21 = vector.broadcast %c128_i32 : i32 to vector<1x256xi32>
    %22 = arith.cmpi sge, %0, %21 : vector<1x256xi32>
    %c192_i32 = arith.constant 192 : i32
    %23 = vector.broadcast %c192_i32 : i32 to vector<1x256xi32>
    %24 = arith.cmpi slt, %0, %23 : vector<1x256xi32>
    %25 = arith.andi %22, %24 : vector<1x256xi1>
    %cst = arith.constant 1.000000e+00 : f32
    %cst_3 = arith.constant 5.000000e-01 : f32
    %26 = vector.broadcast %cst : f32 to vector<1x256xf32>
    %27 = vector.broadcast %cst_3 : f32 to vector<1x256xf32>
    %28 = arith.select %25, %26, %27 : vector<1x256xi1>, vector<1x256xf32>
    %29 = vector.shape_cast %28 : vector<1x256xf32> to vector<1x256xf32>
    %30 = vector.broadcast %29 : vector<1x256xf32> to vector<2x256xf32>
    %cst_4 = arith.constant 0.000000e+00 : f32
    %cst_5 = arith.constant 5.000000e-01 : f32
    %31 = vector.broadcast %cst_4 : f32 to vector<1x256xf32>
    %32 = vector.broadcast %cst_5 : f32 to vector<1x256xf32>
    %33 = arith.select %25, %31, %32 : vector<1x256xi1>, vector<1x256xf32>
    %34 = vector.shape_cast %33 : vector<1x256xf32> to vector<1x256xf32>
    %35 = vector.broadcast %34 : vector<1x256xf32> to vector<2x256xf32>
    %36 = tpu.iota {dimensions = array<i32: 1>} : vector<1x64xi32>
    %c32_i32_6 = arith.constant 32 : i32
    %37 = vector.broadcast %c32_i32_6 : i32 to vector<1x64xi32>
    %38 = arith.cmpi slt, %36, %37 : vector<1x64xi32>
    %39 = vector.shape_cast %38 : vector<1x64xi1> to vector<1x64xi1>
    %40 = vector.broadcast %39 : vector<1x64xi1> to vector<2x64xi1>
    %c0 = arith.constant 0 : index
    %c0_7 = arith.constant 0 : index
    %c0_8 = arith.constant 0 : index
    %41 = vector.load %arg1[%c0, %c0_7, %c0_8] : memref<8x2x300xf32, #tpu.memory_space<vmem>>, vector<8x2x300xf32>
    %42 = vector.shape_cast %41 : vector<8x2x300xf32> to vector<16x300xf32>
    %43 = arith.truncf %42 : vector<16x300xf32> to vector<16x300xbf16>
    %c0_9 = arith.constant 0 : index
    %c0_10 = arith.constant 0 : index
    %c0_11 = arith.constant 0 : index
    %44 = vector.load %arg3[%c0_9, %c0_10, %c0_11] : memref<1x300x256xbf16, #tpu.memory_space<vmem>>, vector<1x300x256xbf16>
    %45 = vector.shape_cast %44 : vector<1x300x256xbf16> to vector<300x256xbf16>
    %cst_12 = arith.constant dense<0.000000e+00> : vector<16x256xf32>
    %46 = tpu.matmul %43, %45, %cst_12 {dimension_numbers = #tpu.dot_dimension_numbers<[1], [0], [0], [1], [0, 0, 1, 1], [], []>} : vector<16x300xbf16>, vector<300x256xbf16>, vector<16x256xf32> -> vector<16x256xf32>
    %c0_13 = arith.constant 0 : index
    %c0_14 = arith.constant 0 : index
    %c0_15 = arith.constant 0 : index
    %47 = vector.load %arg5[%c0_13, %c0_14, %c0_15] : memref<1x1x256xf32, #tpu.memory_space<vmem>>, vector<1x1x256xf32>
    %48 = vector.shape_cast %47 : vector<1x1x256xf32> to vector<1x256xf32>
    %49 = vector.broadcast %48 : vector<1x256xf32> to vector<16x256xf32>
    %50 = arith.addf %46, %49 : vector<16x256xf32>
    %c0_16 = arith.constant 0 : index
    %c0_17 = arith.constant 0 : index
    %c0_18 = arith.constant 0 : index
    %51 = vector.load %arg4[%c0_16, %c0_17, %c0_18] : memref<1x64x256xbf16, #tpu.memory_space<vmem>>, vector<1x64x256xbf16>
    %52 = vector.shape_cast %51 : vector<1x64x256xbf16> to vector<64x256xbf16>
    %c0_19 = arith.constant 0 : index
    %c0_20 = arith.constant 0 : index
    %c0_21 = arith.constant 0 : index
    %53 = vector.load %arg2[%c0_19, %c0_20, %c0_21] : memref<8x2x1xf32, #tpu.memory_space<vmem>>, vector<8x2x1xf32>
    %cst_22 = arith.constant 0.000000e+00 : f32
    %54 = vector.broadcast %cst_22 : f32 to vector<2x64xf32>
    %cst_23 = arith.constant 0.000000e+00 : f32
    %55 = vector.broadcast %cst_23 : f32 to vector<2x64xf32>
    %56 = arith.truncf %54 : vector<2x64xf32> to vector<2x64xbf16>
    %cst_24 = arith.constant dense<0.000000e+00> : vector<2x256xf32>
    %57 = tpu.matmul %56, %52, %cst_24 {dimension_numbers = #tpu.dot_dimension_numbers<[1], [0], [0], [1], [0, 0, 1, 1], [], []>} : vector<2x64xbf16>, vector<64x256xbf16>, vector<2x256xf32> -> vector<2x256xf32>
    %58 = vector.extract_strided_slice %50 {offsets = [0, 0], sizes = [2, 256], strides = [1, 1]} : vector<16x256xf32> to vector<2x256xf32>
    %59 = vector.extract_strided_slice %50 {offsets = [14, 0], sizes = [2, 256], strides = [1, 1]} : vector<16x256xf32> to vector<2x256xf32>
    %60 = arith.select %20, %58, %59 : vector<2x256xi1>, vector<2x256xf32>
    %61 = arith.addf %57, %60 : vector<2x256xf32>
    %62 = arith.mulf %61, %30 : vector<2x256xf32>
    %63 = math.tanh %62 : vector<2x256xf32>
    %64 = arith.mulf %30, %63 : vector<2x256xf32>
    %65 = arith.addf %64, %35 : vector<2x256xf32>
    %66 = vector.extract_strided_slice %65 {offsets = [0, 0], sizes = [2, 64], strides = [1, 1]} : vector<2x256xf32> to vector<2x64xf32>
    %67 = vector.extract_strided_slice %65 {offsets = [0, 64], sizes = [2, 64], strides = [1, 1]} : vector<2x256xf32> to vector<2x64xf32>
    %68 = vector.extract_strided_slice %65 {offsets = [0, 128], sizes = [2, 64], strides = [1, 1]} : vector<2x256xf32> to vector<2x64xf32>
    %69 = vector.extract_strided_slice %65 {offsets = [0, 192], sizes = [2, 64], strides = [1, 1]} : vector<2x256xf32> to vector<2x64xf32>
    %70 = arith.mulf %67, %55 : vector<2x64xf32>
    %71 = arith.mulf %66, %68 : vector<2x64xf32>
    %72 = arith.addf %70, %71 : vector<2x64xf32>
    %73 = math.tanh %72 : vector<2x64xf32>
    %74 = arith.mulf %69, %73 : vector<2x64xf32>
    %75 = vector.extract_strided_slice %53 {offsets = [0, 0, 0], sizes = [1, 2, 1], strides = [1, 1, 1]} : vector<8x2x1xf32> to vector<1x2x1xf32>
    %76 = vector.shape_cast %75 : vector<1x2x1xf32> to vector<2x1xf32>
    %77 = vector.extract_strided_slice %53 {offsets = [7, 0, 0], sizes = [1, 2, 1], strides = [1, 1, 1]} : vector<8x2x1xf32> to vector<1x2x1xf32>
    %78 = vector.shape_cast %77 : vector<1x2x1xf32> to vector<2x1xf32>
    %79 = vector.shape_cast %76 : vector<2x1xf32> to vector<2x1xf32>
    %80 = vector.broadcast %79 : vector<2x1xf32> to vector<2x64xf32>
    %81 = vector.shape_cast %78 : vector<2x1xf32> to vector<2x1xf32>
    %82 = vector.broadcast %81 : vector<2x1xf32> to vector<2x64xf32>
    %83 = arith.select %40, %80, %82 : vector<2x64xi1>, vector<2x64xf32>
    %cst_25 = arith.constant 5.000000e-01 : f32
    %84 = vector.broadcast %cst_25 : f32 to vector<2x64xf32>
    %85 = arith.cmpf ogt, %83, %84 : vector<2x64xf32>
    %86 = arith.select %85, %74, %54 : vector<2x64xi1>, vector<2x64xf32>
    %87 = arith.select %85, %72, %55 : vector<2x64xi1>, vector<2x64xf32>
    %88 = vector.extract_strided_slice %74 {offsets = [0, 0], sizes = [2, 32], strides = [1, 1]} : vector<2x64xf32> to vector<2x32xf32>
    %89 = vector.broadcast %76 : vector<2x1xf32> to vector<2x32xf32>
    %90 = arith.mulf %89, %88 : vector<2x32xf32>
    %c0_26 = arith.constant 0 : index
    %c0_27 = arith.constant 0 : index
    %c0_28 = arith.constant 0 : index
    %c0_29 = arith.constant 0 : index
    %91 = vector.load %arg6[%c0_26, %c0_27, %c0_28, %c0_29] : memref<1x8x2x64xf32, #tpu.memory_space<vmem>>, vector<1x1x2x32xf32>
    %92 = vector.shape_cast %91 : vector<1x1x2x32xf32> to vector<2x32xf32>
    %93 = vector.shape_cast %90 : vector<2x32xf32> to vector<1x1x2x32xf32>
    tpu.vector_store %arg6[%c0_26, %c0_27, %c0_28, %c0_29], %93 {strides = array<i32>} : memref<1x8x2x64xf32, #tpu.memory_space<vmem>>, vector<1x1x2x32xf32>,
    %94 = vector.extract_strided_slice %74 {offsets = [0, 32], sizes = [2, 32], strides = [1, 1]} : vector<2x64xf32> to vector<2x32xf32>
    %95 = vector.broadcast %78 : vector<2x1xf32> to vector<2x32xf32>
    %96 = arith.mulf %95, %94 : vector<2x32xf32>
    %c0_30 = arith.constant 0 : index
    %c7 = arith.constant 7 : index
    %c0_31 = arith.constant 0 : index
    %c32 = arith.constant 32 : index
    %97 = vector.load %arg6[%c0_30, %c7, %c0_31, %c32] : memref<1x8x2x64xf32, #tpu.memory_space<vmem>>, vector<1x1x2x32xf32>
    %98 = vector.shape_cast %97 : vector<1x1x2x32xf32> to vector<2x32xf32>
    %99 = vector.shape_cast %96 : vector<2x32xf32> to vector<1x1x2x32xf32>
    tpu.vector_store %arg6[%c0_30, %c7, %c0_31, %c32], %99 {strides = array<i32>} : memref<1x8x2x64xf32, #tpu.memory_space<vmem>>, vector<1x1x2x32xf32>,
    %100 = arith.truncf %86 : vector<2x64xf32> to vector<2x64xbf16>
    %cst_32 = arith.constant dense<0.000000e+00> : vector<2x256xf32>
    %101 = tpu.matmul %100, %52, %cst_32 {dimension_numbers = #tpu.dot_dimension_numbers<[1], [0], [0], [1], [0, 0, 1, 1], [], []>} : vector<2x64xbf16>, vector<64x256xbf16>, vector<2x256xf32> -> vector<2x256xf32>
    %102 = vector.extract_strided_slice %50 {offsets = [2, 0], sizes = [2, 256], strides = [1, 1]} : vector<16x256xf32> to vector<2x256xf32>
    %103 = vector.extract_strided_slice %50 {offsets = [12, 0], sizes = [2, 256], strides = [1, 1]} : vector<16x256xf32> to vector<2x256xf32>
    %104 = arith.select %20, %102, %103 : vector<2x256xi1>, vector<2x256xf32>
    %105 = arith.addf %101, %104 : vector<2x256xf32>
    %106 = arith.mulf %105, %30 : vector<2x256xf32>
    %107 = math.tanh %106 : vector<2x256xf32>
    %108 = arith.mulf %30, %107 : vector<2x256xf32>
    %109 = arith.addf %108, %35 : vector<2x256xf32>
    %110 = vector.extract_strided_slice %109 {offsets = [0, 0], sizes = [2, 64], strides = [1, 1]} : vector<2x256xf32> to vector<2x64xf32>
    %111 = vector.extract_strided_slice %109 {offsets = [0, 64], sizes = [2, 64], strides = [1, 1]} : vector<2x256xf32> to vector<2x64xf32>
    %112 = vector.extract_strided_slice %109 {offsets = [0, 128], sizes = [2, 64], strides = [1, 1]} : vector<2x256xf32> to vector<2x64xf32>
    %113 = vector.extract_strided_slice %109 {offsets = [0, 192], sizes = [2, 64], strides = [1, 1]} : vector<2x256xf32> to vector<2x64xf32>
    %114 = arith.mulf %111, %87 : vector<2x64xf32>
    %115 = arith.mulf %110, %112 : vector<2x64xf32>
    %116 = arith.addf %114, %115 : vector<2x64xf32>
    %117 = math.tanh %116 : vector<2x64xf32>
    %118 = arith.mulf %113, %117 : vector<2x64xf32>
    %119 = vector.extract_strided_slice %53 {offsets = [1, 0, 0], sizes = [1, 2, 1], strides = [1, 1, 1]} : vector<8x2x1xf32> to vector<1x2x1xf32>
    %120 = vector.shape_cast %119 : vector<1x2x1xf32> to vector<2x1xf32>
    %121 = vector.extract_strided_slice %53 {offsets = [6, 0, 0], sizes = [1, 2, 1], strides = [1, 1, 1]} : vector<8x2x1xf32> to vector<1x2x1xf32>
    %122 = vector.shape_cast %121 : vector<1x2x1xf32> to vector<2x1xf32>
    %123 = vector.shape_cast %120 : vector<2x1xf32> to vector<2x1xf32>
    %124 = vector.broadcast %123 : vector<2x1xf32> to vector<2x64xf32>
    %125 = vector.shape_cast %122 : vector<2x1xf32> to vector<2x1xf32>
    %126 = vector.broadcast %125 : vector<2x1xf32> to vector<2x64xf32>
    %127 = arith.select %40, %124, %126 : vector<2x64xi1>, vector<2x64xf32>
    %cst_33 = arith.constant 5.000000e-01 : f32
    %128 = vector.broadcast %cst_33 : f32 to vector<2x64xf32>
    %129 = arith.cmpf ogt, %127, %128 : vector<2x64xf32>
    %130 = arith.select %129, %118, %86 : vector<2x64xi1>, vector<2x64xf32>
    %131 = arith.select %129, %116, %87 : vector<2x64xi1>, vector<2x64xf32>
    %132 = vector.extract_strided_slice %118 {offsets = [0, 0], sizes = [2, 32], strides = [1, 1]} : vector<2x64xf32> to vector<2x32xf32>
    %133 = vector.broadcast %120 : vector<2x1xf32> to vector<2x32xf32>
    %134 = arith.mulf %133, %132 : vector<2x32xf32>
    %c0_34 = arith.constant 0 : index
    %c1 = arith.constant 1 : index
    %c0_35 = arith.constant 0 : index
    %c0_36 = arith.constant 0 : index
    %135 = vector.load %arg6[%c0_34, %c1, %c0_35, %c0_36] : memref<1x8x2x64xf32, #tpu.memory_space<vmem>>, vector<1x1x2x32xf32>
    %136 = vector.shape_cast %135 : vector<1x1x2x32xf32> to vector<2x32xf32>
    %137 = vector.shape_cast %134 : vector<2x32xf32> to vector<1x1x2x32xf32>
    tpu.vector_store %arg6[%c0_34, %c1, %c0_35, %c0_36], %137 {strides = array<i32>} : memref<1x8x2x64xf32, #tpu.memory_space<vmem>>, vector<1x1x2x32xf32>,
    %138 = vector.extract_strided_slice %118 {offsets = [0, 32], sizes = [2, 32], strides = [1, 1]} : vector<2x64xf32> to vector<2x32xf32>
    %139 = vector.broadcast %122 : vector<2x1xf32> to vector<2x32xf32>
    %140 = arith.mulf %139, %138 : vector<2x32xf32>
    %c0_37 = arith.constant 0 : index
    %c6 = arith.constant 6 : index
    %c0_38 = arith.constant 0 : index
    %c32_39 = arith.constant 32 : index
    %141 = vector.load %arg6[%c0_37, %c6, %c0_38, %c32_39] : memref<1x8x2x64xf32, #tpu.memory_space<vmem>>, vector<1x1x2x32xf32>
    %142 = vector.shape_cast %141 : vector<1x1x2x32xf32> to vector<2x32xf32>
    %143 = vector.shape_cast %140 : vector<2x32xf32> to vector<1x1x2x32xf32>
    tpu.vector_store %arg6[%c0_37, %c6, %c0_38, %c32_39], %143 {strides = array<i32>} : memref<1x8x2x64xf32, #tpu.memory_space<vmem>>, vector<1x1x2x32xf32>,
    %144 = arith.truncf %130 : vector<2x64xf32> to vector<2x64xbf16>
    %cst_40 = arith.constant dense<0.000000e+00> : vector<2x256xf32>
    %145 = tpu.matmul %144, %52, %cst_40 {dimension_numbers = #tpu.dot_dimension_numbers<[1], [0], [0], [1], [0, 0, 1, 1], [], []>} : vector<2x64xbf16>, vector<64x256xbf16>, vector<2x256xf32> -> vector<2x256xf32>
    %146 = vector.extract_strided_slice %50 {offsets = [4, 0], sizes = [2, 256], strides = [1, 1]} : vector<16x256xf32> to vector<2x256xf32>
    %147 = vector.extract_strided_slice %50 {offsets = [10, 0], sizes = [2, 256], strides = [1, 1]} : vector<16x256xf32> to vector<2x256xf32>
    %148 = arith.select %20, %146, %147 : vector<2x256xi1>, vector<2x256xf32>
    %149 = arith.addf %145, %148 : vector<2x256xf32>
    %150 = arith.mulf %149, %30 : vector<2x256xf32>
    %151 = math.tanh %150 : vector<2x256xf32>
    %152 = arith.mulf %30, %151 : vector<2x256xf32>
    %153 = arith.addf %152, %35 : vector<2x256xf32>
    %154 = vector.extract_strided_slice %153 {offsets = [0, 0], sizes = [2, 64], strides = [1, 1]} : vector<2x256xf32> to vector<2x64xf32>
    %155 = vector.extract_strided_slice %153 {offsets = [0, 64], sizes = [2, 64], strides = [1, 1]} : vector<2x256xf32> to vector<2x64xf32>
    %156 = vector.extract_strided_slice %153 {offsets = [0, 128], sizes = [2, 64], strides = [1, 1]} : vector<2x256xf32> to vector<2x64xf32>
    %157 = vector.extract_strided_slice %153 {offsets = [0, 192], sizes = [2, 64], strides = [1, 1]} : vector<2x256xf32> to vector<2x64xf32>
    %158 = arith.mulf %155, %131 : vector<2x64xf32>
    %159 = arith.mulf %154, %156 : vector<2x64xf32>
    %160 = arith.addf %158, %159 : vector<2x64xf32>
    %161 = math.tanh %160 : vector<2x64xf32>
    %162 = arith.mulf %157, %161 : vector<2x64xf32>
    %163 = vector.extract_strided_slice %53 {offsets = [2, 0, 0], sizes = [1, 2, 1], strides = [1, 1, 1]} : vector<8x2x1xf32> to vector<1x2x1xf32>
    %164 = vector.shape_cast %163 : vector<1x2x1xf32> to vector<2x1xf32>
    %165 = vector.extract_strided_slice %53 {offsets = [5, 0, 0], sizes = [1, 2, 1], strides = [1, 1, 1]} : vector<8x2x1xf32> to vector<1x2x1xf32>
    %166 = vector.shape_cast %165 : vector<1x2x1xf32> to vector<2x1xf32>
    %167 = vector.shape_cast %164 : vector<2x1xf32> to vector<2x1xf32>
    %168 = vector.broadcast %167 : vector<2x1xf32> to vector<2x64xf32>
    %169 = vector.shape_cast %166 : vector<2x1xf32> to vector<2x1xf32>
    %170 = vector.broadcast %169 : vector<2x1xf32> to vector<2x64xf32>
    %171 = arith.select %40, %168, %170 : vector<2x64xi1>, vector<2x64xf32>
    %cst_41 = arith.constant 5.000000e-01 : f32
    %172 = vector.broadcast %cst_41 : f32 to vector<2x64xf32>
    %173 = arith.cmpf ogt, %171, %172 : vector<2x64xf32>
    %174 = arith.select %173, %162, %130 : vector<2x64xi1>, vector<2x64xf32>
    %175 = arith.select %173, %160, %131 : vector<2x64xi1>, vector<2x64xf32>
    %176 = vector.extract_strided_slice %162 {offsets = [0, 0], sizes = [2, 32], strides = [1, 1]} : vector<2x64xf32> to vector<2x32xf32>
    %177 = vector.broadcast %164 : vector<2x1xf32> to vector<2x32xf32>
    %178 = arith.mulf %177, %176 : vector<2x32xf32>
    %c0_42 = arith.constant 0 : index
    %c2 = arith.constant 2 : index
    %c0_43 = arith.constant 0 : index
    %c0_44 = arith.constant 0 : index
    %179 = vector.load %arg6[%c0_42, %c2, %c0_43, %c0_44] : memref<1x8x2x64xf32, #tpu.memory_space<vmem>>, vector<1x1x2x32xf32>
    %180 = vector.shape_cast %179 : vector<1x1x2x32xf32> to vector<2x32xf32>
    %181 = vector.shape_cast %178 : vector<2x32xf32> to vector<1x1x2x32xf32>
    tpu.vector_store %arg6[%c0_42, %c2, %c0_43, %c0_44], %181 {strides = array<i32>} : memref<1x8x2x64xf32, #tpu.memory_space<vmem>>, vector<1x1x2x32xf32>,
    %182 = vector.extract_strided_slice %162 {offsets = [0, 32], sizes = [2, 32], strides = [1, 1]} : vector<2x64xf32> to vector<2x32xf32>
    %183 = vector.broadcast %166 : vector<2x1xf32> to vector<2x32xf32>
    %184 = arith.mulf %183, %182 : vector<2x32xf32>
    %c0_45 = arith.constant 0 : index
    %c5 = arith.constant 5 : index
    %c0_46 = arith.constant 0 : index
    %c32_47 = arith.constant 32 : index
    %185 = vector.load %arg6[%c0_45, %c5, %c0_46, %c32_47] : memref<1x8x2x64xf32, #tpu.memory_space<vmem>>, vector<1x1x2x32xf32>
    %186 = vector.shape_cast %185 : vector<1x1x2x32xf32> to vector<2x32xf32>
    %187 = vector.shape_cast %184 : vector<2x32xf32> to vector<1x1x2x32xf32>
    tpu.vector_store %arg6[%c0_45, %c5, %c0_46, %c32_47], %187 {strides = array<i32>} : memref<1x8x2x64xf32, #tpu.memory_space<vmem>>, vector<1x1x2x32xf32>,
    %188 = arith.truncf %174 : vector<2x64xf32> to vector<2x64xbf16>
    %cst_48 = arith.constant dense<0.000000e+00> : vector<2x256xf32>
    %189 = tpu.matmul %188, %52, %cst_48 {dimension_numbers = #tpu.dot_dimension_numbers<[1], [0], [0], [1], [0, 0, 1, 1], [], []>} : vector<2x64xbf16>, vector<64x256xbf16>, vector<2x256xf32> -> vector<2x256xf32>
    %190 = vector.extract_strided_slice %50 {offsets = [6, 0], sizes = [2, 256], strides = [1, 1]} : vector<16x256xf32> to vector<2x256xf32>
    %191 = vector.extract_strided_slice %50 {offsets = [8, 0], sizes = [2, 256], strides = [1, 1]} : vector<16x256xf32> to vector<2x256xf32>
    %192 = arith.select %20, %190, %191 : vector<2x256xi1>, vector<2x256xf32>
    %193 = arith.addf %189, %192 : vector<2x256xf32>
    %194 = arith.mulf %193, %30 : vector<2x256xf32>
    %195 = math.tanh %194 : vector<2x256xf32>
    %196 = arith.mulf %30, %195 : vector<2x256xf32>
    %197 = arith.addf %196, %35 : vector<2x256xf32>
    %198 = vector.extract_strided_slice %197 {offsets = [0, 0], sizes = [2, 64], strides = [1, 1]} : vector<2x256xf32> to vector<2x64xf32>
    %199 = vector.extract_strided_slice %197 {offsets = [0, 64], sizes = [2, 64], strides = [1, 1]} : vector<2x256xf32> to vector<2x64xf32>
    %200 = vector.extract_strided_slice %197 {offsets = [0, 128], sizes = [2, 64], strides = [1, 1]} : vector<2x256xf32> to vector<2x64xf32>
    %201 = vector.extract_strided_slice %197 {offsets = [0, 192], sizes = [2, 64], strides = [1, 1]} : vector<2x256xf32> to vector<2x64xf32>
    %202 = arith.mulf %199, %175 : vector<2x64xf32>
    %203 = arith.mulf %198, %200 : vector<2x64xf32>
    %204 = arith.addf %202, %203 : vector<2x64xf32>
    %205 = math.tanh %204 : vector<2x64xf32>
    %206 = arith.mulf %201, %205 : vector<2x64xf32>
    %207 = vector.extract_strided_slice %53 {offsets = [3, 0, 0], sizes = [1, 2, 1], strides = [1, 1, 1]} : vector<8x2x1xf32> to vector<1x2x1xf32>
    %208 = vector.shape_cast %207 : vector<1x2x1xf32> to vector<2x1xf32>
    %209 = vector.extract_strided_slice %53 {offsets = [4, 0, 0], sizes = [1, 2, 1], strides = [1, 1, 1]} : vector<8x2x1xf32> to vector<1x2x1xf32>
    %210 = vector.shape_cast %209 : vector<1x2x1xf32> to vector<2x1xf32>
    %211 = vector.shape_cast %208 : vector<2x1xf32> to vector<2x1xf32>
    %212 = vector.broadcast %211 : vector<2x1xf32> to vector<2x64xf32>
    %213 = vector.shape_cast %210 : vector<2x1xf32> to vector<2x1xf32>
    %214 = vector.broadcast %213 : vector<2x1xf32> to vector<2x64xf32>
    %215 = arith.select %40, %212, %214 : vector<2x64xi1>, vector<2x64xf32>
    %cst_49 = arith.constant 5.000000e-01 : f32
    %216 = vector.broadcast %cst_49 : f32 to vector<2x64xf32>
    %217 = arith.cmpf ogt, %215, %216 : vector<2x64xf32>
    %218 = arith.select %217, %206, %174 : vector<2x64xi1>, vector<2x64xf32>
    %219 = arith.select %217, %204, %175 : vector<2x64xi1>, vector<2x64xf32>
    %220 = vector.extract_strided_slice %206 {offsets = [0, 0], sizes = [2, 32], strides = [1, 1]} : vector<2x64xf32> to vector<2x32xf32>
    %221 = vector.broadcast %208 : vector<2x1xf32> to vector<2x32xf32>
    %222 = arith.mulf %221, %220 : vector<2x32xf32>
    %c0_50 = arith.constant 0 : index
    %c3 = arith.constant 3 : index
    %c0_51 = arith.constant 0 : index
    %c0_52 = arith.constant 0 : index
    %223 = vector.load %arg6[%c0_50, %c3, %c0_51, %c0_52] : memref<1x8x2x64xf32, #tpu.memory_space<vmem>>, vector<1x1x2x32xf32>
    %224 = vector.shape_cast %223 : vector<1x1x2x32xf32> to vector<2x32xf32>
    %225 = vector.shape_cast %222 : vector<2x32xf32> to vector<1x1x2x32xf32>
    tpu.vector_store %arg6[%c0_50, %c3, %c0_51, %c0_52], %225 {strides = array<i32>} : memref<1x8x2x64xf32, #tpu.memory_space<vmem>>, vector<1x1x2x32xf32>,
    %226 = vector.extract_strided_slice %206 {offsets = [0, 32], sizes = [2, 32], strides = [1, 1]} : vector<2x64xf32> to vector<2x32xf32>
    %227 = vector.broadcast %210 : vector<2x1xf32> to vector<2x32xf32>
    %228 = arith.mulf %227, %226 : vector<2x32xf32>
    %c0_53 = arith.constant 0 : index
    %c4 = arith.constant 4 : index
    %c0_54 = arith.constant 0 : index
    %c32_55 = arith.constant 32 : index
    %229 = vector.load %arg6[%c0_53, %c4, %c0_54, %c32_55] : memref<1x8x2x64xf32, #tpu.memory_space<vmem>>, vector<1x1x2x32xf32>
    %230 = vector.shape_cast %229 : vector<1x1x2x32xf32> to vector<2x32xf32>
    %231 = vector.shape_cast %228 : vector<2x32xf32> to vector<1x1x2x32xf32>
    tpu.vector_store %arg6[%c0_53, %c4, %c0_54, %c32_55], %231 {strides = array<i32>} : memref<1x8x2x64xf32, #tpu.memory_space<vmem>>, vector<1x1x2x32xf32>,
    %232 = arith.truncf %218 : vector<2x64xf32> to vector<2x64xbf16>
    %cst_56 = arith.constant dense<0.000000e+00> : vector<2x256xf32>
    %233 = tpu.matmul %232, %52, %cst_56 {dimension_numbers = #tpu.dot_dimension_numbers<[1], [0], [0], [1], [0, 0, 1, 1], [], []>} : vector<2x64xbf16>, vector<64x256xbf16>, vector<2x256xf32> -> vector<2x256xf32>
    %234 = vector.extract_strided_slice %50 {offsets = [8, 0], sizes = [2, 256], strides = [1, 1]} : vector<16x256xf32> to vector<2x256xf32>
    %235 = vector.extract_strided_slice %50 {offsets = [6, 0], sizes = [2, 256], strides = [1, 1]} : vector<16x256xf32> to vector<2x256xf32>
    %236 = arith.select %20, %234, %235 : vector<2x256xi1>, vector<2x256xf32>
    %237 = arith.addf %233, %236 : vector<2x256xf32>
    %238 = arith.mulf %237, %30 : vector<2x256xf32>
    %239 = math.tanh %238 : vector<2x256xf32>
    %240 = arith.mulf %30, %239 : vector<2x256xf32>
    %241 = arith.addf %240, %35 : vector<2x256xf32>
    %242 = vector.extract_strided_slice %241 {offsets = [0, 0], sizes = [2, 64], strides = [1, 1]} : vector<2x256xf32> to vector<2x64xf32>
    %243 = vector.extract_strided_slice %241 {offsets = [0, 64], sizes = [2, 64], strides = [1, 1]} : vector<2x256xf32> to vector<2x64xf32>
    %244 = vector.extract_strided_slice %241 {offsets = [0, 128], sizes = [2, 64], strides = [1, 1]} : vector<2x256xf32> to vector<2x64xf32>
    %245 = vector.extract_strided_slice %241 {offsets = [0, 192], sizes = [2, 64], strides = [1, 1]} : vector<2x256xf32> to vector<2x64xf32>
    %246 = arith.mulf %243, %219 : vector<2x64xf32>
    %247 = arith.mulf %242, %244 : vector<2x64xf32>
    %248 = arith.addf %246, %247 : vector<2x64xf32>
    %249 = math.tanh %248 : vector<2x64xf32>
    %250 = arith.mulf %245, %249 : vector<2x64xf32>
    %251 = vector.extract_strided_slice %53 {offsets = [4, 0, 0], sizes = [1, 2, 1], strides = [1, 1, 1]} : vector<8x2x1xf32> to vector<1x2x1xf32>
    %252 = vector.shape_cast %251 : vector<1x2x1xf32> to vector<2x1xf32>
    %253 = vector.extract_strided_slice %53 {offsets = [3, 0, 0], sizes = [1, 2, 1], strides = [1, 1, 1]} : vector<8x2x1xf32> to vector<1x2x1xf32>
    %254 = vector.shape_cast %253 : vector<1x2x1xf32> to vector<2x1xf32>
    %255 = vector.shape_cast %252 : vector<2x1xf32> to vector<2x1xf32>
    %256 = vector.broadcast %255 : vector<2x1xf32> to vector<2x64xf32>
    %257 = vector.shape_cast %254 : vector<2x1xf32> to vector<2x1xf32>
    %258 = vector.broadcast %257 : vector<2x1xf32> to vector<2x64xf32>
    %259 = arith.select %40, %256, %258 : vector<2x64xi1>, vector<2x64xf32>
    %cst_57 = arith.constant 5.000000e-01 : f32
    %260 = vector.broadcast %cst_57 : f32 to vector<2x64xf32>
    %261 = arith.cmpf ogt, %259, %260 : vector<2x64xf32>
    %262 = arith.select %261, %250, %218 : vector<2x64xi1>, vector<2x64xf32>
    %263 = arith.select %261, %248, %219 : vector<2x64xi1>, vector<2x64xf32>
    %264 = vector.extract_strided_slice %250 {offsets = [0, 0], sizes = [2, 32], strides = [1, 1]} : vector<2x64xf32> to vector<2x32xf32>
    %265 = vector.broadcast %252 : vector<2x1xf32> to vector<2x32xf32>
    %266 = arith.mulf %265, %264 : vector<2x32xf32>
    %c0_58 = arith.constant 0 : index
    %c4_59 = arith.constant 4 : index
    %c0_60 = arith.constant 0 : index
    %c0_61 = arith.constant 0 : index
    %267 = vector.load %arg6[%c0_58, %c4_59, %c0_60, %c0_61] : memref<1x8x2x64xf32, #tpu.memory_space<vmem>>, vector<1x1x2x32xf32>
    %268 = vector.shape_cast %267 : vector<1x1x2x32xf32> to vector<2x32xf32>
    %269 = vector.shape_cast %266 : vector<2x32xf32> to vector<1x1x2x32xf32>
    tpu.vector_store %arg6[%c0_58, %c4_59, %c0_60, %c0_61], %269 {strides = array<i32>} : memref<1x8x2x64xf32, #tpu.memory_space<vmem>>, vector<1x1x2x32xf32>,
    %270 = vector.extract_strided_slice %250 {offsets = [0, 32], sizes = [2, 32], strides = [1, 1]} : vector<2x64xf32> to vector<2x32xf32>
    %271 = vector.broadcast %254 : vector<2x1xf32> to vector<2x32xf32>
    %272 = arith.mulf %271, %270 : vector<2x32xf32>
    %c0_62 = arith.constant 0 : index
    %c3_63 = arith.constant 3 : index
    %c0_64 = arith.constant 0 : index
    %c32_65 = arith.constant 32 : index
    %273 = vector.load %arg6[%c0_62, %c3_63, %c0_64, %c32_65] : memref<1x8x2x64xf32, #tpu.memory_space<vmem>>, vector<1x1x2x32xf32>
    %274 = vector.shape_cast %273 : vector<1x1x2x32xf32> to vector<2x32xf32>
    %275 = vector.shape_cast %272 : vector<2x32xf32> to vector<1x1x2x32xf32>
    tpu.vector_store %arg6[%c0_62, %c3_63, %c0_64, %c32_65], %275 {strides = array<i32>} : memref<1x8x2x64xf32, #tpu.memory_space<vmem>>, vector<1x1x2x32xf32>,
    %276 = arith.truncf %262 : vector<2x64xf32> to vector<2x64xbf16>
    %cst_66 = arith.constant dense<0.000000e+00> : vector<2x256xf32>
    %277 = tpu.matmul %276, %52, %cst_66 {dimension_numbers = #tpu.dot_dimension_numbers<[1], [0], [0], [1], [0, 0, 1, 1], [], []>} : vector<2x64xbf16>, vector<64x256xbf16>, vector<2x256xf32> -> vector<2x256xf32>
    %278 = vector.extract_strided_slice %50 {offsets = [10, 0], sizes = [2, 256], strides = [1, 1]} : vector<16x256xf32> to vector<2x256xf32>
    %279 = vector.extract_strided_slice %50 {offsets = [4, 0], sizes = [2, 256], strides = [1, 1]} : vector<16x256xf32> to vector<2x256xf32>
    %280 = arith.select %20, %278, %279 : vector<2x256xi1>, vector<2x256xf32>
    %281 = arith.addf %277, %280 : vector<2x256xf32>
    %282 = arith.mulf %281, %30 : vector<2x256xf32>
    %283 = math.tanh %282 : vector<2x256xf32>
    %284 = arith.mulf %30, %283 : vector<2x256xf32>
    %285 = arith.addf %284, %35 : vector<2x256xf32>
    %286 = vector.extract_strided_slice %285 {offsets = [0, 0], sizes = [2, 64], strides = [1, 1]} : vector<2x256xf32> to vector<2x64xf32>
    %287 = vector.extract_strided_slice %285 {offsets = [0, 64], sizes = [2, 64], strides = [1, 1]} : vector<2x256xf32> to vector<2x64xf32>
    %288 = vector.extract_strided_slice %285 {offsets = [0, 128], sizes = [2, 64], strides = [1, 1]} : vector<2x256xf32> to vector<2x64xf32>
    %289 = vector.extract_strided_slice %285 {offsets = [0, 192], sizes = [2, 64], strides = [1, 1]} : vector<2x256xf32> to vector<2x64xf32>
    %290 = arith.mulf %287, %263 : vector<2x64xf32>
    %291 = arith.mulf %286, %288 : vector<2x64xf32>
    %292 = arith.addf %290, %291 : vector<2x64xf32>
    %293 = math.tanh %292 : vector<2x64xf32>
    %294 = arith.mulf %289, %293 : vector<2x64xf32>
    %295 = vector.extract_strided_slice %53 {offsets = [5, 0, 0], sizes = [1, 2, 1], strides = [1, 1, 1]} : vector<8x2x1xf32> to vector<1x2x1xf32>
    %296 = vector.shape_cast %295 : vector<1x2x1xf32> to vector<2x1xf32>
    %297 = vector.extract_strided_slice %53 {offsets = [2, 0, 0], sizes = [1, 2, 1], strides = [1, 1, 1]} : vector<8x2x1xf32> to vector<1x2x1xf32>
    %298 = vector.shape_cast %297 : vector<1x2x1xf32> to vector<2x1xf32>
    %299 = vector.shape_cast %296 : vector<2x1xf32> to vector<2x1xf32>
    %300 = vector.broadcast %299 : vector<2x1xf32> to vector<2x64xf32>
    %301 = vector.shape_cast %298 : vector<2x1xf32> to vector<2x1xf32>
    %302 = vector.broadcast %301 : vector<2x1xf32> to vector<2x64xf32>
    %303 = arith.select %40, %300, %302 : vector<2x64xi1>, vector<2x64xf32>
    %cst_67 = arith.constant 5.000000e-01 : f32
    %304 = vector.broadcast %cst_67 : f32 to vector<2x64xf32>
    %305 = arith.cmpf ogt, %303, %304 : vector<2x64xf32>
    %306 = arith.select %305, %294, %262 : vector<2x64xi1>, vector<2x64xf32>
    %307 = arith.select %305, %292, %263 : vector<2x64xi1>, vector<2x64xf32>
    %308 = vector.extract_strided_slice %294 {offsets = [0, 0], sizes = [2, 32], strides = [1, 1]} : vector<2x64xf32> to vector<2x32xf32>
    %309 = vector.broadcast %296 : vector<2x1xf32> to vector<2x32xf32>
    %310 = arith.mulf %309, %308 : vector<2x32xf32>
    %c0_68 = arith.constant 0 : index
    %c5_69 = arith.constant 5 : index
    %c0_70 = arith.constant 0 : index
    %c0_71 = arith.constant 0 : index
    %311 = vector.load %arg6[%c0_68, %c5_69, %c0_70, %c0_71] : memref<1x8x2x64xf32, #tpu.memory_space<vmem>>, vector<1x1x2x32xf32>
    %312 = vector.shape_cast %311 : vector<1x1x2x32xf32> to vector<2x32xf32>
    %313 = vector.shape_cast %310 : vector<2x32xf32> to vector<1x1x2x32xf32>
    tpu.vector_store %arg6[%c0_68, %c5_69, %c0_70, %c0_71], %313 {strides = array<i32>} : memref<1x8x2x64xf32, #tpu.memory_space<vmem>>, vector<1x1x2x32xf32>,
    %314 = vector.extract_strided_slice %294 {offsets = [0, 32], sizes = [2, 32], strides = [1, 1]} : vector<2x64xf32> to vector<2x32xf32>
    %315 = vector.broadcast %298 : vector<2x1xf32> to vector<2x32xf32>
    %316 = arith.mulf %315, %314 : vector<2x32xf32>
    %c0_72 = arith.constant 0 : index
    %c2_73 = arith.constant 2 : index
    %c0_74 = arith.constant 0 : index
    %c32_75 = arith.constant 32 : index
    %317 = vector.load %arg6[%c0_72, %c2_73, %c0_74, %c32_75] : memref<1x8x2x64xf32, #tpu.memory_space<vmem>>, vector<1x1x2x32xf32>
    %318 = vector.shape_cast %317 : vector<1x1x2x32xf32> to vector<2x32xf32>
    %319 = vector.shape_cast %316 : vector<2x32xf32> to vector<1x1x2x32xf32>
    tpu.vector_store %arg6[%c0_72, %c2_73, %c0_74, %c32_75], %319 {strides = array<i32>} : memref<1x8x2x64xf32, #tpu.memory_space<vmem>>, vector<1x1x2x32xf32>,
    %320 = arith.truncf %306 : vector<2x64xf32> to vector<2x64xbf16>
    %cst_76 = arith.constant dense<0.000000e+00> : vector<2x256xf32>
    %321 = tpu.matmul %320, %52, %cst_76 {dimension_numbers = #tpu.dot_dimension_numbers<[1], [0], [0], [1], [0, 0, 1, 1], [], []>} : vector<2x64xbf16>, vector<64x256xbf16>, vector<2x256xf32> -> vector<2x256xf32>
    %322 = vector.extract_strided_slice %50 {offsets = [12, 0], sizes = [2, 256], strides = [1, 1]} : vector<16x256xf32> to vector<2x256xf32>
    %323 = vector.extract_strided_slice %50 {offsets = [2, 0], sizes = [2, 256], strides = [1, 1]} : vector<16x256xf32> to vector<2x256xf32>
    %324 = arith.select %20, %322, %323 : vector<2x256xi1>, vector<2x256xf32>
    %325 = arith.addf %321, %324 : vector<2x256xf32>
    %326 = arith.mulf %325, %30 : vector<2x256xf32>
    %327 = math.tanh %326 : vector<2x256xf32>
    %328 = arith.mulf %30, %327 : vector<2x256xf32>
    %329 = arith.addf %328, %35 : vector<2x256xf32>
    %330 = vector.extract_strided_slice %329 {offsets = [0, 0], sizes = [2, 64], strides = [1, 1]} : vector<2x256xf32> to vector<2x64xf32>
    %331 = vector.extract_strided_slice %329 {offsets = [0, 64], sizes = [2, 64], strides = [1, 1]} : vector<2x256xf32> to vector<2x64xf32>
    %332 = vector.extract_strided_slice %329 {offsets = [0, 128], sizes = [2, 64], strides = [1, 1]} : vector<2x256xf32> to vector<2x64xf32>
    %333 = vector.extract_strided_slice %329 {offsets = [0, 192], sizes = [2, 64], strides = [1, 1]} : vector<2x256xf32> to vector<2x64xf32>
    %334 = arith.mulf %331, %307 : vector<2x64xf32>
    %335 = arith.mulf %330, %332 : vector<2x64xf32>
    %336 = arith.addf %334, %335 : vector<2x64xf32>
    %337 = math.tanh %336 : vector<2x64xf32>
    %338 = arith.mulf %333, %337 : vector<2x64xf32>
    %339 = vector.extract_strided_slice %53 {offsets = [6, 0, 0], sizes = [1, 2, 1], strides = [1, 1, 1]} : vector<8x2x1xf32> to vector<1x2x1xf32>
    %340 = vector.shape_cast %339 : vector<1x2x1xf32> to vector<2x1xf32>
    %341 = vector.extract_strided_slice %53 {offsets = [1, 0, 0], sizes = [1, 2, 1], strides = [1, 1, 1]} : vector<8x2x1xf32> to vector<1x2x1xf32>
    %342 = vector.shape_cast %341 : vector<1x2x1xf32> to vector<2x1xf32>
    %343 = vector.shape_cast %340 : vector<2x1xf32> to vector<2x1xf32>
    %344 = vector.broadcast %343 : vector<2x1xf32> to vector<2x64xf32>
    %345 = vector.shape_cast %342 : vector<2x1xf32> to vector<2x1xf32>
    %346 = vector.broadcast %345 : vector<2x1xf32> to vector<2x64xf32>
    %347 = arith.select %40, %344, %346 : vector<2x64xi1>, vector<2x64xf32>
    %cst_77 = arith.constant 5.000000e-01 : f32
    %348 = vector.broadcast %cst_77 : f32 to vector<2x64xf32>
    %349 = arith.cmpf ogt, %347, %348 : vector<2x64xf32>
    %350 = arith.select %349, %338, %306 : vector<2x64xi1>, vector<2x64xf32>
    %351 = arith.select %349, %336, %307 : vector<2x64xi1>, vector<2x64xf32>
    %352 = vector.extract_strided_slice %338 {offsets = [0, 0], sizes = [2, 32], strides = [1, 1]} : vector<2x64xf32> to vector<2x32xf32>
    %353 = vector.broadcast %340 : vector<2x1xf32> to vector<2x32xf32>
    %354 = arith.mulf %353, %352 : vector<2x32xf32>
    %c0_78 = arith.constant 0 : index
    %c6_79 = arith.constant 6 : index
    %c0_80 = arith.constant 0 : index
    %c0_81 = arith.constant 0 : index
    %355 = vector.load %arg6[%c0_78, %c6_79, %c0_80, %c0_81] : memref<1x8x2x64xf32, #tpu.memory_space<vmem>>, vector<1x1x2x32xf32>
    %356 = vector.shape_cast %355 : vector<1x1x2x32xf32> to vector<2x32xf32>
    %357 = vector.shape_cast %354 : vector<2x32xf32> to vector<1x1x2x32xf32>
    tpu.vector_store %arg6[%c0_78, %c6_79, %c0_80, %c0_81], %357 {strides = array<i32>} : memref<1x8x2x64xf32, #tpu.memory_space<vmem>>, vector<1x1x2x32xf32>,
    %358 = vector.extract_strided_slice %338 {offsets = [0, 32], sizes = [2, 32], strides = [1, 1]} : vector<2x64xf32> to vector<2x32xf32>
    %359 = vector.broadcast %342 : vector<2x1xf32> to vector<2x32xf32>
    %360 = arith.mulf %359, %358 : vector<2x32xf32>
    %c0_82 = arith.constant 0 : index
    %c1_83 = arith.constant 1 : index
    %c0_84 = arith.constant 0 : index
    %c32_85 = arith.constant 32 : index
    %361 = vector.load %arg6[%c0_82, %c1_83, %c0_84, %c32_85] : memref<1x8x2x64xf32, #tpu.memory_space<vmem>>, vector<1x1x2x32xf32>
    %362 = vector.shape_cast %361 : vector<1x1x2x32xf32> to vector<2x32xf32>
    %363 = vector.shape_cast %360 : vector<2x32xf32> to vector<1x1x2x32xf32>
    tpu.vector_store %arg6[%c0_82, %c1_83, %c0_84, %c32_85], %363 {strides = array<i32>} : memref<1x8x2x64xf32, #tpu.memory_space<vmem>>, vector<1x1x2x32xf32>,
    %364 = arith.truncf %350 : vector<2x64xf32> to vector<2x64xbf16>
    %cst_86 = arith.constant dense<0.000000e+00> : vector<2x256xf32>
    %365 = tpu.matmul %364, %52, %cst_86 {dimension_numbers = #tpu.dot_dimension_numbers<[1], [0], [0], [1], [0, 0, 1, 1], [], []>} : vector<2x64xbf16>, vector<64x256xbf16>, vector<2x256xf32> -> vector<2x256xf32>
    %366 = vector.extract_strided_slice %50 {offsets = [14, 0], sizes = [2, 256], strides = [1, 1]} : vector<16x256xf32> to vector<2x256xf32>
    %367 = vector.extract_strided_slice %50 {offsets = [0, 0], sizes = [2, 256], strides = [1, 1]} : vector<16x256xf32> to vector<2x256xf32>
    %368 = arith.select %20, %366, %367 : vector<2x256xi1>, vector<2x256xf32>
    %369 = arith.addf %365, %368 : vector<2x256xf32>
    %370 = arith.mulf %369, %30 : vector<2x256xf32>
    %371 = math.tanh %370 : vector<2x256xf32>
    %372 = arith.mulf %30, %371 : vector<2x256xf32>
    %373 = arith.addf %372, %35 : vector<2x256xf32>
    %374 = vector.extract_strided_slice %373 {offsets = [0, 0], sizes = [2, 64], strides = [1, 1]} : vector<2x256xf32> to vector<2x64xf32>
    %375 = vector.extract_strided_slice %373 {offsets = [0, 64], sizes = [2, 64], strides = [1, 1]} : vector<2x256xf32> to vector<2x64xf32>
    %376 = vector.extract_strided_slice %373 {offsets = [0, 128], sizes = [2, 64], strides = [1, 1]} : vector<2x256xf32> to vector<2x64xf32>
    %377 = vector.extract_strided_slice %373 {offsets = [0, 192], sizes = [2, 64], strides = [1, 1]} : vector<2x256xf32> to vector<2x64xf32>
    %378 = arith.mulf %375, %351 : vector<2x64xf32>
    %379 = arith.mulf %374, %376 : vector<2x64xf32>
    %380 = arith.addf %378, %379 : vector<2x64xf32>
    %381 = math.tanh %380 : vector<2x64xf32>
    %382 = arith.mulf %377, %381 : vector<2x64xf32>
    %383 = vector.extract_strided_slice %53 {offsets = [7, 0, 0], sizes = [1, 2, 1], strides = [1, 1, 1]} : vector<8x2x1xf32> to vector<1x2x1xf32>
    %384 = vector.shape_cast %383 : vector<1x2x1xf32> to vector<2x1xf32>
    %385 = vector.extract_strided_slice %53 {offsets = [0, 0, 0], sizes = [1, 2, 1], strides = [1, 1, 1]} : vector<8x2x1xf32> to vector<1x2x1xf32>
    %386 = vector.shape_cast %385 : vector<1x2x1xf32> to vector<2x1xf32>
    %387 = vector.extract_strided_slice %382 {offsets = [0, 0], sizes = [2, 32], strides = [1, 1]} : vector<2x64xf32> to vector<2x32xf32>
    %388 = vector.broadcast %384 : vector<2x1xf32> to vector<2x32xf32>
    %389 = arith.mulf %388, %387 : vector<2x32xf32>
    %c0_87 = arith.constant 0 : index
    %c7_88 = arith.constant 7 : index
    %c0_89 = arith.constant 0 : index
    %c0_90 = arith.constant 0 : index
    %390 = vector.load %arg6[%c0_87, %c7_88, %c0_89, %c0_90] : memref<1x8x2x64xf32, #tpu.memory_space<vmem>>, vector<1x1x2x32xf32>
    %391 = vector.shape_cast %390 : vector<1x1x2x32xf32> to vector<2x32xf32>
    %392 = vector.shape_cast %389 : vector<2x32xf32> to vector<1x1x2x32xf32>
    tpu.vector_store %arg6[%c0_87, %c7_88, %c0_89, %c0_90], %392 {strides = array<i32>} : memref<1x8x2x64xf32, #tpu.memory_space<vmem>>, vector<1x1x2x32xf32>,
    %393 = vector.extract_strided_slice %382 {offsets = [0, 32], sizes = [2, 32], strides = [1, 1]} : vector<2x64xf32> to vector<2x32xf32>
    %394 = vector.broadcast %386 : vector<2x1xf32> to vector<2x32xf32>
    %395 = arith.mulf %394, %393 : vector<2x32xf32>
    %c0_91 = arith.constant 0 : index
    %c0_92 = arith.constant 0 : index
    %c0_93 = arith.constant 0 : index
    %c32_94 = arith.constant 32 : index
    %396 = vector.load %arg6[%c0_91, %c0_92, %c0_93, %c32_94] : memref<1x8x2x64xf32, #tpu.memory_space<vmem>>, vector<1x1x2x32xf32>
    %397 = vector.shape_cast %396 : vector<1x1x2x32xf32> to vector<2x32xf32>
    %398 = vector.shape_cast %395 : vector<2x32xf32> to vector<1x1x2x32xf32>
    tpu.vector_store %arg6[%c0_91, %c0_92, %c0_93, %c32_94], %398 {strides = array<i32>} : memref<1x8x2x64xf32, #tpu.memory_space<vmem>>, vector<1x1x2x32xf32>,
    return
  }
  func.func @transform_0(%arg0: i32) -> (i32, i32, i32) {
    %c0_i32 = arith.constant 0 : i32
    %c0_i32_0 = arith.constant 0 : i32
    %c0_i32_1 = arith.constant 0 : i32
    %c0_i32_2 = arith.constant 0 : i32
    return %c0_i32, %c0_i32_0, %c0_i32_1 : i32, i32, i32
  }
  func.func @transform_1(%arg0: i32) -> (i32, i32, i32) {
    %c0_i32 = arith.constant 0 : i32
    %c0_i32_0 = arith.constant 0 : i32
    %c0_i32_1 = arith.constant 0 : i32
    %c0_i32_2 = arith.constant 0 : i32
    return %c0_i32, %c0_i32_0, %c0_i32_1 : i32, i32, i32
  }
  func.func @transform_2(%arg0: i32) -> (i32, i32, i32) {
    %c0_i32 = arith.constant 0 : i32
    %c0_i32_0 = arith.constant 0 : i32
    %c0_i32_1 = arith.constant 0 : i32
    return %arg0, %c0_i32, %c0_i32_0 : i32, i32, i32
  }
  func.func @transform_3(%arg0: i32) -> (i32, i32, i32) {
    %c0_i32 = arith.constant 0 : i32
    %c0_i32_0 = arith.constant 0 : i32
    %c0_i32_1 = arith.constant 0 : i32
    return %arg0, %c0_i32, %c0_i32_0 : i32, i32, i32
  }
  func.func @transform_4(%arg0: i32) -> (i32, i32, i32) {
    %c0_i32 = arith.constant 0 : i32
    %c0_i32_0 = arith.constant 0 : i32
    %c0_i32_1 = arith.constant 0 : i32
    return %arg0, %c0_i32, %c0_i32_0 : i32, i32, i32
  }
  func.func @transform_5(%arg0: i32) -> (i32, i32, i32, i32) {
    %c0_i32 = arith.constant 0 : i32
    %c0_i32_0 = arith.constant 0 : i32
    %c0_i32_1 = arith.constant 0 : i32
    %c0_i32_2 = arith.constant 0 : i32
    return %arg0, %c0_i32, %c0_i32_0, %c0_i32_1 : i32, i32, i32, i32
  }
}

module attributes {stable_mosaic.version = 11 : i64} {
  func.func @kernel(%arg0: i32, %arg1: memref<8x2x128xf32, #tpu.memory_space<vmem>>, %arg2: memref<8x2x1xf32, #tpu.memory_space<vmem>>, %arg3: memref<1x128x256xbf16, #tpu.memory_space<vmem>>, %arg4: memref<1x64x256xbf16, #tpu.memory_space<vmem>>, %arg5: memref<1x1x256xf32, #tpu.memory_space<vmem>>, %arg6: memref<1x8x2x64xf32, #tpu.memory_space<vmem>>) attributes {dimension_semantics = [#tpu.dimension_semantics<parallel>], iteration_bounds = array<i64: 1>, scalar_prefetch = 0 : i64, scratch_operands = 0 : i64, tpu.core_type = #tpu.core_type<tc>, window_params = [{pipeline_mode = #tpu.pipeline_mode<synchronous>, transform_indices = @transform_0, window_bounds = array<i64: 8, 2, 128>}, {pipeline_mode = #tpu.pipeline_mode<synchronous>, transform_indices = @transform_1, window_bounds = array<i64: 8, 2, 1>}, {transform_indices = @transform_2, window_bounds = array<i64: 1, 128, 256>}, {transform_indices = @transform_3, window_bounds = array<i64: 1, 64, 256>}, {transform_indices = @transform_4, window_bounds = array<i64: 1, 1, 256>}, {transform_indices = @transform_5, window_bounds = array<i64: 1, 8, 2, 64>}]} {
    %0 = tpu.iota {dimensions = array<i32: 1>} : vector<1x256xi32>
    %c64_i32 = arith.constant 64 : i32
    %c0_i32 = arith.constant 0 : i32
    %1 = arith.cmpi eq, %c64_i32, %c0_i32 : i32
    %c1_i32 = arith.constant 1 : i32
    %2 = arith.select %1, %c1_i32, %c64_i32 : i32
    %3 = vector.broadcast %2 : i32 to vector<1x256xi32>
    %4 = arith.remsi %0, %3 : vector<1x256xi32>
    %c0_i32_0 = arith.constant 0 : i32
    %5 = vector.broadcast %c0_i32_0 : i32 to vector<1x256xi32>
    %6 = arith.cmpi ne, %4, %5 : vector<1x256xi32>
    %c0_i32_1 = arith.constant 0 : i32
    %7 = vector.broadcast %c0_i32_1 : i32 to vector<1x256xi32>
    %8 = arith.cmpi slt, %4, %7 : vector<1x256xi32>
    %c0_i32_2 = arith.constant 0 : i32
    %9 = arith.cmpi slt, %2, %c0_i32_2 : i32
    %10 = vector.broadcast %9 : i1 to vector<1x256xi1>
    %11 = vector.broadcast %10 : vector<1x256xi1> to vector<1x256xi1>
    %12 = arith.xori %8, %11 : vector<1x256xi1>
    %13 = arith.andi %12, %6 : vector<1x256xi1>
    %14 = vector.broadcast %2 : i32 to vector<1x256xi32>
    %15 = arith.addi %4, %14 : vector<1x256xi32>
    %16 = arith.select %13, %15, %4 : vector<1x256xi1>, vector<1x256xi32>
    %c32_i32 = arith.constant 32 : i32
    %17 = vector.broadcast %c32_i32 : i32 to vector<1x256xi32>
    %18 = arith.cmpi slt, %16, %17 : vector<1x256xi32>
    %19 = vector.shape_cast %18 : vector<1x256xi1> to vector<1x256xi1>
    %20 = vector.broadcast %19 : vector<1x256xi1> to vector<2x256xi1>
    %c128_i32 = arith.constant 128 : i32
    %21 = vector.broadcast %c128_i32 : i32 to vector<1x256xi32>
    %22 = arith.cmpi sge, %0, %21 : vector<1x256xi32>
    %c192_i32 = arith.constant 192 : i32
    %23 = vector.broadcast %c192_i32 : i32 to vector<1x256xi32>
    %24 = arith.cmpi slt, %0, %23 : vector<1x256xi32>
    %25 = arith.andi %22, %24 : vector<1x256xi1>
    %cst = arith.constant 1.000000e+00 : f32
    %cst_3 = arith.constant 5.000000e-01 : f32
    %26 = vector.broadcast %cst : f32 to vector<1x256xf32>
    %27 = vector.broadcast %cst_3 : f32 to vector<1x256xf32>
    %28 = arith.select %25, %26, %27 : vector<1x256xi1>, vector<1x256xf32>
    %29 = vector.shape_cast %28 : vector<1x256xf32> to vector<1x256xf32>
    %30 = vector.broadcast %29 : vector<1x256xf32> to vector<2x256xf32>
    %cst_4 = arith.constant 0.000000e+00 : f32
    %cst_5 = arith.constant 5.000000e-01 : f32
    %31 = vector.broadcast %cst_4 : f32 to vector<1x256xf32>
    %32 = vector.broadcast %cst_5 : f32 to vector<1x256xf32>
    %33 = arith.select %25, %31, %32 : vector<1x256xi1>, vector<1x256xf32>
    %34 = vector.shape_cast %33 : vector<1x256xf32> to vector<1x256xf32>
    %35 = vector.broadcast %34 : vector<1x256xf32> to vector<2x256xf32>
    %36 = tpu.iota {dimensions = array<i32: 1>} : vector<1x64xi32>
    %c32_i32_6 = arith.constant 32 : i32
    %37 = vector.broadcast %c32_i32_6 : i32 to vector<1x64xi32>
    %38 = arith.cmpi slt, %36, %37 : vector<1x64xi32>
    %39 = vector.shape_cast %38 : vector<1x64xi1> to vector<1x64xi1>
    %40 = vector.broadcast %39 : vector<1x64xi1> to vector<2x64xi1>
    %c0 = arith.constant 0 : index
    %c0_7 = arith.constant 0 : index
    %c0_8 = arith.constant 0 : index
    %41 = vector.load %arg1[%c0, %c0_7, %c0_8] : memref<8x2x128xf32, #tpu.memory_space<vmem>>, vector<8x2x128xf32>
    %42 = vector.shape_cast %41 : vector<8x2x128xf32> to vector<16x128xf32>
    %43 = arith.truncf %42 : vector<16x128xf32> to vector<16x128xbf16>
    %c0_9 = arith.constant 0 : index
    %c0_10 = arith.constant 0 : index
    %c0_11 = arith.constant 0 : index
    %44 = vector.load %arg3[%c0_9, %c0_10, %c0_11] : memref<1x128x256xbf16, #tpu.memory_space<vmem>>, vector<1x128x256xbf16>
    %45 = vector.shape_cast %44 : vector<1x128x256xbf16> to vector<128x256xbf16>
    %cst_12 = arith.constant dense<0.000000e+00> : vector<16x256xf32>
    %46 = tpu.matmul %43, %45, %cst_12 {dimension_numbers = #tpu.dot_dimension_numbers<[1], [0], [0], [1], [0, 0, 1, 1], [], []>} : vector<16x128xbf16>, vector<128x256xbf16>, vector<16x256xf32> -> vector<16x256xf32>
    %c0_13 = arith.constant 0 : index
    %c0_14 = arith.constant 0 : index
    %c0_15 = arith.constant 0 : index
    %47 = vector.load %arg5[%c0_13, %c0_14, %c0_15] : memref<1x1x256xf32, #tpu.memory_space<vmem>>, vector<1x1x256xf32>
    %48 = vector.shape_cast %47 : vector<1x1x256xf32> to vector<1x256xf32>
    %49 = vector.broadcast %48 : vector<1x256xf32> to vector<16x256xf32>
    %50 = arith.addf %46, %49 : vector<16x256xf32>
    %c0_16 = arith.constant 0 : index
    %c0_17 = arith.constant 0 : index
    %c0_18 = arith.constant 0 : index
    %51 = vector.load %arg4[%c0_16, %c0_17, %c0_18] : memref<1x64x256xbf16, #tpu.memory_space<vmem>>, vector<1x64x256xbf16>
    %52 = vector.shape_cast %51 : vector<1x64x256xbf16> to vector<64x256xbf16>
    %c0_19 = arith.constant 0 : index
    %c0_20 = arith.constant 0 : index
    %c0_21 = arith.constant 0 : index
    %53 = vector.load %arg2[%c0_19, %c0_20, %c0_21] : memref<8x2x1xf32, #tpu.memory_space<vmem>>, vector<8x2x1xf32>
    %cst_22 = arith.constant 0.000000e+00 : f32
    %54 = vector.broadcast %cst_22 : f32 to vector<2x64xf32>
    %cst_23 = arith.constant 0.000000e+00 : f32
    %55 = vector.broadcast %cst_23 : f32 to vector<2x64xf32>
    %56 = arith.truncf %54 : vector<2x64xf32> to vector<2x64xbf16>
    %cst_24 = arith.constant dense<0.000000e+00> : vector<2x256xf32>
    %57 = tpu.matmul %56, %52, %cst_24 {dimension_numbers = #tpu.dot_dimension_numbers<[1], [0], [0], [1], [0, 0, 1, 1], [], []>} : vector<2x64xbf16>, vector<64x256xbf16>, vector<2x256xf32> -> vector<2x256xf32>
    %58 = vector.extract_strided_slice %50 {offsets = [0, 0], sizes = [2, 256], strides = [1, 1]} : vector<16x256xf32> to vector<2x256xf32>
    %59 = vector.extract_strided_slice %50 {offsets = [14, 0], sizes = [2, 256], strides = [1, 1]} : vector<16x256xf32> to vector<2x256xf32>
    %60 = arith.select %20, %58, %59 : vector<2x256xi1>, vector<2x256xf32>
    %61 = arith.addf %57, %60 : vector<2x256xf32>
    %62 = arith.mulf %61, %30 : vector<2x256xf32>
    %63 = math.tanh %62 : vector<2x256xf32>
    %64 = arith.mulf %30, %63 : vector<2x256xf32>
    %65 = arith.addf %64, %35 : vector<2x256xf32>
    %66 = vector.extract_strided_slice %65 {offsets = [0, 0], sizes = [2, 64], strides = [1, 1]} : vector<2x256xf32> to vector<2x64xf32>
    %67 = vector.extract_strided_slice %65 {offsets = [0, 64], sizes = [2, 64], strides = [1, 1]} : vector<2x256xf32> to vector<2x64xf32>
    %68 = vector.extract_strided_slice %65 {offsets = [0, 128], sizes = [2, 64], strides = [1, 1]} : vector<2x256xf32> to vector<2x64xf32>
    %69 = vector.extract_strided_slice %65 {offsets = [0, 192], sizes = [2, 64], strides = [1, 1]} : vector<2x256xf32> to vector<2x64xf32>
    %70 = arith.mulf %67, %55 : vector<2x64xf32>
    %71 = arith.mulf %66, %68 : vector<2x64xf32>
    %72 = arith.addf %70, %71 : vector<2x64xf32>
    %73 = math.tanh %72 : vector<2x64xf32>
    %74 = arith.mulf %69, %73 : vector<2x64xf32>
    %75 = vector.extract_strided_slice %53 {offsets = [0, 0, 0], sizes = [1, 2, 1], strides = [1, 1, 1]} : vector<8x2x1xf32> to vector<1x2x1xf32>
    %76 = vector.shape_cast %75 : vector<1x2x1xf32> to vector<2x1xf32>
    %77 = vector.extract_strided_slice %53 {offsets = [7, 0, 0], sizes = [1, 2, 1], strides = [1, 1, 1]} : vector<8x2x1xf32> to vector<1x2x1xf32>
    %78 = vector.shape_cast %77 : vector<1x2x1xf32> to vector<2x1xf32>
    %79 = vector.shape_cast %76 : vector<2x1xf32> to vector<2x1xf32>
    %80 = vector.broadcast %79 : vector<2x1xf32> to vector<2x64xf32>
    %81 = vector.shape_cast %78 : vector<2x1xf32> to vector<2x1xf32>
    %82 = vector.broadcast %81 : vector<2x1xf32> to vector<2x64xf32>
    %83 = arith.select %40, %80, %82 : vector<2x64xi1>, vector<2x64xf32>
    %cst_25 = arith.constant 5.000000e-01 : f32
    %84 = vector.broadcast %cst_25 : f32 to vector<2x64xf32>
    %85 = arith.cmpf ogt, %83, %84 : vector<2x64xf32>
    %86 = arith.select %85, %74, %54 : vector<2x64xi1>, vector<2x64xf32>
    %87 = arith.select %85, %72, %55 : vector<2x64xi1>, vector<2x64xf32>
    %88 = vector.extract_strided_slice %74 {offsets = [0, 0], sizes = [2, 32], strides = [1, 1]} : vector<2x64xf32> to vector<2x32xf32>
    %89 = vector.broadcast %76 : vector<2x1xf32> to vector<2x32xf32>
    %90 = arith.mulf %89, %88 : vector<2x32xf32>
    %c0_26 = arith.constant 0 : index
    %c0_27 = arith.constant 0 : index
    %c0_28 = arith.constant 0 : index
    %c0_29 = arith.constant 0 : index
    %91 = vector.load %arg6[%c0_26, %c0_27, %c0_28, %c0_29] : memref<1x8x2x64xf32, #tpu.memory_space<vmem>>, vector<1x1x2x32xf32>
    %92 = vector.shape_cast %91 : vector<1x1x2x32xf32> to vector<2x32xf32>
    %93 = vector.shape_cast %90 : vector<2x32xf32> to vector<1x1x2x32xf32>
    tpu.vector_store %arg6[%c0_26, %c0_27, %c0_28, %c0_29], %93 {strides = array<i32>} : memref<1x8x2x64xf32, #tpu.memory_space<vmem>>, vector<1x1x2x32xf32>,
    %94 = vector.extract_strided_slice %74 {offsets = [0, 32], sizes = [2, 32], strides = [1, 1]} : vector<2x64xf32> to vector<2x32xf32>
    %95 = vector.broadcast %78 : vector<2x1xf32> to vector<2x32xf32>
    %96 = arith.mulf %95, %94 : vector<2x32xf32>
    %c0_30 = arith.constant 0 : index
    %c7 = arith.constant 7 : index
    %c0_31 = arith.constant 0 : index
    %c32 = arith.constant 32 : index
    %97 = vector.load %arg6[%c0_30, %c7, %c0_31, %c32] : memref<1x8x2x64xf32, #tpu.memory_space<vmem>>, vector<1x1x2x32xf32>
    %98 = vector.shape_cast %97 : vector<1x1x2x32xf32> to vector<2x32xf32>
    %99 = vector.shape_cast %96 : vector<2x32xf32> to vector<1x1x2x32xf32>
    tpu.vector_store %arg6[%c0_30, %c7, %c0_31, %c32], %99 {strides = array<i32>} : memref<1x8x2x64xf32, #tpu.memory_space<vmem>>, vector<1x1x2x32xf32>,
    %100 = arith.truncf %86 : vector<2x64xf32> to vector<2x64xbf16>
    %cst_32 = arith.constant dense<0.000000e+00> : vector<2x256xf32>
    %101 = tpu.matmul %100, %52, %cst_32 {dimension_numbers = #tpu.dot_dimension_numbers<[1], [0], [0], [1], [0, 0, 1, 1], [], []>} : vector<2x64xbf16>, vector<64x256xbf16>, vector<2x256xf32> -> vector<2x256xf32>
    %102 = vector.extract_strided_slice %50 {offsets = [2, 0], sizes = [2, 256], strides = [1, 1]} : vector<16x256xf32> to vector<2x256xf32>
    %103 = vector.extract_strided_slice %50 {offsets = [12, 0], sizes = [2, 256], strides = [1, 1]} : vector<16x256xf32> to vector<2x256xf32>
    %104 = arith.select %20, %102, %103 : vector<2x256xi1>, vector<2x256xf32>
    %105 = arith.addf %101, %104 : vector<2x256xf32>
    %106 = arith.mulf %105, %30 : vector<2x256xf32>
    %107 = math.tanh %106 : vector<2x256xf32>
    %108 = arith.mulf %30, %107 : vector<2x256xf32>
    %109 = arith.addf %108, %35 : vector<2x256xf32>
    %110 = vector.extract_strided_slice %109 {offsets = [0, 0], sizes = [2, 64], strides = [1, 1]} : vector<2x256xf32> to vector<2x64xf32>
    %111 = vector.extract_strided_slice %109 {offsets = [0, 64], sizes = [2, 64], strides = [1, 1]} : vector<2x256xf32> to vector<2x64xf32>
    %112 = vector.extract_strided_slice %109 {offsets = [0, 128], sizes = [2, 64], strides = [1, 1]} : vector<2x256xf32> to vector<2x64xf32>
    %113 = vector.extract_strided_slice %109 {offsets = [0, 192], sizes = [2, 64], strides = [1, 1]} : vector<2x256xf32> to vector<2x64xf32>
    %114 = arith.mulf %111, %87 : vector<2x64xf32>
    %115 = arith.mulf %110, %112 : vector<2x64xf32>
    %116 = arith.addf %114, %115 : vector<2x64xf32>
    %117 = math.tanh %116 : vector<2x64xf32>
    %118 = arith.mulf %113, %117 : vector<2x64xf32>
    %119 = vector.extract_strided_slice %53 {offsets = [1, 0, 0], sizes = [1, 2, 1], strides = [1, 1, 1]} : vector<8x2x1xf32> to vector<1x2x1xf32>
    %120 = vector.shape_cast %119 : vector<1x2x1xf32> to vector<2x1xf32>
    %121 = vector.extract_strided_slice %53 {offsets = [6, 0, 0], sizes = [1, 2, 1], strides = [1, 1, 1]} : vector<8x2x1xf32> to vector<1x2x1xf32>
    %122 = vector.shape_cast %121 : vector<1x2x1xf32> to vector<2x1xf32>
    %123 = vector.shape_cast %120 : vector<2x1xf32> to vector<2x1xf32>
    %124 = vector.broadcast %123 : vector<2x1xf32> to vector<2x64xf32>
    %125 = vector.shape_cast %122 : vector<2x1xf32> to vector<2x1xf32>
    %126 = vector.broadcast %125 : vector<2x1xf32> to vector<2x64xf32>
    %127 = arith.select %40, %124, %126 : vector<2x64xi1>, vector<2x64xf32>
    %cst_33 = arith.constant 5.000000e-01 : f32
    %128 = vector.broadcast %cst_33 : f32 to vector<2x64xf32>
    %129 = arith.cmpf ogt, %127, %128 : vector<2x64xf32>
    %130 = arith.select %129, %118, %86 : vector<2x64xi1>, vector<2x64xf32>
    %131 = arith.select %129, %116, %87 : vector<2x64xi1>, vector<2x64xf32>
    %132 = vector.extract_strided_slice %118 {offsets = [0, 0], sizes = [2, 32], strides = [1, 1]} : vector<2x64xf32> to vector<2x32xf32>
    %133 = vector.broadcast %120 : vector<2x1xf32> to vector<2x32xf32>
    %134 = arith.mulf %133, %132 : vector<2x32xf32>
    %c0_34 = arith.constant 0 : index
    %c1 = arith.constant 1 : index
    %c0_35 = arith.constant 0 : index
    %c0_36 = arith.constant 0 : index
    %135 = vector.load %arg6[%c0_34, %c1, %c0_35, %c0_36] : memref<1x8x2x64xf32, #tpu.memory_space<vmem>>, vector<1x1x2x32xf32>
    %136 = vector.shape_cast %135 : vector<1x1x2x32xf32> to vector<2x32xf32>
    %137 = vector.shape_cast %134 : vector<2x32xf32> to vector<1x1x2x32xf32>
    tpu.vector_store %arg6[%c0_34, %c1, %c0_35, %c0_36], %137 {strides = array<i32>} : memref<1x8x2x64xf32, #tpu.memory_space<vmem>>, vector<1x1x2x32xf32>,
    %138 = vector.extract_strided_slice %118 {offsets = [0, 32], sizes = [2, 32], strides = [1, 1]} : vector<2x64xf32> to vector<2x32xf32>
    %139 = vector.broadcast %122 : vector<2x1xf32> to vector<2x32xf32>
    %140 = arith.mulf %139, %138 : vector<2x32xf32>
    %c0_37 = arith.constant 0 : index
    %c6 = arith.constant 6 : index
    %c0_38 = arith.constant 0 : index
    %c32_39 = arith.constant 32 : index
    %141 = vector.load %arg6[%c0_37, %c6, %c0_38, %c32_39] : memref<1x8x2x64xf32, #tpu.memory_space<vmem>>, vector<1x1x2x32xf32>
    %142 = vector.shape_cast %141 : vector<1x1x2x32xf32> to vector<2x32xf32>
    %143 = vector.shape_cast %140 : vector<2x32xf32> to vector<1x1x2x32xf32>
    tpu.vector_store %arg6[%c0_37, %c6, %c0_38, %c32_39], %143 {strides = array<i32>} : memref<1x8x2x64xf32, #tpu.memory_space<vmem>>, vector<1x1x2x32xf32>,
    %144 = arith.truncf %130 : vector<2x64xf32> to vector<2x64xbf16>
    %cst_40 = arith.constant dense<0.000000e+00> : vector<2x256xf32>
    %145 = tpu.matmul %144, %52, %cst_40 {dimension_numbers = #tpu.dot_dimension_numbers<[1], [0], [0], [1], [0, 0, 1, 1], [], []>} : vector<2x64xbf16>, vector<64x256xbf16>, vector<2x256xf32> -> vector<2x256xf32>
    %146 = vector.extract_strided_slice %50 {offsets = [4, 0], sizes = [2, 256], strides = [1, 1]} : vector<16x256xf32> to vector<2x256xf32>
    %147 = vector.extract_strided_slice %50 {offsets = [10, 0], sizes = [2, 256], strides = [1, 1]} : vector<16x256xf32> to vector<2x256xf32>
    %148 = arith.select %20, %146, %147 : vector<2x256xi1>, vector<2x256xf32>
    %149 = arith.addf %145, %148 : vector<2x256xf32>
    %150 = arith.mulf %149, %30 : vector<2x256xf32>
    %151 = math.tanh %150 : vector<2x256xf32>
    %152 = arith.mulf %30, %151 : vector<2x256xf32>
    %153 = arith.addf %152, %35 : vector<2x256xf32>
    %154 = vector.extract_strided_slice %153 {offsets = [0, 0], sizes = [2, 64], strides = [1, 1]} : vector<2x256xf32> to vector<2x64xf32>
    %155 = vector.extract_strided_slice %153 {offsets = [0, 64], sizes = [2, 64], strides = [1, 1]} : vector<2x256xf32> to vector<2x64xf32>
    %156 = vector.extract_strided_slice %153 {offsets = [0, 128], sizes = [2, 64], strides = [1, 1]} : vector<2x256xf32> to vector<2x64xf32>
    %157 = vector.extract_strided_slice %153 {offsets = [0, 192], sizes = [2, 64], strides = [1, 1]} : vector<2x256xf32> to vector<2x64xf32>
    %158 = arith.mulf %155, %131 : vector<2x64xf32>
    %159 = arith.mulf %154, %156 : vector<2x64xf32>
    %160 = arith.addf %158, %159 : vector<2x64xf32>
    %161 = math.tanh %160 : vector<2x64xf32>
    %162 = arith.mulf %157, %161 : vector<2x64xf32>
    %163 = vector.extract_strided_slice %53 {offsets = [2, 0, 0], sizes = [1, 2, 1], strides = [1, 1, 1]} : vector<8x2x1xf32> to vector<1x2x1xf32>
    %164 = vector.shape_cast %163 : vector<1x2x1xf32> to vector<2x1xf32>
    %165 = vector.extract_strided_slice %53 {offsets = [5, 0, 0], sizes = [1, 2, 1], strides = [1, 1, 1]} : vector<8x2x1xf32> to vector<1x2x1xf32>
    %166 = vector.shape_cast %165 : vector<1x2x1xf32> to vector<2x1xf32>
    %167 = vector.shape_cast %164 : vector<2x1xf32> to vector<2x1xf32>
    %168 = vector.broadcast %167 : vector<2x1xf32> to vector<2x64xf32>
    %169 = vector.shape_cast %166 : vector<2x1xf32> to vector<2x1xf32>
    %170 = vector.broadcast %169 : vector<2x1xf32> to vector<2x64xf32>
    %171 = arith.select %40, %168, %170 : vector<2x64xi1>, vector<2x64xf32>
    %cst_41 = arith.constant 5.000000e-01 : f32
    %172 = vector.broadcast %cst_41 : f32 to vector<2x64xf32>
    %173 = arith.cmpf ogt, %171, %172 : vector<2x64xf32>
    %174 = arith.select %173, %162, %130 : vector<2x64xi1>, vector<2x64xf32>
    %175 = arith.select %173, %160, %131 : vector<2x64xi1>, vector<2x64xf32>
    %176 = vector.extract_strided_slice %162 {offsets = [0, 0], sizes = [2, 32], strides = [1, 1]} : vector<2x64xf32> to vector<2x32xf32>
    %177 = vector.broadcast %164 : vector<2x1xf32> to vector<2x32xf32>
    %178 = arith.mulf %177, %176 : vector<2x32xf32>
    %c0_42 = arith.constant 0 : index
    %c2 = arith.constant 2 : index
    %c0_43 = arith.constant 0 : index
    %c0_44 = arith.constant 0 : index
    %179 = vector.load %arg6[%c0_42, %c2, %c0_43, %c0_44] : memref<1x8x2x64xf32, #tpu.memory_space<vmem>>, vector<1x1x2x32xf32>
    %180 = vector.shape_cast %179 : vector<1x1x2x32xf32> to vector<2x32xf32>
    %181 = vector.shape_cast %178 : vector<2x32xf32> to vector<1x1x2x32xf32>
    tpu.vector_store %arg6[%c0_42, %c2, %c0_43, %c0_44], %181 {strides = array<i32>} : memref<1x8x2x64xf32, #tpu.memory_space<vmem>>, vector<1x1x2x32xf32>,
    %182 = vector.extract_strided_slice %162 {offsets = [0, 32], sizes = [2, 32], strides = [1, 1]} : vector<2x64xf32> to vector<2x32xf32>
    %183 = vector.broadcast %166 : vector<2x1xf32> to vector<2x32xf32>
    %184 = arith.mulf %183, %182 : vector<2x32xf32>
    %c0_45 = arith.constant 0 : index
    %c5 = arith.constant 5 : index
    %c0_46 = arith.constant 0 : index
    %c32_47 = arith.constant 32 : index
    %185 = vector.load %arg6[%c0_45, %c5, %c0_46, %c32_47] : memref<1x8x2x64xf32, #tpu.memory_space<vmem>>, vector<1x1x2x32xf32>
    %186 = vector.shape_cast %185 : vector<1x1x2x32xf32> to vector<2x32xf32>
    %187 = vector.shape_cast %184 : vector<2x32xf32> to vector<1x1x2x32xf32>
    tpu.vector_store %arg6[%c0_45, %c5, %c0_46, %c32_47], %187 {strides = array<i32>} : memref<1x8x2x64xf32, #tpu.memory_space<vmem>>, vector<1x1x2x32xf32>,
    %188 = arith.truncf %174 : vector<2x64xf32> to vector<2x64xbf16>
    %cst_48 = arith.constant dense<0.000000e+00> : vector<2x256xf32>
    %189 = tpu.matmul %188, %52, %cst_48 {dimension_numbers = #tpu.dot_dimension_numbers<[1], [0], [0], [1], [0, 0, 1, 1], [], []>} : vector<2x64xbf16>, vector<64x256xbf16>, vector<2x256xf32> -> vector<2x256xf32>
    %190 = vector.extract_strided_slice %50 {offsets = [6, 0], sizes = [2, 256], strides = [1, 1]} : vector<16x256xf32> to vector<2x256xf32>
    %191 = vector.extract_strided_slice %50 {offsets = [8, 0], sizes = [2, 256], strides = [1, 1]} : vector<16x256xf32> to vector<2x256xf32>
    %192 = arith.select %20, %190, %191 : vector<2x256xi1>, vector<2x256xf32>
    %193 = arith.addf %189, %192 : vector<2x256xf32>
    %194 = arith.mulf %193, %30 : vector<2x256xf32>
    %195 = math.tanh %194 : vector<2x256xf32>
    %196 = arith.mulf %30, %195 : vector<2x256xf32>
    %197 = arith.addf %196, %35 : vector<2x256xf32>
    %198 = vector.extract_strided_slice %197 {offsets = [0, 0], sizes = [2, 64], strides = [1, 1]} : vector<2x256xf32> to vector<2x64xf32>
    %199 = vector.extract_strided_slice %197 {offsets = [0, 64], sizes = [2, 64], strides = [1, 1]} : vector<2x256xf32> to vector<2x64xf32>
    %200 = vector.extract_strided_slice %197 {offsets = [0, 128], sizes = [2, 64], strides = [1, 1]} : vector<2x256xf32> to vector<2x64xf32>
    %201 = vector.extract_strided_slice %197 {offsets = [0, 192], sizes = [2, 64], strides = [1, 1]} : vector<2x256xf32> to vector<2x64xf32>
    %202 = arith.mulf %199, %175 : vector<2x64xf32>
    %203 = arith.mulf %198, %200 : vector<2x64xf32>
    %204 = arith.addf %202, %203 : vector<2x64xf32>
    %205 = math.tanh %204 : vector<2x64xf32>
    %206 = arith.mulf %201, %205 : vector<2x64xf32>
    %207 = vector.extract_strided_slice %53 {offsets = [3, 0, 0], sizes = [1, 2, 1], strides = [1, 1, 1]} : vector<8x2x1xf32> to vector<1x2x1xf32>
    %208 = vector.shape_cast %207 : vector<1x2x1xf32> to vector<2x1xf32>
    %209 = vector.extract_strided_slice %53 {offsets = [4, 0, 0], sizes = [1, 2, 1], strides = [1, 1, 1]} : vector<8x2x1xf32> to vector<1x2x1xf32>
    %210 = vector.shape_cast %209 : vector<1x2x1xf32> to vector<2x1xf32>
    %211 = vector.shape_cast %208 : vector<2x1xf32> to vector<2x1xf32>
    %212 = vector.broadcast %211 : vector<2x1xf32> to vector<2x64xf32>
    %213 = vector.shape_cast %210 : vector<2x1xf32> to vector<2x1xf32>
    %214 = vector.broadcast %213 : vector<2x1xf32> to vector<2x64xf32>
    %215 = arith.select %40, %212, %214 : vector<2x64xi1>, vector<2x64xf32>
    %cst_49 = arith.constant 5.000000e-01 : f32
    %216 = vector.broadcast %cst_49 : f32 to vector<2x64xf32>
    %217 = arith.cmpf ogt, %215, %216 : vector<2x64xf32>
    %218 = arith.select %217, %206, %174 : vector<2x64xi1>, vector<2x64xf32>
    %219 = arith.select %217, %204, %175 : vector<2x64xi1>, vector<2x64xf32>
    %220 = vector.extract_strided_slice %206 {offsets = [0, 0], sizes = [2, 32], strides = [1, 1]} : vector<2x64xf32> to vector<2x32xf32>
    %221 = vector.broadcast %208 : vector<2x1xf32> to vector<2x32xf32>
    %222 = arith.mulf %221, %220 : vector<2x32xf32>
    %c0_50 = arith.constant 0 : index
    %c3 = arith.constant 3 : index
    %c0_51 = arith.constant 0 : index
    %c0_52 = arith.constant 0 : index
    %223 = vector.load %arg6[%c0_50, %c3, %c0_51, %c0_52] : memref<1x8x2x64xf32, #tpu.memory_space<vmem>>, vector<1x1x2x32xf32>
    %224 = vector.shape_cast %223 : vector<1x1x2x32xf32> to vector<2x32xf32>
    %225 = vector.shape_cast %222 : vector<2x32xf32> to vector<1x1x2x32xf32>
    tpu.vector_store %arg6[%c0_50, %c3, %c0_51, %c0_52], %225 {strides = array<i32>} : memref<1x8x2x64xf32, #tpu.memory_space<vmem>>, vector<1x1x2x32xf32>,
    %226 = vector.extract_strided_slice %206 {offsets = [0, 32], sizes = [2, 32], strides = [1, 1]} : vector<2x64xf32> to vector<2x32xf32>
    %227 = vector.broadcast %210 : vector<2x1xf32> to vector<2x32xf32>
    %228 = arith.mulf %227, %226 : vector<2x32xf32>
    %c0_53 = arith.constant 0 : index
    %c4 = arith.constant 4 : index
    %c0_54 = arith.constant 0 : index
    %c32_55 = arith.constant 32 : index
    %229 = vector.load %arg6[%c0_53, %c4, %c0_54, %c32_55] : memref<1x8x2x64xf32, #tpu.memory_space<vmem>>, vector<1x1x2x32xf32>
    %230 = vector.shape_cast %229 : vector<1x1x2x32xf32> to vector<2x32xf32>
    %231 = vector.shape_cast %228 : vector<2x32xf32> to vector<1x1x2x32xf32>
    tpu.vector_store %arg6[%c0_53, %c4, %c0_54, %c32_55], %231 {strides = array<i32>} : memref<1x8x2x64xf32, #tpu.memory_space<vmem>>, vector<1x1x2x32xf32>,
    %232 = arith.truncf %218 : vector<2x64xf32> to vector<2x64xbf16>
    %cst_56 = arith.constant dense<0.000000e+00> : vector<2x256xf32>
    %233 = tpu.matmul %232, %52, %cst_56 {dimension_numbers = #tpu.dot_dimension_numbers<[1], [0], [0], [1], [0, 0, 1, 1], [], []>} : vector<2x64xbf16>, vector<64x256xbf16>, vector<2x256xf32> -> vector<2x256xf32>
    %234 = vector.extract_strided_slice %50 {offsets = [8, 0], sizes = [2, 256], strides = [1, 1]} : vector<16x256xf32> to vector<2x256xf32>
    %235 = vector.extract_strided_slice %50 {offsets = [6, 0], sizes = [2, 256], strides = [1, 1]} : vector<16x256xf32> to vector<2x256xf32>
    %236 = arith.select %20, %234, %235 : vector<2x256xi1>, vector<2x256xf32>
    %237 = arith.addf %233, %236 : vector<2x256xf32>
    %238 = arith.mulf %237, %30 : vector<2x256xf32>
    %239 = math.tanh %238 : vector<2x256xf32>
    %240 = arith.mulf %30, %239 : vector<2x256xf32>
    %241 = arith.addf %240, %35 : vector<2x256xf32>
    %242 = vector.extract_strided_slice %241 {offsets = [0, 0], sizes = [2, 64], strides = [1, 1]} : vector<2x256xf32> to vector<2x64xf32>
    %243 = vector.extract_strided_slice %241 {offsets = [0, 64], sizes = [2, 64], strides = [1, 1]} : vector<2x256xf32> to vector<2x64xf32>
    %244 = vector.extract_strided_slice %241 {offsets = [0, 128], sizes = [2, 64], strides = [1, 1]} : vector<2x256xf32> to vector<2x64xf32>
    %245 = vector.extract_strided_slice %241 {offsets = [0, 192], sizes = [2, 64], strides = [1, 1]} : vector<2x256xf32> to vector<2x64xf32>
    %246 = arith.mulf %243, %219 : vector<2x64xf32>
    %247 = arith.mulf %242, %244 : vector<2x64xf32>
    %248 = arith.addf %246, %247 : vector<2x64xf32>
    %249 = math.tanh %248 : vector<2x64xf32>
    %250 = arith.mulf %245, %249 : vector<2x64xf32>
    %251 = vector.extract_strided_slice %53 {offsets = [4, 0, 0], sizes = [1, 2, 1], strides = [1, 1, 1]} : vector<8x2x1xf32> to vector<1x2x1xf32>
    %252 = vector.shape_cast %251 : vector<1x2x1xf32> to vector<2x1xf32>
    %253 = vector.extract_strided_slice %53 {offsets = [3, 0, 0], sizes = [1, 2, 1], strides = [1, 1, 1]} : vector<8x2x1xf32> to vector<1x2x1xf32>
    %254 = vector.shape_cast %253 : vector<1x2x1xf32> to vector<2x1xf32>
    %255 = vector.shape_cast %252 : vector<2x1xf32> to vector<2x1xf32>
    %256 = vector.broadcast %255 : vector<2x1xf32> to vector<2x64xf32>
    %257 = vector.shape_cast %254 : vector<2x1xf32> to vector<2x1xf32>
    %258 = vector.broadcast %257 : vector<2x1xf32> to vector<2x64xf32>
    %259 = arith.select %40, %256, %258 : vector<2x64xi1>, vector<2x64xf32>
    %cst_57 = arith.constant 5.000000e-01 : f32
    %260 = vector.broadcast %cst_57 : f32 to vector<2x64xf32>
    %261 = arith.cmpf ogt, %259, %260 : vector<2x64xf32>
    %262 = arith.select %261, %250, %218 : vector<2x64xi1>, vector<2x64xf32>
    %263 = arith.select %261, %248, %219 : vector<2x64xi1>, vector<2x64xf32>
    %264 = vector.extract_strided_slice %250 {offsets = [0, 0], sizes = [2, 32], strides = [1, 1]} : vector<2x64xf32> to vector<2x32xf32>
    %265 = vector.broadcast %252 : vector<2x1xf32> to vector<2x32xf32>
    %266 = arith.mulf %265, %264 : vector<2x32xf32>
    %c0_58 = arith.constant 0 : index
    %c4_59 = arith.constant 4 : index
    %c0_60 = arith.constant 0 : index
    %c0_61 = arith.constant 0 : index
    %267 = vector.load %arg6[%c0_58, %c4_59, %c0_60, %c0_61] : memref<1x8x2x64xf32, #tpu.memory_space<vmem>>, vector<1x1x2x32xf32>
    %268 = vector.shape_cast %267 : vector<1x1x2x32xf32> to vector<2x32xf32>
    %269 = vector.shape_cast %266 : vector<2x32xf32> to vector<1x1x2x32xf32>
    tpu.vector_store %arg6[%c0_58, %c4_59, %c0_60, %c0_61], %269 {strides = array<i32>} : memref<1x8x2x64xf32, #tpu.memory_space<vmem>>, vector<1x1x2x32xf32>,
    %270 = vector.extract_strided_slice %250 {offsets = [0, 32], sizes = [2, 32], strides = [1, 1]} : vector<2x64xf32> to vector<2x32xf32>
    %271 = vector.broadcast %254 : vector<2x1xf32> to vector<2x32xf32>
    %272 = arith.mulf %271, %270 : vector<2x32xf32>
    %c0_62 = arith.constant 0 : index
    %c3_63 = arith.constant 3 : index
    %c0_64 = arith.constant 0 : index
    %c32_65 = arith.constant 32 : index
    %273 = vector.load %arg6[%c0_62, %c3_63, %c0_64, %c32_65] : memref<1x8x2x64xf32, #tpu.memory_space<vmem>>, vector<1x1x2x32xf32>
    %274 = vector.shape_cast %273 : vector<1x1x2x32xf32> to vector<2x32xf32>
    %275 = vector.shape_cast %272 : vector<2x32xf32> to vector<1x1x2x32xf32>
    tpu.vector_store %arg6[%c0_62, %c3_63, %c0_64, %c32_65], %275 {strides = array<i32>} : memref<1x8x2x64xf32, #tpu.memory_space<vmem>>, vector<1x1x2x32xf32>,
    %276 = arith.truncf %262 : vector<2x64xf32> to vector<2x64xbf16>
    %cst_66 = arith.constant dense<0.000000e+00> : vector<2x256xf32>
    %277 = tpu.matmul %276, %52, %cst_66 {dimension_numbers = #tpu.dot_dimension_numbers<[1], [0], [0], [1], [0, 0, 1, 1], [], []>} : vector<2x64xbf16>, vector<64x256xbf16>, vector<2x256xf32> -> vector<2x256xf32>
    %278 = vector.extract_strided_slice %50 {offsets = [10, 0], sizes = [2, 256], strides = [1, 1]} : vector<16x256xf32> to vector<2x256xf32>
    %279 = vector.extract_strided_slice %50 {offsets = [4, 0], sizes = [2, 256], strides = [1, 1]} : vector<16x256xf32> to vector<2x256xf32>
    %280 = arith.select %20, %278, %279 : vector<2x256xi1>, vector<2x256xf32>
    %281 = arith.addf %277, %280 : vector<2x256xf32>
    %282 = arith.mulf %281, %30 : vector<2x256xf32>
    %283 = math.tanh %282 : vector<2x256xf32>
    %284 = arith.mulf %30, %283 : vector<2x256xf32>
    %285 = arith.addf %284, %35 : vector<2x256xf32>
    %286 = vector.extract_strided_slice %285 {offsets = [0, 0], sizes = [2, 64], strides = [1, 1]} : vector<2x256xf32> to vector<2x64xf32>
    %287 = vector.extract_strided_slice %285 {offsets = [0, 64], sizes = [2, 64], strides = [1, 1]} : vector<2x256xf32> to vector<2x64xf32>
    %288 = vector.extract_strided_slice %285 {offsets = [0, 128], sizes = [2, 64], strides = [1, 1]} : vector<2x256xf32> to vector<2x64xf32>
    %289 = vector.extract_strided_slice %285 {offsets = [0, 192], sizes = [2, 64], strides = [1, 1]} : vector<2x256xf32> to vector<2x64xf32>
    %290 = arith.mulf %287, %263 : vector<2x64xf32>
    %291 = arith.mulf %286, %288 : vector<2x64xf32>
    %292 = arith.addf %290, %291 : vector<2x64xf32>
    %293 = math.tanh %292 : vector<2x64xf32>
    %294 = arith.mulf %289, %293 : vector<2x64xf32>
    %295 = vector.extract_strided_slice %53 {offsets = [5, 0, 0], sizes = [1, 2, 1], strides = [1, 1, 1]} : vector<8x2x1xf32> to vector<1x2x1xf32>
    %296 = vector.shape_cast %295 : vector<1x2x1xf32> to vector<2x1xf32>
    %297 = vector.extract_strided_slice %53 {offsets = [2, 0, 0], sizes = [1, 2, 1], strides = [1, 1, 1]} : vector<8x2x1xf32> to vector<1x2x1xf32>
    %298 = vector.shape_cast %297 : vector<1x2x1xf32> to vector<2x1xf32>
    %299 = vector.shape_cast %296 : vector<2x1xf32> to vector<2x1xf32>
    %300 = vector.broadcast %299 : vector<2x1xf32> to vector<2x64xf32>
    %301 = vector.shape_cast %298 : vector<2x1xf32> to vector<2x1xf32>
    %302 = vector.broadcast %301 : vector<2x1xf32> to vector<2x64xf32>
    %303 = arith.select %40, %300, %302 : vector<2x64xi1>, vector<2x64xf32>
    %cst_67 = arith.constant 5.000000e-01 : f32
    %304 = vector.broadcast %cst_67 : f32 to vector<2x64xf32>
    %305 = arith.cmpf ogt, %303, %304 : vector<2x64xf32>
    %306 = arith.select %305, %294, %262 : vector<2x64xi1>, vector<2x64xf32>
    %307 = arith.select %305, %292, %263 : vector<2x64xi1>, vector<2x64xf32>
    %308 = vector.extract_strided_slice %294 {offsets = [0, 0], sizes = [2, 32], strides = [1, 1]} : vector<2x64xf32> to vector<2x32xf32>
    %309 = vector.broadcast %296 : vector<2x1xf32> to vector<2x32xf32>
    %310 = arith.mulf %309, %308 : vector<2x32xf32>
    %c0_68 = arith.constant 0 : index
    %c5_69 = arith.constant 5 : index
    %c0_70 = arith.constant 0 : index
    %c0_71 = arith.constant 0 : index
    %311 = vector.load %arg6[%c0_68, %c5_69, %c0_70, %c0_71] : memref<1x8x2x64xf32, #tpu.memory_space<vmem>>, vector<1x1x2x32xf32>
    %312 = vector.shape_cast %311 : vector<1x1x2x32xf32> to vector<2x32xf32>
    %313 = vector.shape_cast %310 : vector<2x32xf32> to vector<1x1x2x32xf32>
    tpu.vector_store %arg6[%c0_68, %c5_69, %c0_70, %c0_71], %313 {strides = array<i32>} : memref<1x8x2x64xf32, #tpu.memory_space<vmem>>, vector<1x1x2x32xf32>,
    %314 = vector.extract_strided_slice %294 {offsets = [0, 32], sizes = [2, 32], strides = [1, 1]} : vector<2x64xf32> to vector<2x32xf32>
    %315 = vector.broadcast %298 : vector<2x1xf32> to vector<2x32xf32>
    %316 = arith.mulf %315, %314 : vector<2x32xf32>
    %c0_72 = arith.constant 0 : index
    %c2_73 = arith.constant 2 : index
    %c0_74 = arith.constant 0 : index
    %c32_75 = arith.constant 32 : index
    %317 = vector.load %arg6[%c0_72, %c2_73, %c0_74, %c32_75] : memref<1x8x2x64xf32, #tpu.memory_space<vmem>>, vector<1x1x2x32xf32>
    %318 = vector.shape_cast %317 : vector<1x1x2x32xf32> to vector<2x32xf32>
    %319 = vector.shape_cast %316 : vector<2x32xf32> to vector<1x1x2x32xf32>
    tpu.vector_store %arg6[%c0_72, %c2_73, %c0_74, %c32_75], %319 {strides = array<i32>} : memref<1x8x2x64xf32, #tpu.memory_space<vmem>>, vector<1x1x2x32xf32>,
    %320 = arith.truncf %306 : vector<2x64xf32> to vector<2x64xbf16>
    %cst_76 = arith.constant dense<0.000000e+00> : vector<2x256xf32>
    %321 = tpu.matmul %320, %52, %cst_76 {dimension_numbers = #tpu.dot_dimension_numbers<[1], [0], [0], [1], [0, 0, 1, 1], [], []>} : vector<2x64xbf16>, vector<64x256xbf16>, vector<2x256xf32> -> vector<2x256xf32>
    %322 = vector.extract_strided_slice %50 {offsets = [12, 0], sizes = [2, 256], strides = [1, 1]} : vector<16x256xf32> to vector<2x256xf32>
    %323 = vector.extract_strided_slice %50 {offsets = [2, 0], sizes = [2, 256], strides = [1, 1]} : vector<16x256xf32> to vector<2x256xf32>
    %324 = arith.select %20, %322, %323 : vector<2x256xi1>, vector<2x256xf32>
    %325 = arith.addf %321, %324 : vector<2x256xf32>
    %326 = arith.mulf %325, %30 : vector<2x256xf32>
    %327 = math.tanh %326 : vector<2x256xf32>
    %328 = arith.mulf %30, %327 : vector<2x256xf32>
    %329 = arith.addf %328, %35 : vector<2x256xf32>
    %330 = vector.extract_strided_slice %329 {offsets = [0, 0], sizes = [2, 64], strides = [1, 1]} : vector<2x256xf32> to vector<2x64xf32>
    %331 = vector.extract_strided_slice %329 {offsets = [0, 64], sizes = [2, 64], strides = [1, 1]} : vector<2x256xf32> to vector<2x64xf32>
    %332 = vector.extract_strided_slice %329 {offsets = [0, 128], sizes = [2, 64], strides = [1, 1]} : vector<2x256xf32> to vector<2x64xf32>
    %333 = vector.extract_strided_slice %329 {offsets = [0, 192], sizes = [2, 64], strides = [1, 1]} : vector<2x256xf32> to vector<2x64xf32>
    %334 = arith.mulf %331, %307 : vector<2x64xf32>
    %335 = arith.mulf %330, %332 : vector<2x64xf32>
    %336 = arith.addf %334, %335 : vector<2x64xf32>
    %337 = math.tanh %336 : vector<2x64xf32>
    %338 = arith.mulf %333, %337 : vector<2x64xf32>
    %339 = vector.extract_strided_slice %53 {offsets = [6, 0, 0], sizes = [1, 2, 1], strides = [1, 1, 1]} : vector<8x2x1xf32> to vector<1x2x1xf32>
    %340 = vector.shape_cast %339 : vector<1x2x1xf32> to vector<2x1xf32>
    %341 = vector.extract_strided_slice %53 {offsets = [1, 0, 0], sizes = [1, 2, 1], strides = [1, 1, 1]} : vector<8x2x1xf32> to vector<1x2x1xf32>
    %342 = vector.shape_cast %341 : vector<1x2x1xf32> to vector<2x1xf32>
    %343 = vector.shape_cast %340 : vector<2x1xf32> to vector<2x1xf32>
    %344 = vector.broadcast %343 : vector<2x1xf32> to vector<2x64xf32>
    %345 = vector.shape_cast %342 : vector<2x1xf32> to vector<2x1xf32>
    %346 = vector.broadcast %345 : vector<2x1xf32> to vector<2x64xf32>
    %347 = arith.select %40, %344, %346 : vector<2x64xi1>, vector<2x64xf32>
    %cst_77 = arith.constant 5.000000e-01 : f32
    %348 = vector.broadcast %cst_77 : f32 to vector<2x64xf32>
    %349 = arith.cmpf ogt, %347, %348 : vector<2x64xf32>
    %350 = arith.select %349, %338, %306 : vector<2x64xi1>, vector<2x64xf32>
    %351 = arith.select %349, %336, %307 : vector<2x64xi1>, vector<2x64xf32>
    %352 = vector.extract_strided_slice %338 {offsets = [0, 0], sizes = [2, 32], strides = [1, 1]} : vector<2x64xf32> to vector<2x32xf32>
    %353 = vector.broadcast %340 : vector<2x1xf32> to vector<2x32xf32>
    %354 = arith.mulf %353, %352 : vector<2x32xf32>
    %c0_78 = arith.constant 0 : index
    %c6_79 = arith.constant 6 : index
    %c0_80 = arith.constant 0 : index
    %c0_81 = arith.constant 0 : index
    %355 = vector.load %arg6[%c0_78, %c6_79, %c0_80, %c0_81] : memref<1x8x2x64xf32, #tpu.memory_space<vmem>>, vector<1x1x2x32xf32>
    %356 = vector.shape_cast %355 : vector<1x1x2x32xf32> to vector<2x32xf32>
    %357 = vector.shape_cast %354 : vector<2x32xf32> to vector<1x1x2x32xf32>
    tpu.vector_store %arg6[%c0_78, %c6_79, %c0_80, %c0_81], %357 {strides = array<i32>} : memref<1x8x2x64xf32, #tpu.memory_space<vmem>>, vector<1x1x2x32xf32>,
    %358 = vector.extract_strided_slice %338 {offsets = [0, 32], sizes = [2, 32], strides = [1, 1]} : vector<2x64xf32> to vector<2x32xf32>
    %359 = vector.broadcast %342 : vector<2x1xf32> to vector<2x32xf32>
    %360 = arith.mulf %359, %358 : vector<2x32xf32>
    %c0_82 = arith.constant 0 : index
    %c1_83 = arith.constant 1 : index
    %c0_84 = arith.constant 0 : index
    %c32_85 = arith.constant 32 : index
    %361 = vector.load %arg6[%c0_82, %c1_83, %c0_84, %c32_85] : memref<1x8x2x64xf32, #tpu.memory_space<vmem>>, vector<1x1x2x32xf32>
    %362 = vector.shape_cast %361 : vector<1x1x2x32xf32> to vector<2x32xf32>
    %363 = vector.shape_cast %360 : vector<2x32xf32> to vector<1x1x2x32xf32>
    tpu.vector_store %arg6[%c0_82, %c1_83, %c0_84, %c32_85], %363 {strides = array<i32>} : memref<1x8x2x64xf32, #tpu.memory_space<vmem>>, vector<1x1x2x32xf32>,
    %364 = arith.truncf %350 : vector<2x64xf32> to vector<2x64xbf16>
    %cst_86 = arith.constant dense<0.000000e+00> : vector<2x256xf32>
    %365 = tpu.matmul %364, %52, %cst_86 {dimension_numbers = #tpu.dot_dimension_numbers<[1], [0], [0], [1], [0, 0, 1, 1], [], []>} : vector<2x64xbf16>, vector<64x256xbf16>, vector<2x256xf32> -> vector<2x256xf32>
    %366 = vector.extract_strided_slice %50 {offsets = [14, 0], sizes = [2, 256], strides = [1, 1]} : vector<16x256xf32> to vector<2x256xf32>
    %367 = vector.extract_strided_slice %50 {offsets = [0, 0], sizes = [2, 256], strides = [1, 1]} : vector<16x256xf32> to vector<2x256xf32>
    %368 = arith.select %20, %366, %367 : vector<2x256xi1>, vector<2x256xf32>
    %369 = arith.addf %365, %368 : vector<2x256xf32>
    %370 = arith.mulf %369, %30 : vector<2x256xf32>
    %371 = math.tanh %370 : vector<2x256xf32>
    %372 = arith.mulf %30, %371 : vector<2x256xf32>
    %373 = arith.addf %372, %35 : vector<2x256xf32>
    %374 = vector.extract_strided_slice %373 {offsets = [0, 0], sizes = [2, 64], strides = [1, 1]} : vector<2x256xf32> to vector<2x64xf32>
    %375 = vector.extract_strided_slice %373 {offsets = [0, 64], sizes = [2, 64], strides = [1, 1]} : vector<2x256xf32> to vector<2x64xf32>
    %376 = vector.extract_strided_slice %373 {offsets = [0, 128], sizes = [2, 64], strides = [1, 1]} : vector<2x256xf32> to vector<2x64xf32>
    %377 = vector.extract_strided_slice %373 {offsets = [0, 192], sizes = [2, 64], strides = [1, 1]} : vector<2x256xf32> to vector<2x64xf32>
    %378 = arith.mulf %375, %351 : vector<2x64xf32>
    %379 = arith.mulf %374, %376 : vector<2x64xf32>
    %380 = arith.addf %378, %379 : vector<2x64xf32>
    %381 = math.tanh %380 : vector<2x64xf32>
    %382 = arith.mulf %377, %381 : vector<2x64xf32>
    %383 = vector.extract_strided_slice %53 {offsets = [7, 0, 0], sizes = [1, 2, 1], strides = [1, 1, 1]} : vector<8x2x1xf32> to vector<1x2x1xf32>
    %384 = vector.shape_cast %383 : vector<1x2x1xf32> to vector<2x1xf32>
    %385 = vector.extract_strided_slice %53 {offsets = [0, 0, 0], sizes = [1, 2, 1], strides = [1, 1, 1]} : vector<8x2x1xf32> to vector<1x2x1xf32>
    %386 = vector.shape_cast %385 : vector<1x2x1xf32> to vector<2x1xf32>
    %387 = vector.extract_strided_slice %382 {offsets = [0, 0], sizes = [2, 32], strides = [1, 1]} : vector<2x64xf32> to vector<2x32xf32>
    %388 = vector.broadcast %384 : vector<2x1xf32> to vector<2x32xf32>
    %389 = arith.mulf %388, %387 : vector<2x32xf32>
    %c0_87 = arith.constant 0 : index
    %c7_88 = arith.constant 7 : index
    %c0_89 = arith.constant 0 : index
    %c0_90 = arith.constant 0 : index
    %390 = vector.load %arg6[%c0_87, %c7_88, %c0_89, %c0_90] : memref<1x8x2x64xf32, #tpu.memory_space<vmem>>, vector<1x1x2x32xf32>
    %391 = vector.shape_cast %390 : vector<1x1x2x32xf32> to vector<2x32xf32>
    %392 = vector.shape_cast %389 : vector<2x32xf32> to vector<1x1x2x32xf32>
    tpu.vector_store %arg6[%c0_87, %c7_88, %c0_89, %c0_90], %392 {strides = array<i32>} : memref<1x8x2x64xf32, #tpu.memory_space<vmem>>, vector<1x1x2x32xf32>,
    %393 = vector.extract_strided_slice %382 {offsets = [0, 32], sizes = [2, 32], strides = [1, 1]} : vector<2x64xf32> to vector<2x32xf32>
    %394 = vector.broadcast %386 : vector<2x1xf32> to vector<2x32xf32>
    %395 = arith.mulf %394, %393 : vector<2x32xf32>
    %c0_91 = arith.constant 0 : index
    %c0_92 = arith.constant 0 : index
    %c0_93 = arith.constant 0 : index
    %c32_94 = arith.constant 32 : index
    %396 = vector.load %arg6[%c0_91, %c0_92, %c0_93, %c32_94] : memref<1x8x2x64xf32, #tpu.memory_space<vmem>>, vector<1x1x2x32xf32>
    %397 = vector.shape_cast %396 : vector<1x1x2x32xf32> to vector<2x32xf32>
    %398 = vector.shape_cast %395 : vector<2x32xf32> to vector<1x1x2x32xf32>
    tpu.vector_store %arg6[%c0_91, %c0_92, %c0_93, %c32_94], %398 {strides = array<i32>} : memref<1x8x2x64xf32, #tpu.memory_space<vmem>>, vector<1x1x2x32xf32>,
    return
  }
  func.func @transform_0(%arg0: i32) -> (i32, i32, i32) {
    %c0_i32 = arith.constant 0 : i32
    %c0_i32_0 = arith.constant 0 : i32
    %c0_i32_1 = arith.constant 0 : i32
    %c0_i32_2 = arith.constant 0 : i32
    return %c0_i32, %c0_i32_0, %c0_i32_1 : i32, i32, i32
  }
  func.func @transform_1(%arg0: i32) -> (i32, i32, i32) {
    %c0_i32 = arith.constant 0 : i32
    %c0_i32_0 = arith.constant 0 : i32
    %c0_i32_1 = arith.constant 0 : i32
    %c0_i32_2 = arith.constant 0 : i32
    return %c0_i32, %c0_i32_0, %c0_i32_1 : i32, i32, i32
  }
  func.func @transform_2(%arg0: i32) -> (i32, i32, i32) {
    %c0_i32 = arith.constant 0 : i32
    %c0_i32_0 = arith.constant 0 : i32
    %c0_i32_1 = arith.constant 0 : i32
    return %arg0, %c0_i32, %c0_i32_0 : i32, i32, i32
  }
  func.func @transform_3(%arg0: i32) -> (i32, i32, i32) {
    %c0_i32 = arith.constant 0 : i32
    %c0_i32_0 = arith.constant 0 : i32
    %c0_i32_1 = arith.constant 0 : i32
    return %arg0, %c0_i32, %c0_i32_0 : i32, i32, i32
  }
  func.func @transform_4(%arg0: i32) -> (i32, i32, i32) {
    %c0_i32 = arith.constant 0 : i32
    %c0_i32_0 = arith.constant 0 : i32
    %c0_i32_1 = arith.constant 0 : i32
    return %arg0, %c0_i32, %c0_i32_0 : i32, i32, i32
  }
  func.func @transform_5(%arg0: i32) -> (i32, i32, i32, i32) {
    %c0_i32 = arith.constant 0 : i32
    %c0_i32_0 = arith.constant 0 : i32
    %c0_i32_1 = arith.constant 0 : i32
    %c0_i32_2 = arith.constant 0 : i32
    return %arg0, %c0_i32, %c0_i32_0, %c0_i32_1 : i32, i32, i32, i32
  }
}

</mosaic_0001>

<bundles_post_ra>
// kernel: _forward_impl.3
= control target key start
LH: loop header
LB: loop body
LE: loop exit
PB: predicated region body
PF: predicated region fallthrough
CT: control target
= control target key end

     0   :  { %v1279_v1 = vmov 0   ;;  %v21_v11 = vlaneseq  ;;  %v1280_v12 = vmov 1983009808   ;;  %vm335_vm5 = vcmask 523264   ;;  %s1825_s2 = inlined_call_operand.vmem [shape: bf16[1,128,256], index: 2, kind: input, shape index: {}]   ;;  %s1826_s3 = inlined_call_operand.vmem [shape: bf16[1,64,256], index: 3, kind: input, shape index: {}]   ;;  %s1827_s0 = inlined_call_operand.vmem [shape: f32[8,2,128], index: 0, kind: input, shape index: {}]   ;;  %s1828_s1 = inlined_call_operand.vmem [shape: f32[8,2,1], index: 1, kind: input, shape index: {}]   ;;  %s1829_s4 = inlined_call_operand.vmem [shape: f32[1,1,256], index: 4, kind: input, shape index: {}]   ;;  %s1830_s5 = inlined_call_operand.vmem [shape: f32[1,8,2,64], index: 5, kind: output, shape index: {}]  }
   0x1   :  { %v1195_v0 = vld [vmem:[%s1825_s2 + $0x74] ss:$8 sps:$4 sm:$0xff]   ;;  %260 = vmatprep.mubr.bf16.mxu0 %v1279_v1  ;;  %371 = vmatprep.mubr.bf16.mxu1 %v1279_v1  ;;  %v1197_v2 = vld [vmem:[%s1825_s2 + $0x70] ss:$8 sps:$4 sm:$0xff]   ;;  %v1198_v3 = vld [vmem:[%s1825_s2 + $0x64] ss:$8 sps:$4 sm:$0xff]   ;;  %v86_v13 = vunpack.c.l.s4 %v1280_v12 }
   0x2   :  { %1194 = vset.pattern.permute.xlu1 %v1279_v1  ;;  %1193 = vset.pattern.permute.xlu0 %v1279_v1  ;;  %v1200_v4 = vld [vmem:[%s1825_s2 + $0x60] ss:$8 sps:$4 sm:$0xff]   ;;  %v1201_v5 = vld [vmem:[%s1825_s2 + $0x54] ss:$8 sps:$4 sm:$0xff]   ;;  %v1203_v6 = vld [vmem:[%s1825_s2 + $0x50] ss:$8 sps:$4 sm:$0xff]  }
   0x3   :  { %228 = vmatprep.subr.bf16.mxu0 %v1195_v0  ;;  %v1338_v7 = vld [vmem:[%s1826_s3 + $0x34] ss:$8 sps:$4 sm:$0xff]   ;;  %v1204_v8 = vld [vmem:[%s1825_s2 + $0x44] ss:$8 sps:$4 sm:$0xff]   ;;  %v1346_v9 = vld [vmem:[%s1826_s3 + $0x30] ss:$8 sps:$4 sm:$0xff]   ;;  %v87_v21 = vunpack.c.0.s8 %v86_v13 }
   0x4   :  { %229 = vmatpush1.bf16.msra.mxu0 %v1197_v2  ;;  %347 = vmatprep.subr.bf16.mxu1 %v1338_v7  ;;  %v1353_v10 = vld [vmem:[%s1826_s3 + $0x24] ss:$8 sps:$4 sm:$0xff]   ;;  %v1206_v14 = vld [vmem:[%s1825_s2 + $0x40] ss:$8 sps:$4 sm:$0xff]   ;;  %v1207_v15 = vld [vmem:[%s1825_s2 + $0x34] ss:$8 sps:$4 sm:$0xff]  }
   0x5   :  { %230 = vmatprep.subr.bf16.mxu0 %v1198_v3  ;;  %348 = vmatpush1.bf16.msra.mxu1 %v1346_v9  ;;  %v1364_v16 = vld [vmem:[%s1826_s3 + $0x20] ss:$8 sps:$4 sm:$0xff]   ;;  %v1370_v17 = vld [vmem:[%s1826_s3 + $0x14] ss:$8 sps:$4 sm:$0xff]   ;;  %v1209_v18 = vld [vmem:[%s1825_s2 + $0x30] ss:$8 sps:$4 sm:$0xff]  }
   0x6   :  { %349 = vmatprep.subr.bf16.mxu1 %v1353_v10  ;;  %v1212_v19 = vld [vmem:[%s1825_s2 + $0x24] ss:$8 sps:$4 sm:$0xff]   ;;  %v1382_v20 = vld [vmem:[%s1826_s3 + $0x10] ss:$8 sps:$4 sm:$0xff]   ;;  %v1385_v22 = vshrl.u32 %v21_v11, 7  ;;  %v1471_v57 = vand.u32 127, %v21_v11 }
   0x7   :  { %v1391_v23 = vld [vmem:[%s1826_s3 + $0x4] ss:$8 sps:$4 sm:$0xff]   ;;  %v67_v24 = vld [vmem:[%s1827_s0] sm:$0x3]  ;;  %v68_v25 = vld [vmem:[%s1827_s0 + $0x2] sm:$0x3] }
   0x8   :  { %231 = vmatpush1.bf16.msra.mxu0 %v1200_v4  ;;  %v69_v26 = vld [vmem:[%s1827_s0 + $0x4] sm:$0x3]  ;;  %v70_v27 = vld [vmem:[%s1827_s0 + $0x6] sm:$0x3]  ;;  %v71_v28 = vld [vmem:[%s1827_s0 + $0x8] sm:$0x3]  ;;  %v83_v32 = vcombine.low %v67_v24, %v68_v25  ;;  %v90_v34 = vsub.s32 %v87_v21, %v1385_v22 }
   0x9   :  { %232 = vmatprep.subr.bf16.mxu0 %v1201_v5  ;;  %350 = vmatpush1.bf16.msra.mxu1 %v1364_v16  ;;  %v72_v29 = vld [vmem:[%s1827_s0 + $0xa] sm:$0x3]  ;;  %v73_v30 = vld [vmem:[%s1827_s0 + $0xc] sm:$0x3]  ;;  %v74_v31 = vld [vmem:[%s1827_s0 + $0xe] sm:$0x3]  ;;  %v84_v33 = vcombine.low %v69_v26, %v70_v27 }
   0xa   :  { %351 = vmatprep.subr.bf16.mxu1 %v1370_v17  ;;  %v100_v35 = vcombine.low %v71_v28, %v72_v29  ;;  %v1422_v36 = vld [vmem:[%s1826_s3] ss:$8 sps:$4 sm:$0xff]   ;;  %v101_v38 = vcombine.low %v73_v30, %v74_v31  ;;  %v1218_v39 = vld [vmem:[%s1825_s2 + $0x14] ss:$8 sps:$4 sm:$0xff]   ;;  %v91_v40 = vrot.slane %v83_v32, %v90_v34  ;;  %v1221_v44 = vld [vmem:[%s1825_s2 + $0x10] ss:$8 sps:$4 sm:$0xff]  }
   0xb   :  { %v1215_v37 = vld [vmem:[%s1825_s2 + $0x20] ss:$8 sps:$4 sm:$0xff]   ;;  %v98_v41 = vrot.slane %v84_v33, %v90_v34  ;;  %v1224_v45 = vld [vmem:[%s1825_s2 + $0x4] ss:$8 sps:$4 sm:$0xff]   ;;  %v140_v52 = vsub.s32 0, %v1385_v22  ;;  %v144_v56 = vsub.s32 1, %v1385_v22 }
   0xc   :  { %233 = vmatpush1.bf16.msra.mxu0 %v1203_v6  ;;  %v108_v42 = vrot.slane %v100_v35, %v90_v34  ;;  %v115_v43 = vrot.slane %v101_v38, %v90_v34  ;;  %v1227_v48 = vld [vmem:[%s1825_s2] ss:$8 sps:$4 sm:$0xff]   ;;  %v286_v50 = vld [vmem:[%s1828_s1 + $0xe] sm:$0x3]  ;;  %v23_v62 = vadd.s32 128, %v1471_v57  ;;  %v28_v63 = vand.u32 63, %v1471_v57 }
   0xd   :  { %234 = vmatprep.subr.bf16.mxu0 %v1204_v8  ;;  %352 = vmatpush1.bf16.msra.mxu1 %v1382_v20  ;;  %v99_v46 = vcombine.low %v91_v40, %v98_v41  ;;  %v136_v54 = vld [vmem:[%s1829_s4] sm:$0x3]  ;;  %v1281_v28 = vmov 0.5   ;;  %s1282_s4 = smov 64   ;;  %vm64_vm3 = vcmp.lt.s32.totalorder %v1471_v57, 32  ;;  %vm424_vm12 = vcmask 254976  }
   0xe   :  { %353 = vmatprep.subr.bf16.mxu1 %v1391_v23  ;;  %v116_v47 = vcombine.low %v108_v42, %v115_v43  ;;  %404 = vperm.xlu1 %1194, %v286_v50   ;;  %v141_v58 = vrot.slane %v136_v54, %v140_v52  ;;  %v145_v61 = vrot.slane %v136_v54, %v144_v56  ;;  %v35_v5 = vand.u32 63, %v23_v62 }
   0xf   :  { %vm48_vm0 = vcmp.lt.s32.totalorder %v28_v63, 32  ;;  %vm57_vm1 = vcmp.lt.s32.totalorder %v23_v62, 192  ;;  %v280_v63 = vld [vmem:[%s1828_s1 + $0x2] sm:$0x3]  ;;  %vm432_vm13 = vcmask 517376  }
  0x10   :  { %235 = vmatpush1.bf16.msra.mxu0 %v1206_v14  ;;  %v119_v49 = vpack.c.bf16 %v116_v47, %v99_v46  ;;  %vm1477_vm2 = vcmp.lt.s32.totalorder %v35_v5, 32  ;;  %v1488_v29 = vsel %vm57_vm1, 1.0, %v1281_v28  ;;  %v1510_v43 = vsel %vm57_vm1, 0.0, %v1281_v28 }
  0x11   :  { %236 = vmatprep.subr.bf16.mxu0 %v1207_v15  ;;  %354 = vmatpush1.bf16.msra.mxu1 %v1422_v36 }
  0x12   :  { %458 = vmatprep.subr.bf16.mxu1 %v1338_v7 }
  0x14   :  { %237 = vmatpush1.bf16.msra.mxu0 %v1209_v18  ;;  %372 = vmatmul.mubr.bf16.vlgmr.msra.gmra.mxu1 %v1279_v1 }
  0x15   :  { %238 = vmatprep.subr.bf16.mxu0 %v1212_v19  ;;  %459 = vmatpush1.bf16.msra.mxu1 %v1346_v9 }
  0x16   :  { %482 = vmatprep.mubr.bf16.mxu1 %v1279_v1  ;;  %460 = vmatprep.subr.bf16.mxu1 %v1353_v10 }
  0x18   :  { %239 = vmatpush1.bf16.msra.mxu0 %v1215_v37 }
  0x19   :  { %240 = vmatprep.subr.bf16.mxu0 %v1218_v39  ;;  %461 = vmatpush1.bf16.msra.mxu1 %v1364_v16 }
  0x1a   :  { %462 = vmatprep.subr.bf16.mxu1 %v1370_v17 }
  0x1c   :  { %241 = vmatpush1.bf16.msra.mxu0 %v1221_v44 }
  0x1d   :  { %242 = vmatprep.subr.bf16.mxu0 %v1224_v45  ;;  %463 = vmatpush1.bf16.msra.mxu1 %v1382_v20 }
  0x1e   :  { %464 = vmatprep.subr.bf16.mxu1 %v1391_v23 }
  0x20   :  { %243 = vmatpush1.bf16.msra.mxu0 %v1227_v48  ;;  %v279_v48 = vld [vmem:[%s1828_s1] sm:$0x3] }
  0x21   :  { %566 = vmatprep.subr.bf16.mxu0 %v1338_v7  ;;  %465 = vmatpush1.bf16.msra.mxu1 %v1422_v36 }
  0x22   :  { %672 = vmatprep.subr.bf16.mxu1 %v1338_v7 }
  0x23   :  { %261 = vmatmul.mubr.bf16.vlgmr.msra.gmra.mxu0 %v119_v49 }
  0x24   :  { %567 = vmatpush1.bf16.msra.mxu0 %v1346_v9  ;;  %590 = vmatprep.mubr.bf16.mxu0 %v1279_v1 }
  0x25   :  { %568 = vmatprep.subr.bf16.mxu0 %v1353_v10 }
  0x28   :  { %569 = vmatpush1.bf16.msra.mxu0 %v1364_v16 }
  0x29   :  { %570 = vmatprep.subr.bf16.mxu0 %v1370_v17 }
  0x2c   :  { %571 = vmatpush1.bf16.msra.mxu0 %v1382_v20 }
  0x2d   :  { %572 = vmatprep.subr.bf16.mxu0 %v1391_v23 }
  0x30   :  { %573 = vmatpush1.bf16.msra.mxu0 %v1422_v36 }
  0x31   :  { %782 = vmatprep.subr.bf16.mxu0 %v1338_v7 }
  0x89   :  { %v1524_v54 = vpop.permute.xlu1 %404 }
  0xd4   :  { %v373_v51 = vpop.f32.mrf.mxu1 }
  0xd6   :  { %v375_v53 = vpop.f32.mrf.mxu1 }
  0xd8   :  { %v377_v55 = vpop.f32.mrf.mxu1 }
  0xda   :  { %v378_v59 = vpop.f32.mrf.mxu1 }
  0xe3   :  { %v262_v60 = vpop.f32.mrf.mxu0 }
  0xe4   :  { %v263_v0 = vadd.f32 %v262_v60, %v141_v58 }
  0xe5   :  { %v264_v2 = vpop.f32.mrf.mxu0 }
  0xe6   :  { %v265_v3 = vadd.f32 %v264_v2, %v145_v61  ;;  %v765_v8 = vrot.slane %v263_v0, 6  ;;  %v861_v11 = vrot.slane %v263_v0, 2 }
  0xe7   :  { %v266_v4 = vpop.f32.mrf.mxu0 }
  0xe8   :  { %v267_v6 = vadd.f32 %v266_v4, %v141_v58  ;;  %v766_v21 = vrot.slane %v265_v3, 6  ;;  %v862_v34 = vrot.slane %v265_v3, 2 }
  0xe9   :  { %v268_v12 = vpop.f32.mrf.mxu0 }
  0xea   :  { %v289_v13 = vrot.slane %v267_v6, 6  ;;  %v269_v14 = vadd.f32 %v268_v12, %v145_v61  ;;  %v435_v15 = vrot.slane %v267_v6, 2  ;;  %v1475_v18 = vsel %vm48_vm0, %v267_v6, %v765_v8 }
  0xeb   :  { %v1481_v22 = vsel %vm48_vm0, %v267_v6, %v861_v11 }
  0xec   :  { %v290_v24 = vrot.slane %v269_v14, 6  ;;  %v1483_v25 = vsel %vm48_vm0, %v263_v0, %v289_v13  ;;  %v1485_v26 = vsel %vm48_vm0, %v263_v0, %v435_v15  ;;  %v436_v27 = vrot.slane %v269_v14, 2 }
  0xed   :  { %v374_v30 = vadd.f32 %v373_v51, %v1483_v25  ;;  %v1501_v33 = vsel %vm1477_vm2, %v269_v14, %v766_v21  ;;  %v1506_v38 = vsel %vm1477_vm2, %v269_v14, %v862_v34  ;;  %v443_v0 = vrot.slane %v1485_v26, 2 }
  0xee   :  { %v1493_v31 = vsel %vm1477_vm2, %v265_v3, %v290_v24  ;;  %v1497_v32 = vsel %vm1477_vm2, %v265_v3, %v436_v27 }
  0xef   :  { %v376_v35 = vadd.f32 %v375_v53, %v1493_v31  ;;  %v380_v37 = vmul.f32 0.5, %v374_v30  ;;  %v444_v4 = vrot.slane %v1497_v32, 2  ;;  %v285_v30 = vld [vmem:[%s1828_s1 + $0xc] sm:$0x3] }
  0xf1   :  { %v381_v39 = vmul.f32 %v376_v35, %v1488_v29  ;;  %1231 = vtanh.f32 %v380_v37 }
  0xf3   :  { %1233 = vtanh.f32 %v381_v39 }
  0xfe   :  { %v1232_v40 = vpop.eup %1231 }
  0xff   :  { %v384_v41 = vmul.f32 0.5, %v1232_v40 }
 0x100   :  { %v1234_v42 = vpop.eup %1233 }
 0x101   :  { %v385_v44 = vmul.f32 %v1234_v42, %v1488_v29  ;;  %v386_v45 = vadd.f32 0.5, %v384_v41 }
 0x103   :  { %v387_v46 = vadd.f32 %v385_v44, %v1510_v43  ;;  %v388_v49 = vmul.f32 0.0, %v386_v45 }
 0x105   :  { %v389_v47 = vmul.f32 %v387_v46, %v386_v45 }
 0x107   :  { %391 = vrot.lane.b32.xlu0 %v389_v47, %s1282_s4 }
 0x10b   :  { %399 = vperm.xlu0 %1193, %v279_v48   ;;  %v281_v48 = vld [vmem:[%s1828_s1 + $0x4] sm:$0x3] }
 0x179   :  { %v392_v50 = vpop.permute.xlu0 %391 }
 0x17a   :  { %v394_v51 = vadd.f32 %v392_v50, %v388_v49 }
 0x17c   :  { %1235 = vtanh.f32 %v394_v51 }
 0x186   :  { %v1526_v55 = vpop.permute.xlu0 %399 }
 0x187   :  { %v407_v56 = vsel %vm64_vm3, %v1526_v55, %v1524_v54 }
 0x188   :  { %vm408_vm4 = vcmp.gt.f32.partialorder %v407_v56, 0.5 }
 0x189   :  { %v1236_v52 = vpop.eup %1235 }
 0x18a   :  { %v1518_v53 = vmul.f32 %v1236_v52, %v387_v46  ;;  %v551_v52 = vrot.slane %v1483_v25, 4 }
 0x18c   :  { %410 = vrot.lane.b32.xlu1 %v1518_v53, %s1282_s4 }
 0x190   :  { %415 = vrot.lane.b32.xlu1 %v394_v51, %s1282_s4 }
 0x1fe   :  { %v411_v58 = vpop.permute.xlu1 %410 }
 0x1ff   :  { %v413_v59 = vsel %vm408_vm4, %v411_v58, 0.0 }
 0x200   :  { %v434_v60 = vpack.c.bf16 %v413_v59, %v413_v59 }
 0x202   :  { %1169 = vmatmul.mubr.msk.bf16.vlgmr.msra.gmra.mxu1 %vm335_vm5, %v434_v60  ;;  %v416_v61 = vpop.permute.xlu1 %415 }
 0x203   :  { %v418_v62 = vsel %vm408_vm4, %v416_v61, 0.0  ;;  %673 = vmatpush1.bf16.msra.mxu1 %v1346_v9  ;;  %696 = vmatprep.mubr.bf16.mxu1 %v1279_v1 }
 0x204   :  { %500 = vrot.lane.b32.xlu0 %v418_v62, %s1282_s4  ;;  %674 = vmatprep.subr.bf16.mxu1 %v1353_v10 }
 0x207   :  { %675 = vmatpush1.bf16.msra.mxu1 %v1364_v16 }
 0x208   :  { %514 = vperm.xlu0 %1193, %v280_v63   ;;  %676 = vmatprep.subr.bf16.mxu1 %v1370_v17 }
 0x20b   :  { %677 = vmatpush1.bf16.msra.mxu1 %v1382_v20 }
 0x20c   :  { %678 = vmatprep.subr.bf16.mxu1 %v1391_v23 }
 0x20f   :  { %679 = vmatpush1.bf16.msra.mxu1 %v1422_v36 }
 0x210   :  { %884 = vmatprep.subr.bf16.mxu1 %v1338_v7 }
 0x276   :  { %v501_v34 = vpop.permute.xlu0 %500 }
 0x283   :  { %v1562_v44 = vpop.permute.xlu0 %514 }
 0x2c2   :  { %v484_v2 = vpop.f32.mrf.mxu1 }
 0x2c3   :  { %v485_v3 = vadd.f32 %v484_v2, %v443_v0 }
 0x2c4   :  { %v486_v5 = vpop.f32.mrf.mxu1 }
 0x2c5   :  { %v491_v6 = vmul.f32 0.5, %v485_v3  ;;  %v487_v8 = vadd.f32 %v486_v5, %v444_v4 }
 0x2c6   :  { %v488_v12 = vpop.f32.mrf.mxu1 }
 0x2c7   :  { %1237 = vtanh.f32 %v491_v6  ;;  %v492_v11 = vmul.f32 %v487_v8, %v1488_v29 }
 0x2c8   :  { %v489_v13 = vpop.f32.mrf.mxu1 }
 0x2c9   :  { %1239 = vtanh.f32 %v492_v11 }
 0x2d4   :  { %v1238_v14 = vpop.eup %1237 }
 0x2d5   :  { %v495_v15 = vmul.f32 0.5, %v1238_v14 }
 0x2d6   :  { %v1240_v19 = vpop.eup %1239 }
 0x2d7   :  { %v496_v21 = vmul.f32 %v1240_v19, %v1488_v29  ;;  %v497_v24 = vadd.f32 0.5, %v495_v15 }
 0x2d9   :  { %v498_v27 = vadd.f32 %v496_v21, %v1510_v43  ;;  %v503_v35 = vmul.f32 %v501_v34, %v497_v24 }
 0x2db   :  { %v504_v28 = vmul.f32 %v498_v27, %v497_v24 }
 0x2dd   :  { %506 = vrot.lane.b32.xlu1 %v504_v28, %s1282_s4 }
 0x2e1   :  { %519 = vperm.xlu1 %1194, %v285_v30  }
 0x34f   :  { %v507_v37 = vpop.permute.xlu1 %506 }
 0x350   :  { %v509_v39 = vadd.f32 %v507_v37, %v503_v35  ;;  %v282_v35 = vld [vmem:[%s1828_s1 + $0x6] sm:$0x3] }
 0x352   :  { %1241 = vtanh.f32 %v509_v39  ;;  %530 = vrot.lane.b32.xlu1 %v509_v39, %s1282_s4 }
 0x35c   :  { %v1560_v42 = vpop.permute.xlu1 %519 }
 0x35d   :  { %v522_v45 = vsel %vm64_vm3, %v1562_v44, %v1560_v42 }
 0x35e   :  { %vm523_vm6 = vcmp.gt.f32.partialorder %v522_v45, 0.5  ;;  %v657_v45 = vrot.slane %v1485_v26, 6 }
 0x35f   :  { %v1242_v40 = vpop.eup %1241 }
 0x360   :  { %v1556_v41 = vmul.f32 %v1242_v40, %v498_v27 }
 0x362   :  { %525 = vrot.lane.b32.xlu0 %v1556_v41, %s1282_s4 }
 0x3c4   :  { %v531_v46 = vpop.permute.xlu1 %530 }
 0x3c5   :  { %v533_v47 = vsel %vm523_vm6, %v531_v46, %v418_v62 }
 0x3c6   :  { %608 = vrot.lane.b32.xlu0 %v533_v47, %s1282_s4 }
 0x3ca   :  { %622 = vperm.xlu0 %1193, %v281_v48   ;;  %v658_v48 = vrot.slane %v1497_v32, 6  ;;  %v283_v32 = vld [vmem:[%s1828_s1 + $0x8] sm:$0x3] }
 0x3d4   :  { %v526_v49 = vpop.permute.xlu0 %525 }
 0x3d5   :  { %v528_v50 = vsel %vm523_vm6, %v526_v49, %v413_v59  ;;  %v552_v59 = vrot.slane %v1493_v31, 4  ;;  %v284_v31 = vld [vmem:[%s1828_s1 + $0xa] sm:$0x3] }
 0x3d6   :  { %v548_v51 = vpack.c.bf16 %v528_v50, %v528_v50 }
 0x3d8   :  { %1172 = vmatmul.mubr.msk.bf16.vlgmr.msra.gmra.mxu0 %vm335_vm5, %v548_v51 }
 0x3d9   :  { %783 = vmatpush1.bf16.msra.mxu0 %v1346_v9  ;;  %806 = vmatprep.mubr.bf16.mxu0 %v1279_v1 }
 0x3da   :  { %784 = vmatprep.subr.bf16.mxu0 %v1353_v10 }
 0x3dd   :  { %785 = vmatpush1.bf16.msra.mxu0 %v1364_v16 }
 0x3de   :  { %786 = vmatprep.subr.bf16.mxu0 %v1370_v17 }
 0x3e1   :  { %787 = vmatpush1.bf16.msra.mxu0 %v1382_v20 }
 0x3e2   :  { %788 = vmatprep.subr.bf16.mxu0 %v1391_v23 }
 0x3e5   :  { %789 = vmatpush1.bf16.msra.mxu0 %v1422_v36 }
 0x3e6   :  { %980 = vmatprep.subr.bf16.mxu0 %v1338_v7 }
 0x438   :  { %v609_v11 = vpop.permute.xlu0 %608 }
 0x445   :  { %v1598_v27 = vpop.permute.xlu0 %622 }
 0x498   :  { %v592_v56 = vpop.f32.mrf.mxu0 }
 0x499   :  { %v593_v58 = vadd.f32 %v592_v56, %v551_v52 }
 0x49a   :  { %v594_v60 = vpop.f32.mrf.mxu0 }
 0x49b   :  { %v599_v61 = vmul.f32 0.5, %v593_v58  ;;  %v595_v62 = vadd.f32 %v594_v60, %v552_v59 }
 0x49c   :  { %v596_v63 = vpop.f32.mrf.mxu0 }
 0x49d   :  { %1243 = vtanh.f32 %v599_v61  ;;  %v600_v0 = vmul.f32 %v595_v62, %v1488_v29 }
 0x49e   :  { %v597_v2 = vpop.f32.mrf.mxu0 }
 0x49f   :  { %1245 = vtanh.f32 %v600_v0 }
 0x4aa   :  { %v1244_v3 = vpop.eup %1243 }
 0x4ab   :  { %v603_v4 = vmul.f32 0.5, %v1244_v3 }
 0x4ac   :  { %v1246_v5 = vpop.eup %1245 }
 0x4ad   :  { %v604_v6 = vmul.f32 %v1246_v5, %v1488_v29  ;;  %v605_v8 = vadd.f32 0.5, %v603_v4 }
 0x4af   :  { %v606_v25 = vadd.f32 %v604_v6, %v1510_v43  ;;  %v611_v13 = vmul.f32 %v609_v11, %v605_v8 }
 0x4b1   :  { %v612_v12 = vmul.f32 %v606_v25, %v605_v8 }
 0x4b3   :  { %614 = vrot.lane.b32.xlu1 %v612_v12, %s1282_s4 }
 0x4b7   :  { %627 = vperm.xlu1 %1194, %v284_v31  }
 0x525   :  { %v615_v14 = vpop.permute.xlu1 %614 }
 0x526   :  { %v617_v15 = vadd.f32 %v615_v14, %v611_v13 }
 0x528   :  { %1247 = vtanh.f32 %v617_v15  ;;  %638 = vrot.lane.b32.xlu1 %v617_v15, %s1282_s4 }
 0x532   :  { %v1596_v24 = vpop.permute.xlu1 %627 }
 0x533   :  { %v630_v28 = vsel %vm64_vm3, %v1598_v27, %v1596_v24 }
 0x534   :  { %vm631_vm7 = vcmp.gt.f32.partialorder %v630_v28, 0.5 }
 0x535   :  { %v1248_v19 = vpop.eup %1247 }
 0x536   :  { %v1592_v21 = vmul.f32 %v1248_v19, %v606_v25 }
 0x538   :  { %633 = vrot.lane.b32.xlu0 %v1592_v21, %s1282_s4 }
 0x59a   :  { %v639_v30 = vpop.permute.xlu1 %638 }
 0x59b   :  { %v641_v34 = vsel %vm631_vm7, %v639_v30, %v533_v47 }
 0x59c   :  { %714 = vrot.lane.b32.xlu0 %v641_v34, %s1282_s4 }
 0x5a0   :  { %728 = vperm.xlu0 %1193, %v282_v35  }
 0x5aa   :  { %v634_v37 = vpop.permute.xlu0 %633 }
 0x5ab   :  { %v636_v39 = vsel %vm631_vm7, %v634_v37, %v528_v50 }
 0x5ac   :  { %v656_v40 = vpack.c.bf16 %v636_v39, %v636_v39 }
 0x5ae   :  { %1175 = vmatmul.mubr.msk.bf16.vlgmr.msra.gmra.mxu1 %vm335_vm5, %v656_v40 }
 0x5af   :  { %885 = vmatpush1.bf16.msra.mxu1 %v1346_v9  ;;  %908 = vmatprep.mubr.bf16.mxu1 %v1279_v1 }
 0x5b0   :  { %886 = vmatprep.subr.bf16.mxu1 %v1353_v10 }
 0x5b3   :  { %887 = vmatpush1.bf16.msra.mxu1 %v1364_v16 }
 0x5b4   :  { %888 = vmatprep.subr.bf16.mxu1 %v1370_v17 }
 0x5b7   :  { %889 = vmatpush1.bf16.msra.mxu1 %v1382_v20 }
 0x5b8   :  { %890 = vmatprep.subr.bf16.mxu1 %v1391_v23 }
 0x5bb   :  { %891 = vmatpush1.bf16.msra.mxu1 %v1422_v36 }
 0x5bc   :  { %1074 = vmatprep.subr.bf16.mxu1 %v1338_v7 }
 0x60e   :  { %v715_v0 = vpop.permute.xlu0 %714 }
 0x61b   :  { %v1634_v25 = vpop.permute.xlu0 %728 }
 0x66e   :  { %v698_v46 = vpop.f32.mrf.mxu1 }
 0x66f   :  { %v699_v47 = vadd.f32 %v698_v46, %v657_v45 }
 0x670   :  { %v700_v49 = vpop.f32.mrf.mxu1 }
 0x671   :  { %v705_v50 = vmul.f32 0.5, %v699_v47  ;;  %v701_v51 = vadd.f32 %v700_v49, %v658_v48 }
 0x672   :  { %v702_v52 = vpop.f32.mrf.mxu1 }
 0x673   :  { %1249 = vtanh.f32 %v705_v50  ;;  %v706_v56 = vmul.f32 %v701_v51, %v1488_v29 }
 0x674   :  { %v703_v58 = vpop.f32.mrf.mxu1 }
 0x675   :  { %1251 = vtanh.f32 %v706_v56 }
 0x680   :  { %v1250_v59 = vpop.eup %1249 }
 0x681   :  { %v709_v60 = vmul.f32 0.5, %v1250_v59 }
 0x682   :  { %v1252_v61 = vpop.eup %1251 }
 0x683   :  { %v710_v7 = vmul.f32 %v1252_v61, %v1488_v29  ;;  %v711_v62 = vadd.f32 0.5, %v709_v60 }
 0x685   :  { %v712_v26 = vadd.f32 %v710_v7, %v1510_v43  ;;  %v717_v2 = vmul.f32 %v715_v0, %v711_v62 }
 0x687   :  { %v718_v63 = vmul.f32 %v712_v26, %v711_v62 }
 0x689   :  { %720 = vrot.lane.b32.xlu1 %v718_v63, %s1282_s4 }
 0x68d   :  { %733 = vperm.xlu1 %1194, %v283_v32  }
 0x6fb   :  { %v721_v3 = vpop.permute.xlu1 %720 }
 0x6fc   :  { %v723_v4 = vadd.f32 %v721_v3, %v717_v2  ;;  %v869_v2 = vrot.slane %v1481_v22, 2 }
 0x6fe   :  { %1253 = vtanh.f32 %v723_v4  ;;  %744 = vrot.lane.b32.xlu1 %v723_v4, %s1282_s4 }
 0x708   :  { %v1632_v8 = vpop.permute.xlu1 %733 }
 0x709   :  { %v736_v12 = vsel %vm64_vm3, %v1634_v25, %v1632_v8  ;;  %v836_v7 = vsel %vm64_vm3, %v1632_v8, %v1634_v25 }
 0x70a   :  { %vm737_vm8 = vcmp.gt.f32.partialorder %v736_v12, 0.5  ;;  %vm837_vm9 = vcmp.gt.f32.partialorder %v836_v7, 0.5 }
 0x70b   :  { %v1254_v5 = vpop.eup %1253 }
 0x70c   :  { %v1628_v6 = vmul.f32 %v1254_v5, %v712_v26 }
 0x70e   :  { %739 = vrot.lane.b32.xlu0 %v1628_v6, %s1282_s4 }
 0x770   :  { %v745_v31 = vpop.permute.xlu1 %744 }
 0x771   :  { %v747_v11 = vsel %vm737_vm8, %v745_v31, %v641_v34 }
 0x772   :  { %824 = vrot.lane.b32.xlu0 %v747_v11, %s1282_s4 }
 0x780   :  { %v740_v13 = vpop.permute.xlu0 %739 }
 0x781   :  { %v742_v14 = vsel %vm737_vm8, %v740_v13, %v636_v39 }
 0x782   :  { %v762_v15 = vpack.c.bf16 %v742_v14, %v742_v14 }
 0x784   :  { %1178 = vmatmul.mubr.msk.bf16.vlgmr.msra.gmra.mxu0 %vm335_vm5, %v762_v15 }
 0x785   :  { %981 = vmatpush1.bf16.msra.mxu0 %v1346_v9  ;;  %1004 = vmatprep.mubr.bf16.mxu0 %v1279_v1 }
 0x786   :  { %982 = vmatprep.subr.bf16.mxu0 %v1353_v10 }
 0x789   :  { %983 = vmatpush1.bf16.msra.mxu0 %v1364_v16 }
 0x78a   :  { %984 = vmatprep.subr.bf16.mxu0 %v1370_v17 }
 0x78d   :  { %985 = vmatpush1.bf16.msra.mxu0 %v1382_v20 }
 0x78e   :  { %986 = vmatprep.subr.bf16.mxu0 %v1391_v23 }
 0x791   :  { %987 = vmatpush1.bf16.msra.mxu0 %v1422_v36 }
 0x7e4   :  { %v825_v52 = vpop.permute.xlu0 %824 }
 0x844   :  { %v808_v19 = vpop.f32.mrf.mxu0 }
 0x845   :  { %v809_v28 = vadd.f32 %v808_v19, %v1475_v18 }
 0x846   :  { %v810_v30 = vpop.f32.mrf.mxu0 }
 0x847   :  { %v815_v34 = vmul.f32 0.5, %v809_v28  ;;  %v811_v35 = vadd.f32 %v810_v30, %v1501_v33 }
 0x848   :  { %v812_v37 = vpop.f32.mrf.mxu0 }
 0x849   :  { %1255 = vtanh.f32 %v815_v34  ;;  %v816_v39 = vmul.f32 %v811_v35, %v1488_v29  ;;  %v938_v37 = vsel %vm64_vm3, %v1596_v24, %v1598_v27 }
 0x84a   :  { %v813_v40 = vpop.f32.mrf.mxu0  ;;  %vm939_vm10 = vcmp.gt.f32.partialorder %v938_v37, 0.5 }
 0x84b   :  { %1257 = vtanh.f32 %v816_v39 }
 0x856   :  { %v1256_v45 = vpop.eup %1255 }
 0x857   :  { %v819_v46 = vmul.f32 0.5, %v1256_v45 }
 0x858   :  { %v1258_v47 = vpop.eup %1257 }
 0x859   :  { %v820_v48 = vmul.f32 %v1258_v47, %v1488_v29  ;;  %v821_v49 = vadd.f32 0.5, %v819_v46 }
 0x85b   :  { %v822_v50 = vadd.f32 %v820_v48, %v1510_v43  ;;  %v827_v56 = vmul.f32 %v825_v52, %v821_v49  ;;  %v965_v48 = vrot.slane %v1475_v18, 4 }
 0x85d   :  { %v828_v51 = vmul.f32 %v822_v50, %v821_v49 }
 0x85f   :  { %830 = vrot.lane.b32.xlu1 %v828_v51, %s1282_s4  ;;  %v966_v51 = vrot.slane %v1501_v33, 4 }
 0x8d1   :  { %v831_v58 = vpop.permute.xlu1 %830 }
 0x8d2   :  { %v833_v59 = vadd.f32 %v831_v58, %v827_v56 }
 0x8d4   :  { %1259 = vtanh.f32 %v833_v59  ;;  %844 = vrot.lane.b32.xlu1 %v833_v59, %s1282_s4 }
 0x8e1   :  { %v1260_v60 = vpop.eup %1259 }
 0x8e2   :  { %v1657_v61 = vmul.f32 %v1260_v60, %v822_v50 }
 0x8e4   :  { %839 = vrot.lane.b32.xlu0 %v1657_v61, %s1282_s4 }
 0x946   :  { %v845_v62 = vpop.permute.xlu1 %844 }
 0x947   :  { %v847_v26 = vsel %vm837_vm9, %v845_v62, %v747_v11 }
 0x948   :  { %926 = vrot.lane.b32.xlu0 %v847_v26, %s1282_s4 }
 0x956   :  { %v840_v63 = vpop.permute.xlu0 %839 }
 0x957   :  { %v842_v32 = vsel %vm837_vm9, %v840_v63, %v742_v14 }
 0x958   :  { %v860_v0 = vpack.c.bf16 %v842_v32, %v842_v32 }
 0x95a   :  { %1181 = vmatmul.mubr.msk.bf16.vlgmr.msra.gmra.mxu1 %vm335_vm5, %v860_v0 }
 0x95b   :  { %1075 = vmatpush1.bf16.msra.mxu1 %v1346_v9  ;;  %1098 = vmatprep.mubr.bf16.mxu1 %v1279_v1  ;;  %v870_v9 = vrot.slane %v1506_v38, 2 }
 0x95c   :  { %1076 = vmatprep.subr.bf16.mxu1 %v1353_v10 }
 0x95f   :  { %1077 = vmatpush1.bf16.msra.mxu1 %v1364_v16 }
 0x960   :  { %1078 = vmatprep.subr.bf16.mxu1 %v1370_v17 }
 0x963   :  { %1079 = vmatpush1.bf16.msra.mxu1 %v1382_v20 }
 0x964   :  { %1080 = vmatprep.subr.bf16.mxu1 %v1391_v23 }
 0x967   :  { %1081 = vmatpush1.bf16.msra.mxu1 %v1422_v36 }
 0x9ba   :  { %v927_v15 = vpop.permute.xlu0 %926 }
 0xa1a   :  { %v910_v3 = vpop.f32.mrf.mxu1 }
 0xa1b   :  { %v911_v4 = vadd.f32 %v910_v3, %v869_v2 }
 0xa1c   :  { %v912_v5 = vpop.f32.mrf.mxu1 }
 0xa1d   :  { %v917_v1 = vmul.f32 0.5, %v911_v4  ;;  %v913_v12 = vadd.f32 %v912_v5, %v870_v9 }
 0xa1e   :  { %v914_v10 = vpop.f32.mrf.mxu1 }
 0xa1f   :  { %1261 = vtanh.f32 %v917_v1  ;;  %v918_v16 = vmul.f32 %v913_v12, %v1488_v29  ;;  %v1034_v12 = vsel %vm64_vm3, %v1560_v42, %v1562_v44 }
 0xa20   :  { %v915_v17 = vpop.f32.mrf.mxu1  ;;  %vm1035_vm11 = vcmp.gt.f32.partialorder %v1034_v12, 0.5 }
 0xa21   :  { %1263 = vtanh.f32 %v918_v16  ;;  %v419_v17 = vmul.f32 %v1526_v55, %v1518_v53 }
 0xa2c   :  { %v1262_v20 = vpop.eup %1261 }
 0xa2d   :  { %v921_v31 = vmul.f32 0.5, %v1262_v20  ;;  %v534_v20 = vmul.f32 %v1562_v44, %v1556_v41 }
 0xa2e   :  { %v1264_v23 = vpop.eup %1263 }
 0xa2f   :  { %v922_v36 = vmul.f32 %v1264_v23, %v1488_v29  ;;  %v923_v11 = vadd.f32 0.5, %v921_v31  ;;  %v642_v31 = vmul.f32 %v1598_v27, %v1592_v21  ;;  %v748_v23 = vmul.f32 %v1634_v25, %v1628_v6 }
 0xa31   :  { %v924_v13 = vadd.f32 %v922_v36, %v1510_v43  ;;  %v929_v19 = vmul.f32 %v927_v15, %v923_v11 }
 0xa33   :  { %v930_v14 = vmul.f32 %v924_v13, %v923_v11 }
 0xa35   :  { %932 = vrot.lane.b32.xlu1 %v930_v14, %s1282_s4 }
 0xaa7   :  { %v933_v28 = vpop.permute.xlu1 %932 }
 0xaa8   :  { %v935_v30 = vadd.f32 %v933_v28, %v929_v19 }
 0xaaa   :  { %1265 = vtanh.f32 %v935_v30  ;;  %946 = vrot.lane.b32.xlu1 %v935_v30, %s1282_s4 }
 0xab7   :  { %v1266_v34 = vpop.eup %1265 }
 0xab8   :  { %v1682_v35 = vmul.f32 %v1266_v34, %v924_v13  ;;  %v848_v13 = vmul.f32 %v1657_v61, %v1632_v8 }
 0xaba   :  { %941 = vrot.lane.b32.xlu0 %v1682_v35, %s1282_s4  ;;  %v950_v14 = vmul.f32 %v1682_v35, %v1596_v24 }
 0xb1c   :  { %v947_v39 = vpop.permute.xlu1 %946 }
 0xb1d   :  { %v949_v40 = vsel %vm939_vm10, %v947_v39, %v847_v26  ;;  %v1059_v39 = vrot.slane %v1481_v22, 6 }
 0xb1e   :  { %1022 = vrot.lane.b32.xlu0 %v949_v40, %s1282_s4 }
 0xb2c   :  { %v942_v45 = vpop.permute.xlu0 %941 }
 0xb2d   :  { %v944_v46 = vsel %vm939_vm10, %v942_v45, %v842_v32 }
 0xb2e   :  { %v962_v47 = vpack.c.bf16 %v944_v46, %v944_v46 }
 0xb30   :  { %1184 = vmatmul.mubr.msk.bf16.vlgmr.msra.gmra.mxu0 %vm335_vm5, %v962_v47 }
 0xb90   :  { %v1023_v33 = vpop.permute.xlu0 %1022 }
 0xbf0   :  { %v1006_v49 = vpop.f32.mrf.mxu0 }
 0xbf1   :  { %v1007_v50 = vadd.f32 %v1006_v49, %v965_v48 }
 0xbf2   :  { %v1008_v52 = vpop.f32.mrf.mxu0 }
 0xbf3   :  { %v1013_v56 = vmul.f32 0.5, %v1007_v50  ;;  %v1009_v58 = vadd.f32 %v1008_v52, %v966_v51 }
 0xbf4   :  { %v1010_v59 = vpop.f32.mrf.mxu0 }
 0xbf5   :  { %1267 = vtanh.f32 %v1013_v56  ;;  %v1014_v60 = vmul.f32 %v1009_v58, %v1488_v29 }
 0xbf6   :  { %v1011_v7 = vpop.f32.mrf.mxu0 }
 0xbf7   :  { %1269 = vtanh.f32 %v1014_v60 }
 0xc02   :  { %v1268_v62 = vpop.eup %1267 }
 0xc03   :  { %v1017_v26 = vmul.f32 0.5, %v1268_v62 }
 0xc04   :  { %v1270_v63 = vpop.eup %1269 }
 0xc05   :  { %v1018_v32 = vmul.f32 %v1270_v63, %v1488_v29  ;;  %v1019_v0 = vadd.f32 0.5, %v1017_v26  ;;  %v541_v26 = vmul.f32 %v1560_v42, %v1556_v41  ;;  %v649_v63 = vmul.f32 %v1596_v24, %v1592_v21 }
 0xc07   :  { %v1020_v18 = vadd.f32 %v1018_v32, %v1510_v43  ;;  %v1025_v3 = vmul.f32 %v1023_v33, %v1019_v0 }
 0xc09   :  { %v1026_v2 = vmul.f32 %v1020_v18, %v1019_v0 }
 0xc0b   :  { %1028 = vrot.lane.b32.xlu1 %v1026_v2, %s1282_s4 }
 0xc7d   :  { %v1029_v4 = vpop.permute.xlu1 %1028 }
 0xc7e   :  { %v1031_v9 = vadd.f32 %v1029_v4, %v1025_v3 }
 0xc80   :  { %1271 = vtanh.f32 %v1031_v9  ;;  %1042 = vrot.lane.b32.xlu1 %v1031_v9, %s1282_s4 }
 0xc8d   :  { %v1272_v5 = vpop.eup %1271 }
 0xc8e   :  { %v1699_v1 = vmul.f32 %v1272_v5, %v1020_v18 }
 0xc90   :  { %1037 = vrot.lane.b32.xlu0 %v1699_v1, %s1282_s4  ;;  %v1046_v15 = vmul.f32 %v1699_v1, %v1560_v42  ;;  %v1052_v41 = vmul.f32 %v1699_v1, %v1562_v44 }
 0xcf2   :  { %v1043_v10 = vpop.permute.xlu1 %1042 }
 0xcf3   :  { %v1045_v16 = vsel %vm1035_vm11, %v1043_v10, %v949_v40 }
 0xcf4   :  { %1116 = vrot.lane.b32.xlu0 %v1045_v16, %s1282_s4 }
 0xcf8   :  { %421 = vrot.lane.b32.xlu0 %v419_v17, %s1282_s4 }
 0xcfc   :  { %536 = vrot.lane.b32.xlu0 %v534_v20, %s1282_s4 }
 0xd00   :  { %644 = vrot.lane.b32.xlu0 %v642_v31, %s1282_s4 }
 0xd02   :  { %v1038_v57 = vpop.permute.xlu0 %1037 }
 0xd03   :  { %v1040_v36 = vsel %vm1035_vm11, %v1038_v57, %v944_v46  ;;  %v1060_v46 = vrot.slane %v1506_v38, 6  ;;  %v426_v38 = vmul.f32 %v1524_v54, %v1518_v53  ;;  %v956_v53 = vmul.f32 %v1682_v35, %v1598_v27 }
 0xd04   :  { %v1058_v11 = vpack.c.bf16 %v1040_v36, %v1040_v36  ;;  %750 = vrot.lane.b32.xlu0 %v748_v23, %s1282_s4 }
 0xd06   :  { %1187 = vmatmul.mubr.msk.bf16.vlgmr.msra.gmra.mxu1 %vm335_vm5, %v1058_v11 }
 0xd08   :  { %850 = vrot.lane.b32.xlu0 %v848_v13, %s1282_s4 }
 0xd0c   :  { %952 = vrot.lane.b32.xlu0 %v950_v14, %s1282_s4 }
 0xd10   :  { %1048 = vrot.lane.b32.xlu0 %v1046_v15, %s1282_s4 }
 0xd66   :  { %v1117_v19 = vpop.permute.xlu0 %1116 }
 0xd6a   :  { %v422_v28 = vpop.permute.xlu0 %421 }
 0xd6b   :  { %425 = vst.msk [vmem:[%s1830_s5] sm:$0x3] %vm424_vm12, %v422_v28 }
 0xd6e   :  { %v537_v30 = vpop.permute.xlu0 %536 }
 0xd6f   :  { %1170 = vst.msk [vmem:[%s1830_s5 + $0x2] sm:$0x3] %vm424_vm12, %v537_v30 }
 0xd72   :  { %v645_v34 = vpop.permute.xlu0 %644 }
 0xd73   :  { %1173 = vst.msk [vmem:[%s1830_s5 + $0x4] sm:$0x3] %vm424_vm12, %v645_v34 }
 0xd76   :  { %v751_v37 = vpop.permute.xlu0 %750 }
 0xd77   :  { %1176 = vst.msk [vmem:[%s1830_s5 + $0x6] sm:$0x3] %vm424_vm12, %v751_v37 }
 0xd7a   :  { %v851_v42 = vpop.permute.xlu0 %850 }
 0xdc6   :  { %v1100_v40 = vpop.f32.mrf.mxu1 }
 0xdc7   :  { %v1101_v45 = vadd.f32 %v1100_v40, %v1059_v39 }
 0xdc8   :  { %v1102_v47 = vpop.f32.mrf.mxu1 }
 0xdc9   :  { %v1107_v48 = vmul.f32 0.5, %v1101_v45  ;;  %v1103_v49 = vadd.f32 %v1102_v47, %v1060_v46 }
 0xdca   :  { %v1104_v50 = vpop.f32.mrf.mxu1 }
 0xdcb   :  { %1273 = vtanh.f32 %v1107_v48  ;;  %v1108_v51 = vmul.f32 %v1103_v49, %v1488_v29 }
 0xdcc   :  { %v1105_v52 = vpop.f32.mrf.mxu1 }
 0xdcd   :  { %1275 = vtanh.f32 %v1108_v51 }
 0xdd8   :  { %v1274_v56 = vpop.eup %1273 }
 0xdd9   :  { %v1111_v58 = vmul.f32 0.5, %v1274_v56 }
 0xdda   :  { %v1276_v59 = vpop.eup %1275 }
 0xddb   :  { %v1112_v60 = vmul.f32 %v1276_v59, %v1488_v29  ;;  %v1113_v7 = vadd.f32 0.5, %v1111_v58  ;;  %v755_v29 = vmul.f32 %v1632_v8, %v1628_v6  ;;  %v953_v8 = vpop.permute.xlu0 %952 }
 0xddd   :  { %v1114_v22 = vadd.f32 %v1112_v60, %v1510_v43  ;;  %v854_v43 = vmul.f32 %v1657_v61, %v1634_v25  ;;  %v1119_v21 = vmul.f32 %v1117_v19, %v1113_v7 }
 0xddf   :  { %v1120_v62 = vmul.f32 %v1114_v22, %v1113_v7  ;;  %v1049_v61 = vpop.permute.xlu0 %1048 }
 0xde1   :  { %1122 = vrot.lane.b32.xlu1 %v1120_v62, %s1282_s4 }
 0xde5   :  { %428 = vrot.lane.b32.xlu1 %v426_v38, %s1282_s4 }
 0xde9   :  { %543 = vrot.lane.b32.xlu1 %v541_v26, %s1282_s4 }
 0xded   :  { %651 = vrot.lane.b32.xlu1 %v649_v63, %s1282_s4 }
 0xdf1   :  { %757 = vrot.lane.b32.xlu1 %v755_v29, %s1282_s4 }
 0xdf5   :  { %856 = vrot.lane.b32.xlu1 %v854_v43, %s1282_s4 }
 0xdf9   :  { %958 = vrot.lane.b32.xlu1 %v956_v53, %s1282_s4 }
 0xdfd   :  { %1054 = vrot.lane.b32.xlu1 %v1052_v41, %s1282_s4 }
 0xe53   :  { %v1123_v24 = vpop.permute.xlu1 %1122 }
 0xe54   :  { %v1125_v6 = vadd.f32 %v1123_v24, %v1119_v21 }
 0xe56   :  { %1277 = vtanh.f32 %v1125_v6 }
 0xe57   :  { %v429_v25 = vpop.permute.xlu1 %428 }
 0xe58   :  { %1168 = vst.msk [vmem:[%s1830_s5 + $0xe] sm:$0x3] %vm432_vm13, %v429_v25 }
 0xe5b   :  { %v544_v27 = vpop.permute.xlu1 %543 }
 0xe5c   :  { %1171 = vst.msk [vmem:[%s1830_s5 + $0xc] sm:$0x3] %vm432_vm13, %v544_v27 }
 0xe5d   :  { %1185 = vst.msk [vmem:[%s1830_s5 + $0xc] sm:$0x3] %vm424_vm12, %v1049_v61 }
 0xe5f   :  { %v652_v44 = vpop.permute.xlu1 %651 }
 0xe60   :  { %1174 = vst.msk [vmem:[%s1830_s5 + $0xa] sm:$0x3] %vm432_vm13, %v652_v44 }
 0xe61   :  { %1182 = vst.msk [vmem:[%s1830_s5 + $0xa] sm:$0x3] %vm424_vm12, %v953_v8 }
 0xe63   :  { %v1278_v35 = vpop.eup %1277  ;;  %v758_v32 = vpop.permute.xlu1 %757 }
 0xe64   :  { %1177 = vst.msk [vmem:[%s1830_s5 + $0x8] sm:$0x3] %vm432_vm13, %v758_v32  ;;  %v1127_v0 = vmul.f32 %v1278_v35, %v1114_v22 }
 0xe65   :  { %1179 = vst.msk [vmem:[%s1830_s5 + $0x8] sm:$0x3] %vm424_vm12, %v851_v42 }
 0xe66   :  { %v1134_v18 = vmul.f32 %v1127_v0, %v1526_v55  ;;  %v1128_v2 = vmul.f32 %v1127_v0, %v1524_v54 }
 0xe67   :  { %v857_v33 = vpop.permute.xlu1 %856 }
 0xe68   :  { %1180 = vst.msk [vmem:[%s1830_s5 + $0x6] sm:$0x3] %vm432_vm13, %v857_v33  ;;  %1136 = vrot.lane.b32.xlu1 %v1134_v18, %s1282_s4  ;;  %1130 = vrot.lane.b32.xlu0 %v1128_v2, %s1282_s4 }
 0xe6b   :  { %v959_v3 = vpop.permute.xlu1 %958 }
 0xe6c   :  { %1183 = vst.msk [vmem:[%s1830_s5 + $0x4] sm:$0x3] %vm432_vm13, %v959_v3 }
 0xe6f   :  { %v1055_v4 = vpop.permute.xlu1 %1054 }
 0xe70   :  { %1186 = vst.msk [vmem:[%s1830_s5 + $0x2] sm:$0x3] %vm432_vm13, %v1055_v4 }
 0xeda   :  { %v1137_v54 = vpop.permute.xlu1 %1136  ;;  %v1131_v55 = vpop.permute.xlu0 %1130 }
 0xedb   :  { %1139 = vst.msk [vmem:[%s1830_s5] sm:$0x3] %vm432_vm13, %v1137_v54 }
 0xedc   :  { %1188 = vst.msk [vmem:[%s1830_s5 + $0xe] sm:$0x3] %vm424_vm12, %v1131_v55 }

// kernel: _forward_impl.2
= control target key start
LH: loop header
LB: loop body
LE: loop exit
PB: predicated region body
PF: predicated region fallthrough
CT: control target
= control target key end

     0   :  { %s1957_s18 = smov 0   ;;  %s2463_s0 = inlined_call_operand.vmem [shape: f32[8,2,300], index: 0, kind: input, shape index: {}]   ;;  %s2464_s1 = inlined_call_operand.vmem [shape: f32[8,2,1], index: 1, kind: input, shape index: {}]   ;;  %s2465_s2 = inlined_call_operand.vmem [shape: bf16[2,300,256], index: 2, kind: input, shape index: {}]   ;;  %s2466_s3 = inlined_call_operand.vmem [shape: bf16[2,64,256], index: 3, kind: input, shape index: {}]   ;;  %s2467_s4 = inlined_call_operand.vmem [shape: f32[2,1,256], index: 4, kind: input, shape index: {}]   ;;  %s2468_s5 = inlined_call_operand.vmem [shape: f32[2,8,2,64], index: 5, kind: output, shape index: {}]  }
   0x1 LB: > { %s1687_s19 = sadd.s32 4294967295, %s1921_s18   ;;  %p1691_p0 = scmp.ge.s32.totalorder %s1921_s18, 1  ;;  %s1921_s18 = sphi %s1957_s18, %s15_s18  }
   0x2   : > { %p206_p1 = scmp.lt.s32.totalorder %s1921_s18, 3 }
   0x4   : > { %p207_p2 = pnand %p1691_p0, %p206_p1 }
   0x5   : > { %p243_p3 = scmp.lt.s32.totalorder (!%p207_p2), %s1687_s19, 1 }
   0x6   : > { %210 = sbr.rel (%p207_p2) target bundleno = 3852 (0xf0c), region = 40 }
   0xb   : > { %v1923_v0 = vmov 0   ;;  %s2474_s19 = smov (!%p243_p3, %s1687_s19), 1  ;;  %v263_v8 = vlaneseq  ;;  %v1924_v9 = vmov 1983009808   ;;  %vm646_vm0 = vcmask 1045504  }
   0xc   : > { %728 = vmatprep.mubr.bf16.mxu1 %v1923_v0  ;;  %1785 = vset.pattern.permute.xlu1 %v1923_v0  ;;  %s1771_s20 = smul.u32 304, %s2474_s19  ;;  %s1769_s21 = sshll.u32 %s2474_s19, 6  ;;  %v330_v10 = vunpack.c.l.s4 %v1924_v9  ;;  %v1839_v17 = vld [vmem:[%s2463_s0 + $0x4] ss:$6 sps:$4 sm:$0x33]   ;;  %vm642_vm1 = vcmask 359424  }
   0xd   : > { %1784 = vset.pattern.permute.xlu0 %v1923_v0  ;;  %s1975_s24 = scalar_lea.vmem %s2466_s3, %s1769_s21  ;;  %v1992_v14 = vshrl.u32 %v263_v8, 7  ;;  %v1841_v18 = vld [vmem:[%s2463_s0 + $0x10] ss:$6 sps:$4 sm:$0x33]   ;;  %v1860_v44 = vld [vmem:[%s2463_s0] ss:$6 sps:$4 sm:$0xff]  }
   0xe   : > { %s1980_s27 = scalar_lea.vmem %s2465_s2, %s1771_s20  ;;  %v331_v13 = vunpack.c.0.s8 %v330_v10  ;;  %v1843_v22 = vld [vmem:[%s2463_s0 + $0x1c] ss:$6 sps:$4 sm:$0x33]   ;;  %v1845_v33 = vld [vmem:[%s2463_s0 + $0x28] ss:$6 sps:$4 sm:$0x33]  }
   0xf   : > { %v1786_v1 = vld [vmem:[%s1980_s27 + $0x74] ss:$8 sps:$4 sm:$0xff]   ;;  %v1788_v2 = vld [vmem:[%s1980_s27 + $0x70] ss:$8 sps:$4 sm:$0xff]   ;;  %v1789_v3 = vld [vmem:[%s1980_s27 + $0x64] ss:$8 sps:$4 sm:$0xff]  }
  0x10   : > { %653 = vmatprep.subr.bf16.mxu0 %v1786_v1  ;;  %v1791_v4 = vld [vmem:[%s1980_s27 + $0x60] ss:$8 sps:$4 sm:$0xff]   ;;  %v1792_v5 = vld [vmem:[%s1980_s27 + $0x54] ss:$8 sps:$4 sm:$0xff]   ;;  %v1794_v6 = vld [vmem:[%s1980_s27 + $0x50] ss:$8 sps:$4 sm:$0xff]   ;;  %v334_v21 = vsub.s32 %v331_v13, %v1992_v14 }
  0x11   : > { %654 = vmatpush1.bf16.msra.mxu0 %v1788_v2  ;;  %v1795_v7 = vld [vmem:[%s1980_s27 + $0x44] ss:$8 sps:$4 sm:$0xff]   ;;  %v1797_v11 = vld [vmem:[%s1980_s27 + $0x40] ss:$8 sps:$4 sm:$0xff]   ;;  %v1798_v12 = vld [vmem:[%s1980_s27 + $0x34] ss:$8 sps:$4 sm:$0xff]  }
  0x12   : > { %655 = vmatprep.subr.bf16.mxu0 %v1789_v3  ;;  %v1800_v15 = vld [vmem:[%s1980_s27 + $0x30] ss:$8 sps:$4 sm:$0xff]   ;;  %v1819_v16 = vld [vmem:[%s1980_s27 + $0x124] ss:$8 sps:$4 sm:$0x3f]   ;;  %v342_v29 = vrot.slane %v1839_v17, %v334_v21  ;;  %v356_v30 = vrot.slane %v1841_v18, %v334_v21  ;;  %v377_v34 = vrot.slane %v1843_v22, %v334_v21  ;;  %v391_v38 = vrot.slane %v1845_v33, %v334_v21  ;;  %s1695_s23 = sshll.u32 %s2474_s19, 1 }
  0x13   : > { %v1801_v19 = vld [vmem:[%s1980_s27 + $0x24] ss:$8 sps:$4 sm:$0xff]   ;;  %v1821_v20 = vld [vmem:[%s1980_s27 + $0x120] ss:$8 sps:$4 sm:$0x3f]   ;;  %1736 = vmatprep.subr.msk.bf16.mxu1 %vm646_vm0, %v1819_v16  ;;  %v2043_v49 = vrot.slane %v1860_v44, %v334_v21  ;;  %s256_s26 = scalar_lea.vmem %s2467_s4, %s1695_s23  ;;  %vm803_vm7 = vcmask 523264  }
  0x14   : > { %v1803_v23 = vld [vmem:[%s1980_s27 + $0x20] ss:$8 sps:$4 sm:$0xff]   ;;  %v648_v24 = vsel %vm646_vm0, %v1821_v20, 0  ;;  %v1825_v25 = vld [vmem:[%s1980_s27 + $0x114] ss:$8 sps:$4 sm:$0xff]   ;;  %v359_v37 = vcombine.low %v342_v29, %v356_v30  ;;  %v394_v41 = vcombine.low %v377_v34, %v391_v38  ;;  %v450_v29 = vsub.s32 1, %v1992_v14 }
  0x15   : > { %656 = vmatpush1.bf16.msra.mxu0 %v1791_v4  ;;  %v1804_v26 = vld [vmem:[%s1980_s27 + $0x14] ss:$8 sps:$4 sm:$0xff]   ;;  %707 = vmatpush1.bf16.msra.mxu1 %v648_v24  ;;  %v1827_v27 = vld [vmem:[%s1980_s27 + $0x110] ss:$8 sps:$4 sm:$0xff]   ;;  %v1831_v28 = vld [vmem:[%s1980_s27 + $0x104] ss:$8 sps:$4 sm:$0xff]  }
  0x16   : > { %657 = vmatprep.subr.bf16.mxu0 %v1792_v5  ;;  %708 = vmatprep.subr.bf16.mxu1 %v1825_v25  ;;  %v1806_v31 = vld [vmem:[%s1980_s27 + $0x10] ss:$8 sps:$4 sm:$0xff]   ;;  %v1833_v32 = vld [vmem:[%s1980_s27 + $0x100] ss:$8 sps:$4 sm:$0xff]   ;;  %v1807_v35 = vld [vmem:[%s1980_s27 + $0x4] ss:$8 sps:$4 sm:$0xff]   ;;  %v403_v45 = vpack.c.bf16 %v394_v41, %v359_v37 }
  0x17   : > { %v2020_v36 = vld [vmem:[%s1975_s24 + $0x34] ss:$8 sps:$4 sm:$0xff]   ;;  %v1809_v39 = vld [vmem:[%s1980_s27] ss:$8 sps:$4 sm:$0xff]   ;;  %v2026_v42 = vld [vmem:[%s1975_s24 + $0x30] ss:$8 sps:$4 sm:$0xff]  }
  0x18   : > { %v1810_v40 = vld [vmem:[%s1980_s27 + $0xf4] ss:$8 sps:$4 sm:$0xff]   ;;  %v2029_v43 = vld [vmem:[%s1975_s24 + $0x24] ss:$8 sps:$4 sm:$0xff]   ;;  %v1812_v50 = vld [vmem:[%s1980_s27 + $0xf0] ss:$8 sps:$4 sm:$0xff]  }
  0x19   : > { %658 = vmatpush1.bf16.msra.mxu0 %v1794_v6  ;;  %709 = vmatpush1.bf16.msra.mxu1 %v1827_v27  ;;  %v1861_v46 = vld [vmem:[%s2463_s0 + $0xc] ss:$6 sps:$4 sm:$0xff]   ;;  %v1862_v47 = vld [vmem:[%s2463_s0 + $0x18] ss:$6 sps:$4 sm:$0xff]   ;;  %v446_v27 = vsub.s32 0, %v1992_v14  ;;  %s1770_s17 = sshll.u32 %s2474_s19, 4 }
  0x1a   : > { %659 = vmatprep.subr.bf16.mxu0 %v1795_v7  ;;  %710 = vmatprep.subr.bf16.mxu1 %v1831_v28  ;;  %v1863_v48 = vld [vmem:[%s2463_s0 + $0x24] ss:$6 sps:$4 sm:$0xff]   ;;  %v2046_v51 = vrot.slane %v1861_v46, %v334_v21  ;;  %v370_v52 = vrot.slane %v1862_v47, %v334_v21  ;;  %v2055_v56 = vld [vmem:[%s1975_s24 + $0x14] ss:$8 sps:$4 sm:$0xff]   ;;  %v2064_v62 = vld [vmem:[%s1975_s24 + $0x10] ss:$8 sps:$4 sm:$0xff]   ;;  %s2395_s22 = scalar_lea.vmem %s2468_s5, %s1770_s17 }
  0x1b   : > { %v384_v53 = vrot.slane %v1863_v48, %v334_v21  ;;  %v1813_v54 = vld [vmem:[%s1980_s27 + $0xe4] ss:$8 sps:$4 sm:$0xff]   ;;  %v2051_v55 = vld [vmem:[%s1975_s24 + $0x20] ss:$8 sps:$4 sm:$0xff]   ;;  %v1816_v61 = vld [vmem:[%s1980_s27 + $0xd4] ss:$8 sps:$4 sm:$0xff]  }
  0x1c   : > { %v358_v57 = vcombine.high %v2043_v49, %v2046_v51  ;;  %v1815_v59 = vld [vmem:[%s1980_s27 + $0xe0] ss:$8 sps:$4 sm:$0xff]   ;;  %v2068_v63 = vld [vmem:[%s1975_s24 + $0x4] ss:$8 sps:$4 sm:$0xff]   ;;  %v1818_v1 = vld [vmem:[%s1980_s27 + $0xd0] ss:$8 sps:$4 sm:$0xff]   ;;  %v357_v13 = vcombine.low %v2043_v49, %v2046_v51 }
  0x1d   : > { %660 = vmatpush1.bf16.msra.mxu0 %v1797_v11  ;;  %711 = vmatpush1.bf16.msra.mxu1 %v1833_v32  ;;  %v393_v58 = vcombine.high %v370_v52, %v384_v53  ;;  %v1822_v2 = vld [vmem:[%s1980_s27 + $0xc4] ss:$8 sps:$4 sm:$0xff]   ;;  %v2074_v3 = vld [vmem:[%s1975_s24] ss:$8 sps:$4 sm:$0xff]   ;;  %v1828_v5 = vld [vmem:[%s1980_s27 + $0xb4] ss:$8 sps:$4 sm:$0xff]  }
  0x1e   : > { %661 = vmatprep.subr.bf16.mxu0 %v1798_v12  ;;  %815 = vmatprep.subr.bf16.mxu1 %v2020_v36  ;;  %v1824_v4 = vld [vmem:[%s1980_s27 + $0xc0] ss:$8 sps:$4 sm:$0xff]   ;;  %v1830_v6 = vld [vmem:[%s1980_s27 + $0xb0] ss:$8 sps:$4 sm:$0xff]   ;;  %v1834_v7 = vld [vmem:[%s1980_s27 + $0xa4] ss:$8 sps:$4 sm:$0xff]  }
  0x1f   : > { %v402_v60 = vpack.c.bf16 %v393_v58, %v358_v57  ;;  %v1836_v9 = vld [vmem:[%s1980_s27 + $0xa0] ss:$8 sps:$4 sm:$0xff]   ;;  %v1848_v10 = vld [vmem:[%s1980_s27 + $0x94] ss:$8 sps:$4 sm:$0xff]   ;;  %v1850_v11 = vld [vmem:[%s1980_s27 + $0x90] ss:$8 sps:$4 sm:$0xff]  }
  0x20   : > { %1737 = vmatmul.mubr.msk.bf16.vlgmr.msra.gmra.mxu1 %vm642_vm1, %v403_v45  ;;  %v1854_v12 = vld [vmem:[%s1980_s27 + $0x84] ss:$8 sps:$4 sm:$0xff]   ;;  %v1856_v16 = vld [vmem:[%s1980_s27 + $0x80] ss:$8 sps:$4 sm:$0xff]   ;;  %s1926_s27 = smov 64   ;;  %vm892_vm14 = vcmask 254976  }
  0x21   : > { %662 = vmatpush1.bf16.msra.mxu0 %v1800_v15  ;;  %816 = vmatpush1.bf16.msra.mxu1 %v2026_v42  ;;  %v392_v15 = vcombine.low %v370_v52, %v384_v53  ;;  %v754_v18 = vld [vmem:[%s2464_s1 + $0xe] sm:$0x3]  ;;  %v442_v28 = vld [vmem:[%s256_s26] sm:$0x3]  ;;  %vm900_vm15 = vcmask 517376  }
  0x22   : > { %663 = vmatprep.subr.bf16.mxu0 %v1801_v19  ;;  %817 = vmatprep.subr.bf16.mxu1 %v2029_v43  ;;  %v447_v30 = vrot.slane %v442_v28, %v446_v27  ;;  %v451_v32 = vrot.slane %v442_v28, %v450_v29 }
  0x23   : > { %839 = vmatprep.mubr.bf16.mxu1 %v1923_v0  ;;  %685 = vmatprep.mubr.bf16.mxu0 %v402_v60  ;;  %v401_v17 = vpack.c.bf16 %v392_v15, %v357_v13 }
  0x24   : > { %872 = vperm.xlu1 %1785, %v754_v18  }
  0x25   : > { %664 = vmatpush1.bf16.msra.mxu0 %v1803_v23  ;;  %818 = vmatpush1.bf16.msra.mxu1 %v2051_v55 }
  0x26   : > { %665 = vmatprep.subr.bf16.mxu0 %v1804_v26  ;;  %819 = vmatprep.subr.bf16.mxu1 %v2055_v56 }
  0x29   : > { %666 = vmatpush1.bf16.msra.mxu0 %v1806_v31  ;;  %820 = vmatpush1.bf16.msra.mxu1 %v2064_v62  ;;  %v2120_v31 = vand.u32 127, %v263_v8 }
  0x2a   : > { %667 = vmatprep.subr.bf16.mxu0 %v1807_v35  ;;  %821 = vmatprep.subr.bf16.mxu1 %v2068_v63 }
  0x2b   : > { %v270_v37 = vand.u32 63, %v2120_v31  ;;  %v265_v38 = vadd.s32 128, %v2120_v31  ;;  %vm306_vm5 = vcmp.lt.s32.totalorder %v2120_v31, 32 }
  0x2d   : > { %668 = vmatpush1.bf16.msra.mxu0 %v1809_v39  ;;  %822 = vmatpush1.bf16.msra.mxu1 %v2074_v3  ;;  %vm2124_vm2 = vcmp.lt.s32.totalorder %v270_v37, 32  ;;  %v277_v8 = vand.u32 63, %v265_v38  ;;  %vm299_vm3 = vcmp.lt.s32.totalorder %v265_v38, 192 }
  0x2e   : > { %669 = vmatprep.subr.bf16.mxu0 %v1810_v40  ;;  %926 = vmatprep.subr.bf16.mxu1 %v2020_v36 }
  0x2f   : > { %vm2132_vm4 = vcmp.lt.s32.totalorder %v277_v8, 32 }
  0x30   : > { %840 = vmatmul.mubr.bf16.vlgmr.msra.gmra.mxu1 %v1923_v0 }
  0x31   : > { %670 = vmatpush2.bf16.msra.mxu0 %v1812_v50  ;;  %927 = vmatpush1.bf16.msra.mxu1 %v2026_v42 }
  0x32   : > { %671 = vmatprep.subr.bf16.mxu0 %v1813_v54  ;;  %928 = vmatprep.subr.bf16.mxu1 %v2029_v43 }
  0x33   : > { %950 = vmatprep.mubr.bf16.mxu1 %v1923_v0 }
  0x35   : > { %672 = vmatpush2.bf16.msra.mxu0 %v1815_v59  ;;  %929 = vmatpush1.bf16.msra.mxu1 %v2051_v55 }
  0x36   : > { %673 = vmatprep.subr.bf16.mxu0 %v1816_v61  ;;  %930 = vmatprep.subr.bf16.mxu1 %v2055_v56 }
  0x39   : > { %674 = vmatpush2.bf16.msra.mxu0 %v1818_v1  ;;  %931 = vmatpush1.bf16.msra.mxu1 %v2064_v62 }
  0x3a   : > { %675 = vmatprep.subr.bf16.mxu0 %v1822_v2  ;;  %932 = vmatprep.subr.bf16.mxu1 %v2068_v63 }
  0x3d   : > { %676 = vmatpush2.bf16.msra.mxu0 %v1824_v4  ;;  %933 = vmatpush1.bf16.msra.mxu1 %v2074_v3 }
  0x3e   : > { %677 = vmatprep.subr.bf16.mxu0 %v1828_v5  ;;  %1034 = vmatprep.subr.bf16.mxu1 %v2020_v36  ;;  %v1925_v5 = vmov 0.5  }
  0x41   : > { %678 = vmatpush2.bf16.msra.mxu0 %v1830_v6  ;;  %v2150_v6 = vsel %vm299_vm3, 1.0, %v1925_v5 }
  0x42   : > { %679 = vmatprep.subr.bf16.mxu0 %v1834_v7 }
  0x45   : > { %680 = vmatpush2.bf16.msra.mxu0 %v1836_v9 }
  0x46   : > { %681 = vmatprep.subr.bf16.mxu0 %v1848_v10 }
  0x49   : > { %682 = vmatpush2.bf16.msra.mxu0 %v1850_v11 }
  0x4a   : > { %683 = vmatprep.subr.bf16.mxu0 %v1854_v12 }
  0x4d   : > { %684 = vmatpush2.bf16.msra.mxu0 %v1856_v16 }
  0x4e   : > { %1250 = vmatprep.subr.bf16.mxu0 %v2020_v36 }
  0x50   : > { %686 = vmatmul.mubr.bf16.vlgmr.msra.gmra.mxu0 %v401_v17 }
  0x51   : > { %1251 = vmatpush1.bf16.msra.mxu0 %v2026_v42  ;;  %1274 = vmatprep.mubr.bf16.mxu0 %v1923_v0 }
  0x52   : > { %1252 = vmatprep.subr.bf16.mxu0 %v2029_v43 }
  0x55   : > { %1253 = vmatpush1.bf16.msra.mxu0 %v2051_v55 }
  0x56   : > { %1254 = vmatprep.subr.bf16.mxu0 %v2055_v56 }
  0x59   : > { %1255 = vmatpush1.bf16.msra.mxu0 %v2064_v62 }
  0x5a   : > { %1256 = vmatprep.subr.bf16.mxu0 %v2068_v63 }
  0x5d   : > { %1257 = vmatpush1.bf16.msra.mxu0 %v2074_v3 }
  0x5e   : > { %1448 = vmatprep.subr.bf16.mxu0 %v2020_v36 }
  0xe0   : > { %v730_v19 = vpop.f32.mrf.mxu1 }
  0xe2   : > { %v732_v20 = vpop.f32.mrf.mxu1 }
  0xe4   : > { %v734_v21 = vpop.f32.mrf.mxu1 }
  0xe6   : > { %v736_v22 = vpop.f32.mrf.mxu1 }
  0xf0   : > { %v841_v23 = vpop.f32.mrf.mxu1 }
  0xf2   : > { %v843_v24 = vpop.f32.mrf.mxu1 }
  0xf4   : > { %v845_v25 = vpop.f32.mrf.mxu1 }
  0xf5   : > { %v747_v25 = vld [vmem:[%s2464_s1] sm:$0x3] }
  0xf6   : > { %v846_v26 = vpop.f32.mrf.mxu1 }
 0x110   : > { %v687_v33 = vpop.f32.mrf.mxu0 }
 0x111   : > { %v688_v34 = vadd.f32 %v687_v33, %v447_v30 }
 0x112   : > { %v689_v35 = vpop.f32.mrf.mxu0 }
 0x113   : > { %v731_v39 = vadd.f32 %v730_v19, %v688_v34  ;;  %v690_v40 = vadd.f32 %v689_v35, %v451_v32 }
 0x114   : > { %v691_v41 = vpop.f32.mrf.mxu0 }
 0x115   : > { %v692_v44 = vadd.f32 %v691_v41, %v447_v30  ;;  %v733_v45 = vadd.f32 %v732_v20, %v690_v40  ;;  %v1233_v49 = vrot.slane %v731_v39, 6  ;;  %v1329_v50 = vrot.slane %v731_v39, 2  ;;  %v748_v41 = vld [vmem:[%s2464_s1 + $0x2] sm:$0x3] }
 0x116   : > { %v693_v14 = vpop.f32.mrf.mxu0  ;;  %v2171_v20 = vsel %vm299_vm3, 0.0, %v1925_v5  ;;  %v753_v5 = vld [vmem:[%s2464_s1 + $0xc] sm:$0x3] }
 0x117   : > { %v735_v47 = vadd.f32 %v734_v21, %v692_v44  ;;  %v694_v48 = vadd.f32 %v693_v14, %v451_v32  ;;  %v1234_v58 = vrot.slane %v733_v45, 6  ;;  %v1330_v11 = vrot.slane %v733_v45, 2  ;;  %v2185_v32 = vpop.permute.xlu1 %872 }
 0x119   : > { %v757_v51 = vrot.slane %v735_v47, 6  ;;  %v737_v52 = vadd.f32 %v736_v22, %v694_v48  ;;  %v903_v53 = vrot.slane %v735_v47, 2  ;;  %v2130_v54 = vsel %vm2124_vm2, %v735_v47, %v1233_v49 }
 0x11a   : > { %v2138_v59 = vsel %vm2124_vm2, %v735_v47, %v1329_v50 }
 0x11b   : > { %v2142_v60 = vsel %vm2124_vm2, %v731_v39, %v757_v51  ;;  %v758_v61 = vrot.slane %v737_v52, 6  ;;  %v2146_v1 = vsel %vm2124_vm2, %v731_v39, %v903_v53  ;;  %v904_v2 = vrot.slane %v737_v52, 2 }
 0x11c   : > { %v842_v4 = vadd.f32 %v841_v23, %v2142_v60  ;;  %v2162_v10 = vsel %vm2132_vm4, %v737_v52, %v1234_v58  ;;  %v2167_v15 = vsel %vm2132_vm4, %v737_v52, %v1330_v11  ;;  %v911_v44 = vrot.slane %v2146_v1, 2 }
 0x11d   : > { %v2154_v7 = vsel %vm2132_vm4, %v733_v45, %v758_v61  ;;  %v2158_v9 = vsel %vm2132_vm4, %v733_v45, %v904_v2 }
 0x11e   : > { %v848_v12 = vmul.f32 0.5, %v842_v4  ;;  %v844_v13 = vadd.f32 %v843_v24, %v2154_v7  ;;  %v912_v14 = vrot.slane %v2158_v9, 2 }
 0x120   : > { %1867 = vtanh.f32 %v848_v12  ;;  %v849_v16 = vmul.f32 %v844_v13, %v2150_v6 }
 0x122   : > { %1869 = vtanh.f32 %v849_v16 }
 0x12d   : > { %v1868_v17 = vpop.eup %1867 }
 0x12e   : > { %v852_v18 = vmul.f32 0.5, %v1868_v17 }
 0x12f   : > { %v1870_v19 = vpop.eup %1869 }
 0x130   : > { %v853_v21 = vmul.f32 %v1870_v19, %v2150_v6  ;;  %v854_v22 = vadd.f32 0.5, %v852_v18 }
 0x132   : > { %v855_v23 = vadd.f32 %v853_v21, %v2171_v20  ;;  %v856_v26 = vmul.f32 0.0, %v854_v22 }
 0x134   : > { %v857_v24 = vmul.f32 %v855_v23, %v854_v22 }
 0x136   : > { %859 = vrot.lane.b32.xlu0 %v857_v24, %s1926_s27 }
 0x13a   : > { %867 = vperm.xlu0 %1784, %v747_v25   ;;  %v749_v25 = vld [vmem:[%s2464_s1 + $0x4] sm:$0x3] }
 0x1a8   : > { %v860_v27 = vpop.permute.xlu0 %859 }
 0x1a9   : > { %v862_v28 = vadd.f32 %v860_v27, %v856_v26 }
 0x1ab   : > { %1871 = vtanh.f32 %v862_v28 }
 0x1b5   : > { %v2187_v33 = vpop.permute.xlu0 %867 }
 0x1b6   : > { %v875_v34 = vsel %vm306_vm5, %v2187_v33, %v2185_v32 }
 0x1b7   : > { %vm876_vm6 = vcmp.gt.f32.partialorder %v875_v34, 0.5 }
 0x1b8   : > { %v1872_v29 = vpop.eup %1871 }
 0x1b9   : > { %v2179_v30 = vmul.f32 %v1872_v29, %v855_v23  ;;  %v1019_v29 = vrot.slane %v2142_v60, 4 }
 0x1bb   : > { %878 = vrot.lane.b32.xlu1 %v2179_v30, %s1926_s27 }
 0x1bf   : > { %883 = vrot.lane.b32.xlu1 %v862_v28, %s1926_s27 }
 0x22d   : > { %v879_v35 = vpop.permute.xlu1 %878 }
 0x22e   : > { %v881_v37 = vsel %vm876_vm6, %v879_v35, 0.0 }
 0x22f   : > { %v902_v38 = vpack.c.bf16 %v881_v37, %v881_v37 }
 0x231   : > { %1747 = vmatmul.mubr.msk.bf16.vlgmr.msra.gmra.mxu1 %vm803_vm7, %v902_v38  ;;  %v884_v39 = vpop.permute.xlu1 %883 }
 0x232   : > { %v886_v40 = vsel %vm876_vm6, %v884_v39, 0.0  ;;  %1035 = vmatpush1.bf16.msra.mxu1 %v2026_v42  ;;  %1058 = vmatprep.mubr.bf16.mxu1 %v1923_v0 }
 0x233   : > { %968 = vrot.lane.b32.xlu0 %v886_v40, %s1926_s27  ;;  %1036 = vmatprep.subr.bf16.mxu1 %v2029_v43 }
 0x236   : > { %1037 = vmatpush1.bf16.msra.mxu1 %v2051_v55 }
 0x237   : > { %982 = vperm.xlu0 %1784, %v748_v41   ;;  %1038 = vmatprep.subr.bf16.mxu1 %v2055_v56 }
 0x23a   : > { %1039 = vmatpush1.bf16.msra.mxu1 %v2064_v62 }
 0x23b   : > { %1040 = vmatprep.subr.bf16.mxu1 %v2068_v63 }
 0x23e   : > { %1041 = vmatpush1.bf16.msra.mxu1 %v2074_v3 }
 0x23f   : > { %1140 = vmatprep.subr.bf16.mxu1 %v2020_v36 }
 0x2a5   : > { %v969_v11 = vpop.permute.xlu0 %968 }
 0x2b2   : > { %v2223_v21 = vpop.permute.xlu0 %982 }
 0x2f1   : > { %v952_v45 = vpop.f32.mrf.mxu1 }
 0x2f2   : > { %v953_v46 = vadd.f32 %v952_v45, %v911_v44 }
 0x2f3   : > { %v954_v8 = vpop.f32.mrf.mxu1 }
 0x2f4   : > { %v959_v47 = vmul.f32 0.5, %v953_v46  ;;  %v955_v48 = vadd.f32 %v954_v8, %v912_v14 }
 0x2f5   : > { %v956_v49 = vpop.f32.mrf.mxu1 }
 0x2f6   : > { %1873 = vtanh.f32 %v959_v47  ;;  %v960_v50 = vmul.f32 %v955_v48, %v2150_v6 }
 0x2f7   : > { %v957_v51 = vpop.f32.mrf.mxu1 }
 0x2f8   : > { %1875 = vtanh.f32 %v960_v50 }
 0x303   : > { %v1874_v52 = vpop.eup %1873 }
 0x304   : > { %v963_v53 = vmul.f32 0.5, %v1874_v52 }
 0x305   : > { %v1876_v57 = vpop.eup %1875 }
 0x306   : > { %v964_v58 = vmul.f32 %v1876_v57, %v2150_v6  ;;  %v965_v61 = vadd.f32 0.5, %v963_v53 }
 0x308   : > { %v966_v2 = vadd.f32 %v964_v58, %v2171_v20  ;;  %v971_v12 = vmul.f32 %v969_v11, %v965_v61 }
 0x30a   : > { %v972_v4 = vmul.f32 %v966_v2, %v965_v61 }
 0x30c   : > { %974 = vrot.lane.b32.xlu1 %v972_v4, %s1926_s27 }
 0x310   : > { %987 = vperm.xlu1 %1785, %v753_v5  }
 0x37e   : > { %v975_v13 = vpop.permute.xlu1 %974 }
 0x37f   : > { %v977_v16 = vadd.f32 %v975_v13, %v971_v12  ;;  %v750_v12 = vld [vmem:[%s2464_s1 + $0x6] sm:$0x3] }
 0x381   : > { %1877 = vtanh.f32 %v977_v16  ;;  %998 = vrot.lane.b32.xlu1 %v977_v16, %s1926_s27 }
 0x38b   : > { %v2221_v19 = vpop.permute.xlu1 %987 }
 0x38c   : > { %v990_v22 = vsel %vm306_vm5, %v2223_v21, %v2221_v19 }
 0x38d   : > { %vm991_vm8 = vcmp.gt.f32.partialorder %v990_v22, 0.5  ;;  %v1125_v22 = vrot.slane %v2146_v1, 6 }
 0x38e   : > { %v1878_v17 = vpop.eup %1877 }
 0x38f   : > { %v2217_v18 = vmul.f32 %v1878_v17, %v966_v2 }
 0x391   : > { %993 = vrot.lane.b32.xlu0 %v2217_v18, %s1926_s27 }
 0x3f3   : > { %v999_v23 = vpop.permute.xlu1 %998 }
 0x3f4   : > { %v1001_v24 = vsel %vm991_vm8, %v999_v23, %v886_v40 }
 0x3f5   : > { %1076 = vrot.lane.b32.xlu0 %v1001_v24, %s1926_s27 }
 0x3f9   : > { %1090 = vperm.xlu0 %1784, %v749_v25   ;;  %v1126_v25 = vrot.slane %v2158_v9, 6  ;;  %v751_v9 = vld [vmem:[%s2464_s1 + $0x8] sm:$0x3] }
 0x403   : > { %v994_v26 = vpop.permute.xlu0 %993 }
 0x404   : > { %v996_v27 = vsel %vm991_vm8, %v994_v26, %v881_v37  ;;  %v1020_v37 = vrot.slane %v2154_v7, 4  ;;  %v752_v7 = vld [vmem:[%s2464_s1 + $0xa] sm:$0x3] }
 0x405   : > { %v1016_v28 = vpack.c.bf16 %v996_v27, %v996_v27 }
 0x407   : > { %1750 = vmatmul.mubr.msk.bf16.vlgmr.msra.gmra.mxu1 %vm803_vm7, %v1016_v28 }
 0x408   : > { %1141 = vmatpush1.bf16.msra.mxu1 %v2026_v42  ;;  %1164 = vmatprep.mubr.bf16.mxu1 %v1923_v0 }
 0x409   : > { %1142 = vmatprep.subr.bf16.mxu1 %v2029_v43 }
 0x40c   : > { %1143 = vmatpush1.bf16.msra.mxu1 %v2051_v55 }
 0x40d   : > { %1144 = vmatprep.subr.bf16.mxu1 %v2055_v56 }
 0x410   : > { %1145 = vmatpush1.bf16.msra.mxu1 %v2064_v62 }
 0x411   : > { %1146 = vmatprep.subr.bf16.mxu1 %v2068_v63 }
 0x414   : > { %1147 = vmatpush1.bf16.msra.mxu1 %v2074_v3 }
 0x415   : > { %1352 = vmatprep.subr.bf16.mxu1 %v2020_v36 }
 0x467   : > { %v1077_v50 = vpop.permute.xlu0 %1076 }
 0x474   : > { %v2259_v2 = vpop.permute.xlu0 %1090 }
 0x4c7   : > { %v1060_v34 = vpop.f32.mrf.mxu1 }
 0x4c8   : > { %v1061_v35 = vadd.f32 %v1060_v34, %v1019_v29 }
 0x4c9   : > { %v1062_v38 = vpop.f32.mrf.mxu1 }
 0x4ca   : > { %v1067_v39 = vmul.f32 0.5, %v1061_v35  ;;  %v1063_v40 = vadd.f32 %v1062_v38, %v1020_v37 }
 0x4cb   : > { %v1064_v41 = vpop.f32.mrf.mxu1 }
 0x4cc   : > { %1879 = vtanh.f32 %v1067_v39  ;;  %v1068_v44 = vmul.f32 %v1063_v40, %v2150_v6 }
 0x4cd   : > { %v1065_v45 = vpop.f32.mrf.mxu1 }
 0x4ce   : > { %1881 = vtanh.f32 %v1068_v44 }
 0x4d9   : > { %v1880_v46 = vpop.eup %1879 }
 0x4da   : > { %v1071_v14 = vmul.f32 0.5, %v1880_v46 }
 0x4db   : > { %v1882_v8 = vpop.eup %1881 }
 0x4dc   : > { %v1072_v47 = vmul.f32 %v1882_v8, %v2150_v6  ;;  %v1073_v48 = vadd.f32 0.5, %v1071_v14 }
 0x4de   : > { %v1074_v60 = vadd.f32 %v1072_v47, %v2171_v20  ;;  %v1079_v51 = vmul.f32 %v1077_v50, %v1073_v48 }
 0x4e0   : > { %v1080_v49 = vmul.f32 %v1074_v60, %v1073_v48 }
 0x4e2   : > { %1082 = vrot.lane.b32.xlu1 %v1080_v49, %s1926_s27 }
 0x4e6   : > { %1095 = vperm.xlu1 %1785, %v752_v7  }
 0x554   : > { %v1083_v52 = vpop.permute.xlu1 %1082 }
 0x555   : > { %v1085_v53 = vadd.f32 %v1083_v52, %v1079_v51 }
 0x557   : > { %1883 = vtanh.f32 %v1085_v53  ;;  %1106 = vrot.lane.b32.xlu1 %v1085_v53, %s1926_s27 }
 0x561   : > { %v2257_v61 = vpop.permute.xlu1 %1095 }
 0x562   : > { %v1098_v4 = vsel %vm306_vm5, %v2259_v2, %v2257_v61 }
 0x563   : > { %vm1099_vm9 = vcmp.gt.f32.partialorder %v1098_v4, 0.5 }
 0x564   : > { %v1884_v57 = vpop.eup %1883 }
 0x565   : > { %v2253_v58 = vmul.f32 %v1884_v57, %v1074_v60 }
 0x567   : > { %1101 = vrot.lane.b32.xlu0 %v2253_v58, %s1926_s27  ;;  %v1110_v31 = vmul.f32 %v2259_v2, %v2253_v58 }
 0x5c9   : > { %v1107_v5 = vpop.permute.xlu1 %1106 }
 0x5ca   : > { %v1109_v11 = vsel %vm1099_vm9, %v1107_v5, %v1001_v24 }
 0x5cb   : > { %1182 = vrot.lane.b32.xlu0 %v1109_v11, %s1926_s27 }
 0x5cf   : > { %1196 = vperm.xlu0 %1784, %v750_v12  }
 0x5d9   : > { %v1102_v13 = vpop.permute.xlu0 %1101 }
 0x5da   : > { %v1104_v16 = vsel %vm1099_vm9, %v1102_v13, %v996_v27 }
 0x5db   : > { %v1124_v17 = vpack.c.bf16 %v1104_v16, %v1104_v16 }
 0x5dd   : > { %1753 = vmatmul.mubr.msk.bf16.vlgmr.msra.gmra.mxu1 %vm803_vm7, %v1124_v17 }
 0x5de   : > { %1353 = vmatpush1.bf16.msra.mxu1 %v2026_v42  ;;  %1376 = vmatprep.mubr.bf16.mxu1 %v1923_v0 }
 0x5df   : > { %1354 = vmatprep.subr.bf16.mxu1 %v2029_v43 }
 0x5e2   : > { %1355 = vmatpush1.bf16.msra.mxu1 %v2051_v55 }
 0x5e3   : > { %1356 = vmatprep.subr.bf16.mxu1 %v2055_v56 }
 0x5e6   : > { %1357 = vmatpush1.bf16.msra.mxu1 %v2064_v62 }
 0x5e7   : > { %1358 = vmatprep.subr.bf16.mxu1 %v2068_v63 }
 0x5ea   : > { %1359 = vmatpush1.bf16.msra.mxu1 %v2074_v3 }
 0x5eb   : > { %1542 = vmatprep.subr.bf16.mxu1 %v2020_v36 }
 0x63d   : > { %v1183_v44 = vpop.permute.xlu0 %1182 }
 0x64a   : > { %v2295_v60 = vpop.permute.xlu0 %1196 }
 0x69d   : > { %v1166_v23 = vpop.f32.mrf.mxu1 }
 0x69e   : > { %v1167_v24 = vadd.f32 %v1166_v23, %v1125_v22 }
 0x69f   : > { %v1168_v26 = vpop.f32.mrf.mxu1 }
 0x6a0   : > { %v1173_v27 = vmul.f32 0.5, %v1167_v24  ;;  %v1169_v28 = vadd.f32 %v1168_v26, %v1126_v25 }
 0x6a1   : > { %v1170_v29 = vpop.f32.mrf.mxu1 }
 0x6a2   : > { %1885 = vtanh.f32 %v1173_v27  ;;  %v1174_v34 = vmul.f32 %v1169_v28, %v2150_v6 }
 0x6a3   : > { %v1171_v35 = vpop.f32.mrf.mxu1 }
 0x6a4   : > { %1887 = vtanh.f32 %v1174_v34 }
 0x6af   : > { %v1886_v37 = vpop.eup %1885 }
 0x6b0   : > { %v1177_v38 = vmul.f32 0.5, %v1886_v37 }
 0x6b1   : > { %v1888_v39 = vpop.eup %1887 }
 0x6b2   : > { %v1178_v36 = vmul.f32 %v1888_v39, %v2150_v6  ;;  %v1179_v40 = vadd.f32 0.5, %v1177_v38 }
 0x6b4   : > { %v1180_v1 = vadd.f32 %v1178_v36, %v2171_v20  ;;  %v1185_v45 = vmul.f32 %v1183_v44, %v1179_v40 }
 0x6b6   : > { %v1186_v41 = vmul.f32 %v1180_v1, %v1179_v40 }
 0x6b8   : > { %1188 = vrot.lane.b32.xlu1 %v1186_v41, %s1926_s27 }
 0x6bc   : > { %1201 = vperm.xlu1 %1785, %v751_v9  }
 0x72a   : > { %v1189_v46 = vpop.permute.xlu1 %1188 }
 0x72b   : > { %v1191_v14 = vadd.f32 %v1189_v46, %v1185_v45  ;;  %v1337_v45 = vrot.slane %v2138_v59, 2 }
 0x72d   : > { %1889 = vtanh.f32 %v1191_v14  ;;  %1212 = vrot.lane.b32.xlu1 %v1191_v14, %s1926_s27 }
 0x737   : > { %v2293_v48 = vpop.permute.xlu1 %1201 }
 0x738   : > { %v1204_v49 = vsel %vm306_vm5, %v2295_v60, %v2293_v48  ;;  %v1304_v36 = vsel %vm306_vm5, %v2293_v48, %v2295_v60 }
 0x739   : > { %vm1205_vm10 = vcmp.gt.f32.partialorder %v1204_v49, 0.5  ;;  %vm1305_vm11 = vcmp.gt.f32.partialorder %v1304_v36, 0.5 }
 0x73a   : > { %v1890_v8 = vpop.eup %1889 }
 0x73b   : > { %v2289_v47 = vmul.f32 %v1890_v8, %v1180_v1 }
 0x73d   : > { %1207 = vrot.lane.b32.xlu0 %v2289_v47, %s1926_s27 }
 0x79f   : > { %v1213_v7 = vpop.permute.xlu1 %1212 }
 0x7a0   : > { %v1215_v50 = vsel %vm1205_vm10, %v1213_v7, %v1109_v11 }
 0x7a1   : > { %1292 = vrot.lane.b32.xlu0 %v1215_v50, %s1926_s27 }
 0x7af   : > { %v1208_v51 = vpop.permute.xlu0 %1207 }
 0x7b0   : > { %v1210_v52 = vsel %vm1205_vm10, %v1208_v51, %v1104_v16 }
 0x7b1   : > { %v1230_v53 = vpack.c.bf16 %v1210_v52, %v1210_v52 }
 0x7b3   : > { %1756 = vmatmul.mubr.msk.bf16.vlgmr.msra.gmra.mxu0 %vm803_vm7, %v1230_v53 }
 0x7b4   : > { %1449 = vmatpush1.bf16.msra.mxu0 %v2026_v42  ;;  %1472 = vmatprep.mubr.bf16.mxu0 %v1923_v0 }
 0x7b5   : > { %1450 = vmatprep.subr.bf16.mxu0 %v2029_v43 }
 0x7b8   : > { %1451 = vmatpush1.bf16.msra.mxu0 %v2051_v55 }
 0x7b9   : > { %1452 = vmatprep.subr.bf16.mxu0 %v2055_v56 }
 0x7bc   : > { %1453 = vmatpush1.bf16.msra.mxu0 %v2064_v62 }
 0x7bd   : > { %1454 = vmatprep.subr.bf16.mxu0 %v2068_v63 }
 0x7c0   : > { %1455 = vmatpush1.bf16.msra.mxu0 %v2074_v3 }
 0x813   : > { %v1293_v29 = vpop.permute.xlu0 %1292 }
 0x873   : > { %v1276_v57 = vpop.f32.mrf.mxu0 }
 0x874   : > { %v1277_v4 = vadd.f32 %v1276_v57, %v2130_v54 }
 0x875   : > { %v1278_v5 = vpop.f32.mrf.mxu0 }
 0x876   : > { %v1283_v11 = vmul.f32 0.5, %v1277_v4  ;;  %v1279_v12 = vadd.f32 %v1278_v5, %v2162_v10 }
 0x877   : > { %v1280_v13 = vpop.f32.mrf.mxu0 }
 0x878   : > { %1891 = vtanh.f32 %v1283_v11  ;;  %v1284_v16 = vmul.f32 %v1279_v12, %v2150_v6  ;;  %v1406_v13 = vsel %vm306_vm5, %v2257_v61, %v2259_v2 }
 0x879   : > { %v1281_v17 = vpop.f32.mrf.mxu0  ;;  %vm1407_vm12 = vcmp.gt.f32.partialorder %v1406_v13, 0.5 }
 0x87a   : > { %1893 = vtanh.f32 %v1284_v16 }
 0x885   : > { %v1892_v22 = vpop.eup %1891 }
 0x886   : > { %v1287_v23 = vmul.f32 0.5, %v1892_v22 }
 0x887   : > { %v1894_v24 = vpop.eup %1893 }
 0x888   : > { %v1288_v25 = vmul.f32 %v1894_v24, %v2150_v6  ;;  %v1289_v26 = vadd.f32 0.5, %v1287_v23 }
 0x88a   : > { %v1290_v27 = vadd.f32 %v1288_v25, %v2171_v20  ;;  %v1295_v34 = vmul.f32 %v1293_v29, %v1289_v26  ;;  %v1433_v25 = vrot.slane %v2130_v54, 4 }
 0x88c   : > { %v1296_v28 = vmul.f32 %v1290_v27, %v1289_v26 }
 0x88e   : > { %1298 = vrot.lane.b32.xlu1 %v1296_v28, %s1926_s27  ;;  %v1434_v28 = vrot.slane %v2162_v10, 4 }
 0x900   : > { %v1299_v35 = vpop.permute.xlu1 %1298 }
 0x901   : > { %v1301_v37 = vadd.f32 %v1299_v35, %v1295_v34 }
 0x903   : > { %1895 = vtanh.f32 %v1301_v37  ;;  %1312 = vrot.lane.b32.xlu1 %v1301_v37, %s1926_s27 }
 0x910   : > { %v1896_v38 = vpop.eup %1895 }
 0x911   : > { %v2318_v39 = vmul.f32 %v1896_v38, %v1290_v27 }
 0x913   : > { %1307 = vrot.lane.b32.xlu0 %v2318_v39, %s1926_s27 }
 0x975   : > { %v1313_v40 = vpop.permute.xlu1 %1312 }
 0x976   : > { %v1315_v1 = vsel %vm1305_vm11, %v1313_v40, %v1215_v50 }
 0x977   : > { %1394 = vrot.lane.b32.xlu0 %v1315_v1, %s1926_s27 }
 0x985   : > { %v1308_v41 = vpop.permute.xlu0 %1307 }
 0x986   : > { %v1310_v9 = vsel %vm1305_vm11, %v1308_v41, %v1210_v52 }
 0x987   : > { %v1328_v44 = vpack.c.bf16 %v1310_v9, %v1310_v9 }
 0x989   : > { %1759 = vmatmul.mubr.msk.bf16.vlgmr.msra.gmra.mxu1 %vm803_vm7, %v1328_v44 }
 0x98a   : > { %1543 = vmatpush1.bf16.msra.mxu1 %v2026_v42  ;;  %1566 = vmatprep.mubr.bf16.mxu1 %v1923_v0  ;;  %v1338_v42 = vrot.slane %v2167_v15, 2 }
 0x98b   : > { %1544 = vmatprep.subr.bf16.mxu1 %v2029_v43 }
 0x98e   : > { %1545 = vmatpush1.bf16.msra.mxu1 %v2051_v55 }
 0x98f   : > { %1546 = vmatprep.subr.bf16.mxu1 %v2055_v56 }
 0x992   : > { %1547 = vmatpush1.bf16.msra.mxu1 %v2064_v62 }
 0x993   : > { %1548 = vmatprep.subr.bf16.mxu1 %v2068_v63 }
 0x996   : > { %1549 = vmatpush1.bf16.msra.mxu1 %v2074_v3 }
 0x9e9   : > { %v1395_v53 = vpop.permute.xlu0 %1394 }
 0xa49   : > { %v1378_v46 = vpop.f32.mrf.mxu1 }
 0xa4a   : > { %v1379_v14 = vadd.f32 %v1378_v46, %v1337_v45 }
 0xa4b   : > { %v1380_v8 = vpop.f32.mrf.mxu1 }
 0xa4c   : > { %v1385_v0 = vmul.f32 0.5, %v1379_v14  ;;  %v1381_v49 = vadd.f32 %v1380_v8, %v1338_v42 }
 0xa4d   : > { %v1382_v43 = vpop.f32.mrf.mxu1 }
 0xa4e   : > { %1897 = vtanh.f32 %v1385_v0  ;;  %v1386_v55 = vmul.f32 %v1381_v49, %v2150_v6  ;;  %v1502_v49 = vsel %vm306_vm5, %v2221_v19, %v2223_v21 }
 0xa4f   : > { %v1383_v56 = vpop.f32.mrf.mxu1  ;;  %vm1503_vm13 = vcmp.gt.f32.partialorder %v1502_v49, 0.5 }
 0xa50   : > { %1899 = vtanh.f32 %v1386_v55  ;;  %v887_v56 = vmul.f32 %v2187_v33, %v2179_v30 }
 0xa5b   : > { %v1898_v62 = vpop.eup %1897 }
 0xa5c   : > { %v1389_v7 = vmul.f32 0.5, %v1898_v62  ;;  %v1002_v62 = vmul.f32 %v2223_v21, %v2217_v18 }
 0xa5d   : > { %v1900_v63 = vpop.eup %1899 }
 0xa5e   : > { %v1390_v3 = vmul.f32 %v1900_v63, %v2150_v6  ;;  %v1391_v50 = vadd.f32 0.5, %v1389_v7  ;;  %v1216_v63 = vmul.f32 %v2295_v60, %v2289_v47 }
 0xa60   : > { %v1392_v51 = vadd.f32 %v1390_v3, %v2171_v20  ;;  %v1397_v57 = vmul.f32 %v1395_v53, %v1391_v50 }
 0xa62   : > { %v1398_v52 = vmul.f32 %v1392_v51, %v1391_v50 }
 0xa64   : > { %1400 = vrot.lane.b32.xlu1 %v1398_v52, %s1926_s27 }
 0xad6   : > { %v1401_v4 = vpop.permute.xlu1 %1400 }
 0xad7   : > { %v1403_v5 = vadd.f32 %v1401_v4, %v1397_v57 }
 0xad9   : > { %1901 = vtanh.f32 %v1403_v5  ;;  %1414 = vrot.lane.b32.xlu1 %v1403_v5, %s1926_s27 }
 0xae6   : > { %v1902_v11 = vpop.eup %1901 }
 0xae7   : > { %v2343_v12 = vmul.f32 %v1902_v11, %v1392_v51  ;;  %v1316_v51 = vmul.f32 %v2318_v39, %v2293_v48 }
 0xae9   : > { %1409 = vrot.lane.b32.xlu0 %v2343_v12, %s1926_s27  ;;  %v1418_v52 = vmul.f32 %v2343_v12, %v2257_v61 }
 0xb4b   : > { %v1415_v16 = vpop.permute.xlu1 %1414 }
 0xb4c   : > { %v1417_v17 = vsel %vm1407_vm12, %v1415_v16, %v1315_v1  ;;  %v1527_v16 = vrot.slane %v2138_v59, 6 }
 0xb4d   : > { %1490 = vrot.lane.b32.xlu0 %v1417_v17, %s1926_s27 }
 0xb5b   : > { %v1410_v22 = vpop.permute.xlu0 %1409 }
 0xb5c   : > { %v1412_v23 = vsel %vm1407_vm12, %v1410_v22, %v1310_v9 }
 0xb5d   : > { %v1430_v24 = vpack.c.bf16 %v1412_v23, %v1412_v23 }
 0xb5f   : > { %1762 = vmatmul.mubr.msk.bf16.vlgmr.msra.gmra.mxu0 %vm803_vm7, %v1430_v24 }
 0xbbf   : > { %v1491_v10 = vpop.permute.xlu0 %1490 }
 0xc1f   : > { %v1474_v26 = vpop.f32.mrf.mxu0 }
 0xc20   : > { %v1475_v27 = vadd.f32 %v1474_v26, %v1433_v25 }
 0xc21   : > { %v1476_v29 = vpop.f32.mrf.mxu0 }
 0xc22   : > { %v1481_v34 = vmul.f32 0.5, %v1475_v27  ;;  %v1477_v35 = vadd.f32 %v1476_v29, %v1434_v28 }
 0xc23   : > { %v1478_v37 = vpop.f32.mrf.mxu0 }
 0xc24   : > { %1903 = vtanh.f32 %v1481_v34  ;;  %v1482_v38 = vmul.f32 %v1477_v35, %v2150_v6 }
 0xc25   : > { %v1479_v36 = vpop.f32.mrf.mxu0 }
 0xc26   : > { %1905 = vtanh.f32 %v1482_v38 }
 0xc31   : > { %v1904_v40 = vpop.eup %1903 }
 0xc32   : > { %v1485_v1 = vmul.f32 0.5, %v1904_v40 }
 0xc33   : > { %v1906_v41 = vpop.eup %1905 }
 0xc34   : > { %v1486_v9 = vmul.f32 %v1906_v41, %v2150_v6  ;;  %v1487_v44 = vadd.f32 0.5, %v1485_v1  ;;  %v1009_v1 = vmul.f32 %v2221_v19, %v2217_v18  ;;  %v1117_v41 = vmul.f32 %v2257_v61, %v2253_v58 }
 0xc36   : > { %v1488_v54 = vadd.f32 %v1486_v9, %v2171_v20  ;;  %v1493_v46 = vmul.f32 %v1491_v10, %v1487_v44 }
 0xc38   : > { %v1494_v45 = vmul.f32 %v1488_v54, %v1487_v44 }
 0xc3a   : > { %1496 = vrot.lane.b32.xlu1 %v1494_v45, %s1926_s27 }
 0xcac   : > { %v1497_v14 = vpop.permute.xlu1 %1496 }
 0xcad   : > { %v1499_v42 = vadd.f32 %v1497_v14, %v1493_v46 }
 0xcaf   : > { %1907 = vtanh.f32 %v1499_v42  ;;  %1510 = vrot.lane.b32.xlu1 %v1499_v42, %s1926_s27 }
 0xcbc   : > { %v1908_v8 = vpop.eup %1907 }
 0xcbd   : > { %v2360_v0 = vmul.f32 %v1908_v8, %v1488_v54 }
 0xcbf   : > { %1505 = vrot.lane.b32.xlu0 %v2360_v0, %s1926_s27  ;;  %v1514_v53 = vmul.f32 %v2360_v0, %v2221_v19  ;;  %v1520_v18 = vmul.f32 %v2360_v0, %v2223_v21 }
 0xd21   : > { %v1511_v43 = vpop.permute.xlu1 %1510 }
 0xd22   : > { %v1513_v55 = vsel %vm1503_vm13, %v1511_v43, %v1417_v17 }
 0xd23   : > { %1584 = vrot.lane.b32.xlu0 %v1513_v55, %s1926_s27 }
 0xd27   : > { %889 = vrot.lane.b32.xlu0 %v887_v56, %s1926_s27 }
 0xd2b   : > { %1004 = vrot.lane.b32.xlu0 %v1002_v62, %s1926_s27 }
 0xd2f   : > { %1112 = vrot.lane.b32.xlu0 %v1110_v31, %s1926_s27 }
 0xd31   : > { %v1506_v7 = vpop.permute.xlu0 %1505 }
 0xd32   : > { %v1508_v3 = vsel %vm1503_vm13, %v1506_v7, %v1412_v23  ;;  %v1528_v23 = vrot.slane %v2167_v15, 6  ;;  %v894_v15 = vmul.f32 %v2185_v32, %v2179_v30  ;;  %v1424_v30 = vmul.f32 %v2343_v12, %v2259_v2 }
 0xd33   : > { %v1526_v50 = vpack.c.bf16 %v1508_v3, %v1508_v3  ;;  %1218 = vrot.lane.b32.xlu0 %v1216_v63, %s1926_s27 }
 0xd35   : > { %1765 = vmatmul.mubr.msk.bf16.vlgmr.msra.gmra.mxu1 %vm803_vm7, %v1526_v50 }
 0xd37   : > { %1318 = vrot.lane.b32.xlu0 %v1316_v51, %s1926_s27 }
 0xd3b   : > { %1420 = vrot.lane.b32.xlu0 %v1418_v52, %s1926_s27 }
 0xd3f   : > { %1516 = vrot.lane.b32.xlu0 %v1514_v53, %s1926_s27 }
 0xd95   : > { %v1585_v57 = vpop.permute.xlu0 %1584 }
 0xd99   : > { %v890_v4 = vpop.permute.xlu0 %889 }
 0xd9a   : > { %893 = vst.msk [vmem:[%s2395_s22] sm:$0x3] %vm892_vm14, %v890_v4 }
 0xd9d   : > { %v1005_v5 = vpop.permute.xlu0 %1004 }
 0xd9e   : > { %1748 = vst.msk [vmem:[%s2395_s22 + $0x2] sm:$0x3] %vm892_vm14, %v1005_v5 }
 0xda1   : > { %v1113_v11 = vpop.permute.xlu0 %1112 }
 0xda2   : > { %1751 = vst.msk [vmem:[%s2395_s22 + $0x4] sm:$0x3] %vm892_vm14, %v1113_v11 }
 0xda5   : > { %v1219_v13 = vpop.permute.xlu0 %1218 }
 0xda6   : > { %1754 = vst.msk [vmem:[%s2395_s22 + $0x6] sm:$0x3] %vm892_vm14, %v1219_v13 }
 0xda9   : > { %v1319_v19 = vpop.permute.xlu0 %1318 }
 0xdf5   : > { %v1568_v17 = vpop.f32.mrf.mxu1 }
 0xdf6   : > { %v1569_v22 = vadd.f32 %v1568_v17, %v1527_v16 }
 0xdf7   : > { %v1570_v24 = vpop.f32.mrf.mxu1 }
 0xdf8   : > { %v1575_v25 = vmul.f32 0.5, %v1569_v22  ;;  %v1571_v26 = vadd.f32 %v1570_v24, %v1528_v23 }
 0xdf9   : > { %v1572_v27 = vpop.f32.mrf.mxu1 }
 0xdfa   : > { %1909 = vtanh.f32 %v1575_v25  ;;  %v1576_v28 = vmul.f32 %v1571_v26, %v2150_v6 }
 0xdfb   : > { %v1573_v29 = vpop.f32.mrf.mxu1 }
 0xdfc   : > { %1911 = vtanh.f32 %v1576_v28 }
 0xe07   : > { %v1910_v34 = vpop.eup %1909 }
 0xe08   : > { %v1579_v35 = vmul.f32 0.5, %v1910_v34 }
 0xe09   : > { %v1912_v37 = vpop.eup %1911 }
 0xe0a   : > { %v1580_v38 = vmul.f32 %v1912_v37, %v2150_v6  ;;  %v1581_v36 = vadd.f32 0.5, %v1579_v35  ;;  %v1223_v6 = vmul.f32 %v2293_v48, %v2289_v47  ;;  %v1421_v48 = vpop.permute.xlu0 %1420 }
 0xe0c   : > { %v1582_v59 = vadd.f32 %v1580_v38, %v2171_v20  ;;  %v1322_v20 = vmul.f32 %v2318_v39, %v2295_v60  ;;  %v1587_v58 = vmul.f32 %v1585_v57, %v1581_v36 }
 0xe0e   : > { %v1588_v40 = vmul.f32 %v1582_v59, %v1581_v36  ;;  %v1517_v39 = vpop.permute.xlu0 %1516 }
 0xe10   : > { %1590 = vrot.lane.b32.xlu1 %v1588_v40, %s1926_s27 }
 0xe14   : > { %896 = vrot.lane.b32.xlu1 %v894_v15, %s1926_s27 }
 0xe18   : > { %1011 = vrot.lane.b32.xlu1 %v1009_v1, %s1926_s27 }
 0xe1c   : > { %1119 = vrot.lane.b32.xlu1 %v1117_v41, %s1926_s27 }
 0xe20   : > { %1225 = vrot.lane.b32.xlu1 %v1223_v6, %s1926_s27 }
 0xe24   : > { %1324 = vrot.lane.b32.xlu1 %v1322_v20, %s1926_s27 }
 0xe28   : > { %1426 = vrot.lane.b32.xlu1 %v1424_v30, %s1926_s27 }
 0xe2c   : > { %1522 = vrot.lane.b32.xlu1 %v1520_v18, %s1926_s27 }
 0xe82   : > { %v1591_v61 = vpop.permute.xlu1 %1590 }
 0xe83   : > { %v1593_v47 = vadd.f32 %v1591_v61, %v1587_v58 }
 0xe85   : > { %1913 = vtanh.f32 %v1593_v47 }
 0xe86   : > { %v897_v2 = vpop.permute.xlu1 %896 }
 0xe87   : > { %1746 = vst.msk [vmem:[%s2395_s22 + $0xe] sm:$0x3] %vm900_vm15, %v897_v2 }
 0xe8a   : > { %v1012_v60 = vpop.permute.xlu1 %1011 }
 0xe8b   : > { %1749 = vst.msk [vmem:[%s2395_s22 + $0xc] sm:$0x3] %vm900_vm15, %v1012_v60 }
 0xe8c   : > { %1763 = vst.msk [vmem:[%s2395_s22 + $0xc] sm:$0x3] %vm892_vm14, %v1517_v39 }
 0xe8e   : > { %v1120_v21 = vpop.permute.xlu1 %1119 }
 0xe8f   : > { %1752 = vst.msk [vmem:[%s2395_s22 + $0xa] sm:$0x3] %vm900_vm15, %v1120_v21 }
 0xe90   : > { %1760 = vst.msk [vmem:[%s2395_s22 + $0xa] sm:$0x3] %vm892_vm14, %v1421_v48 }
 0xe92   : > { %v1914_v12 = vpop.eup %1913  ;;  %v1226_v9 = vpop.permute.xlu1 %1225 }
 0xe93   : > { %1755 = vst.msk [vmem:[%s2395_s22 + $0x8] sm:$0x3] %vm900_vm15, %v1226_v9  ;;  %v1595_v44 = vmul.f32 %v1914_v12, %v1582_v59 }
 0xe94   : > { %1757 = vst.msk [vmem:[%s2395_s22 + $0x8] sm:$0x3] %vm892_vm14, %v1319_v19 }
 0xe95   : > { %v1602_v54 = vmul.f32 %v1595_v44, %v2187_v33  ;;  %v1596_v45 = vmul.f32 %v1595_v44, %v2185_v32 }
 0xe96   : > { %v1325_v10 = vpop.permute.xlu1 %1324 }
 0xe97   : > { %1758 = vst.msk [vmem:[%s2395_s22 + $0x6] sm:$0x3] %vm900_vm15, %v1325_v10  ;;  %1604 = vrot.lane.b32.xlu1 %v1602_v54, %s1926_s27  ;;  %1598 = vrot.lane.b32.xlu0 %v1596_v45, %s1926_s27 }
 0xe9a   : > { %v1427_v46 = vpop.permute.xlu1 %1426 }
 0xe9b   : > { %1761 = vst.msk [vmem:[%s2395_s22 + $0x4] sm:$0x3] %vm900_vm15, %v1427_v46 }
 0xe9e   : > { %v1523_v14 = vpop.permute.xlu1 %1522 }
 0xe9f   : > { %1764 = vst.msk [vmem:[%s2395_s22 + $0x2] sm:$0x3] %vm900_vm15, %v1523_v14 }
 0xf09   : > { %v1605_v42 = vpop.permute.xlu1 %1604  ;;  %v1599_v8 = vpop.permute.xlu0 %1598 }
 0xf0a   : > { %1607 = vst.msk [vmem:[%s2395_s22] sm:$0x3] %vm900_vm15, %v1605_v42 }
 0xf0b   : > { %1766 = vst.msk [vmem:[%s2395_s22 + $0xe] sm:$0x3] %vm892_vm14, %v1599_v8 }
 0xf0c PF: > { %s15_s18 = sadd.s32 1, %s1921_s18  }
 0xf0d   : > { %p12_p4 = scmp.ge.s32.totalorder %s15_s18, 4  }
 0xf0f   :  { %14 = sbr.rel (!%p12_p4) target bundleno = 1 (0x1), region = 83 }

</bundles_post_ra>
